<compile_context>
chip_gen: v5e
topology: v5e:2x2
jax: 0.10.0
libtpu: 0.0.40
codegen_flags: <defaults>
</compile_context>

<pallas_src>
import math
import jax
import jax.numpy as jnp
from jax.experimental import pallas as pl
from jax.experimental.pallas import tpu as pltpu

D = 128      # d_model
H = 8        # nhead
HD = D // H  # head dim = 16
FF = 2048    # dim_feedforward (nn.TransformerEncoderLayer default)
V = 2048     # output vocab (Linear(128, 2048))
NLAYERS = 8
EPS = 1e-5   # nn.LayerNorm default


def _layernorm(x, w, b):
    mu = jnp.mean(x, axis=-1, keepdims=True)
    xc = x - mu
    var = jnp.mean(xc * xc, axis=-1, keepdims=True)
    return xc * jax.lax.rsqrt(var + EPS) * w + b


def _make_fused_kernel(n_batch, ns):
    """ns = N*S tokens, rows interleaved as row = seq * N + batch."""
    scale = 1.0 / math.sqrt(HD)

    def kernel(x_ref, wqkv_ref, bqkv_ref, wo_ref, bo_ref, ln1w_ref, ln1b_ref,
               w1_ref, b1_ref, w2_ref, b2_ref, ln2w_ref, ln2b_ref,
               hw_ref, hb_ref, o_ref, x_scr):
        l = pl.program_id(0)

        # Load the (tiny) activations into resident VMEM scratch once.
        @pl.when(l == 0)
        def _():
            x_scr[...] = x_ref[...]

        x = x_scr[...]                                    # (NS, D) f32 residual stream

        # ---------------- multi-head self-attention ----------------
        qkv = jnp.dot(x.astype(jnp.bfloat16), wqkv_ref[0],
                      preferred_element_type=jnp.float32) + bqkv_ref[0]   # (NS, 3D)

        # Block-diagonal mask: a query row may only attend to keys of the same
        # batch element (rows are interleaved: row = s * N + n).
        row = jax.lax.broadcasted_iota(jnp.int32, (ns, ns), 0)
        col = jax.lax.broadcasted_iota(jnp.int32, (ns, ns), 1)
        same = (row % n_batch) == (col % n_batch)

        ctxs = []
        for h in range(H):
            qh = (qkv[:, h * HD:(h + 1) * HD] * scale).astype(jnp.bfloat16)
            kh = qkv[:, D + h * HD:D + (h + 1) * HD].astype(jnp.bfloat16)
            vh = qkv[:, 2 * D + h * HD:2 * D + (h + 1) * HD].astype(jnp.bfloat16)
            s = jax.lax.dot_general(qh, kh, (((1,), (1,)), ((), ())),
                                    preferred_element_type=jnp.float32)   # (NS, NS)
            s = jnp.where(same, s, -1e30)
            s = s - jnp.max(s, axis=-1, keepdims=True)
            p = jnp.exp(s)
            p = p * pl.reciprocal(jnp.sum(p, axis=-1, keepdims=True), approx=True)
            ctxs.append(jnp.dot(p.astype(jnp.bfloat16), vh,
                                preferred_element_type=jnp.float32))      # (NS, HD)
        ctx = jnp.concatenate(ctxs, axis=-1)              # (NS, D) == concat(heads)
        attn = jnp.dot(ctx.astype(jnp.bfloat16), wo_ref[0],
                       preferred_element_type=jnp.float32) + bo_ref[0]    # single Wo dot

        # residual + post-LayerNorm 1
        x = _layernorm(x + attn, ln1w_ref[0], ln1b_ref[0])

        # ---------------- feed-forward (relu) ----------------
        h1 = jnp.dot(x.astype(jnp.bfloat16), w1_ref[0],
                     preferred_element_type=jnp.float32) + b1_ref[0]
        h1 = jnp.maximum(h1, 0.0)
        h2 = jnp.dot(h1.astype(jnp.bfloat16), w2_ref[0],
                     preferred_element_type=jnp.float32) + b2_ref[0]

        # residual + post-LayerNorm 2
        x = _layernorm(x + h2, ln2w_ref[0], ln2b_ref[0])
        x_scr[...] = x

        # -------- fused head: Linear(128, 2048) + log_softmax (last layer only) --------
        @pl.when(l == NLAYERS - 1)
        def _():
            logits = jnp.dot(x.astype(jnp.bfloat16), hw_ref[...],
                             preferred_element_type=jnp.float32) + hb_ref[...]  # (NS, V)
            m = jnp.max(logits, axis=-1, keepdims=True)
            z = logits - m
            lse = jnp.log(jnp.sum(jnp.exp(z), axis=-1, keepdims=True))
            o_ref[...] = z - lse

    return kernel


def fused_forward(x_flat, params, n_batch):
    ns = x_flat.shape[0]

    def lspec(*shape):      # per-layer stacked weight: streamed, indexed by layer id
        nz = (0,) * len(shape)
        return pl.BlockSpec((1,) + tuple(shape), lambda l, nz=nz: (l,) + nz)

    def cspec(*shape):      # constant block: DMA'd once, resident across the grid
        nz = (0,) * len(shape)
        return pl.BlockSpec(tuple(shape), lambda l, nz=nz: nz)

    kernel = _make_fused_kernel(n_batch, ns)

    return pl.pallas_call(
        kernel,
        out_shape=jax.ShapeDtypeStruct((ns, V), jnp.float32),
        grid=(NLAYERS,),
        in_specs=[
            cspec(ns, D),                    # x
            lspec(D, 3 * D), lspec(1, 3 * D),    # wqkv / bqkv
            lspec(D, D),     lspec(1, D),        # wo / bo
            lspec(1, D),     lspec(1, D),        # ln1 w / b
            lspec(D, FF),    lspec(1, FF),       # w1 / b1
            lspec(FF, D),    lspec(1, D),        # w2 / b2
            lspec(1, D),     lspec(1, D),        # ln2 w / b
            cspec(D, V),     cspec(1, V),        # head w / b
        ],
        out_specs=cspec(ns, V),
        scratch_shapes=[pltpu.VMEM((ns, D), jnp.float32)],   # resident activations
        compiler_params=pltpu.CompilerParams(
            dimension_semantics=("arbitrary",)),             # layer axis is sequential
    )(x_flat,
      params["wqkv"], params["bqkv"], params["wo"], params["bo"],
      params["ln1w"], params["ln1b"], params["w1"], params["b1"],
      params["w2"], params["b2"], params["ln2w"], params["ln2b"],
      params["head_w"], params["head_b"])


def init_model_params(key):
    keys = jax.random.split(key, NLAYERS + 1)
    s = 0.05
    names = ["wqkv", "bqkv", "wo", "bo", "w1", "b1", "w2", "b2"]
    shapes = {"wqkv": (D, 3 * D), "bqkv": (1, 3 * D), "wo": (D, D), "bo": (1, D),
              "w1": (D, FF), "b1": (1, FF), "w2": (FF, D), "b2": (1, D)}
    cols = {n: [] for n in names}
    for k in keys[:NLAYERS]:
        ks = jax.random.split(k, 8)
        for kk, n in zip(ks, names):
            cols[n].append(jax.random.normal(kk, shapes[n], jnp.float32) * s)
    params = {n: jnp.stack(v) for n, v in cols.items()}       # leading layer dim
    for n in ["wqkv", "wo", "w1", "w2"]:                      # stream big weights as bf16
        params[n] = params[n].astype(jnp.bfloat16)
    params["ln1w"] = jnp.ones((NLAYERS, 1, D), jnp.float32)
    params["ln1b"] = jnp.zeros((NLAYERS, 1, D), jnp.float32)
    params["ln2w"] = jnp.ones((NLAYERS, 1, D), jnp.float32)
    params["ln2b"] = jnp.zeros((NLAYERS, 1, D), jnp.float32)
    kw, kb = jax.random.split(keys[-1])
    params["head_w"] = (jax.random.normal(kw, (D, V), jnp.float32) * s).astype(jnp.bfloat16)
    params["head_b"] = jax.random.normal(kb, (1, V), jnp.float32) * s
    return params


def ctc_model_forward(tpl, params):
    x, y, xl, yl = tpl  # y, xl, yl unused by forward (as in the PyTorch code)
    n, s = x.shape[0], x.shape[1]
    # x.view(x.size(1), x.size(0), -1): row-major reinterpretation -> (S, N, D)
    x = jnp.reshape(x, (s, n, -1)).astype(jnp.float32)
    # flatten tokens row-major: row = seq * N + batch  (pure reshape, no transpose)
    x_flat = jnp.reshape(x, (s * n, D))
    out_flat = fused_forward(x_flat, params, n)          # (S*N, V) log-probs
    return jnp.reshape(out_flat, (s, n, V))              # (S, N, V), free reshape


# ---------------- pure-JAX reference (same bf16 weights) for validation ----------------
def reference_forward(tpl, params):
    x, _, _, _ = tpl
    n, s = x.shape[0], x.shape[1]
    x = jnp.reshape(x, (s, n, -1)).astype(jnp.float32)
    x = jnp.reshape(x, (s * n, D))
    ns = x.shape[0]
    scale = 1.0 / math.sqrt(HD)
    same = (jnp.arange(ns)[:, None] % n) == (jnp.arange(ns)[None, :] % n)

    def dot(a, b):
        return jnp.dot(a.astype(jnp.bfloat16), b.astype(jnp.bfloat16),
                       preferred_element_type=jnp.float32)

    for l in range(NLAYERS):
        qkv = dot(x, params["wqkv"][l]) + params["bqkv"][l]
        ctxs = []
        for h in range(H):
            qh = qkv[:, h * HD:(h + 1) * HD] * scale
            kh = qkv[:, D + h * HD:D + (h + 1) * HD]
            vh = qkv[:, 2 * D + h * HD:2 * D + (h + 1) * HD]
            sc = jnp.where(same, dot(qh, kh.T), -1e30)
            p = jax.nn.softmax(sc, axis=-1)
            ctxs.append(dot(p, vh))
        attn = dot(jnp.concatenate(ctxs, -1), params["wo"][l]) + params["bo"][l]
        x = _layernorm(x + attn, params["ln1w"][l], params["ln1b"][l])
        h1 = jnp.maximum(dot(x, params["w1"][l]) + params["b1"][l], 0.0)
        h2 = dot(h1, params["w2"][l]) + params["b2"][l]
        x = _layernorm(x + h2, params["ln2w"][l], params["ln2b"][l])
    logits = dot(x, params["head_w"]) + params["head_b"]
    return jnp.reshape(jax.nn.log_softmax(logits, axis=-1), (s, n, V))


if __name__ == "__main__":
    key = jax.random.PRNGKey(0)
    k_x, k_p = jax.random.split(key)

    B, T = 2, 8  # x given as (B, T, 128); forward views it to (T, B, 128) = (seq, batch, d)
    x = jax.random.normal(k_x, (B, T, D), jnp.float32)
    y = jnp.zeros((B, 4), jnp.int32)          # unused by forward
    xl = jnp.full((B,), T, jnp.int32)         # unused by forward
    yl = jnp.full((B,), 4, jnp.int32)         # unused by forward
    tpl = (x, y, xl, yl)

    params = init_model_params(k_p)
    out = ctc_model_forward(tpl, params)
    out = jax.block_until_ready(out)

    assert out.shape == (T, B, V), out.shape
    # log_softmax rows should sum to ~1 in prob space (exact property)
    assert bool(jnp.all(jnp.abs(jnp.sum(jnp.exp(out), axis=-1) - 1.0) < 1e-3))
    # match the pure-JAX reference using the same bf16 weights
    ref = reference_forward(tpl, params)
    assert float(jnp.max(jnp.abs(out - ref))) < 5e-2
    print("KERNEL_OK")
</pallas_src>

<mosaic_0001>
module attributes {stable_mosaic.version = 11 : i64} {
  func.func @kernel(%arg0: i32, %arg1: memref<16x128xf32, #tpu.memory_space<vmem>>, %arg2: memref<1x128x384xbf16, #tpu.memory_space<vmem>>, %arg3: memref<1x1x384xf32, #tpu.memory_space<vmem>>, %arg4: memref<1x128x128xbf16, #tpu.memory_space<vmem>>, %arg5: memref<1x1x128xf32, #tpu.memory_space<vmem>>, %arg6: memref<1x1x128xf32, #tpu.memory_space<vmem>>, %arg7: memref<1x1x128xf32, #tpu.memory_space<vmem>>, %arg8: memref<1x128x2048xbf16, #tpu.memory_space<vmem>>, %arg9: memref<1x1x2048xf32, #tpu.memory_space<vmem>>, %arg10: memref<1x2048x128xbf16, #tpu.memory_space<vmem>>, %arg11: memref<1x1x128xf32, #tpu.memory_space<vmem>>, %arg12: memref<1x1x128xf32, #tpu.memory_space<vmem>>, %arg13: memref<1x1x128xf32, #tpu.memory_space<vmem>>, %arg14: memref<128x2048xbf16, #tpu.memory_space<vmem>>, %arg15: memref<1x2048xf32, #tpu.memory_space<vmem>>, %arg16: memref<16x2048xf32, #tpu.memory_space<vmem>>, %arg17: memref<16x128xf32, #tpu.memory_space<vmem>>) attributes {dimension_semantics = [#tpu.dimension_semantics<arbitrary>], iteration_bounds = array<i64: 8>, scalar_prefetch = 0 : i64, scratch_operands = 1 : i64, tpu.core_type = #tpu.core_type<tc>, window_params = [{pipeline_mode = #tpu.pipeline_mode<synchronous>, transform_indices = @transform_0, window_bounds = array<i64: 16, 128>}, {transform_indices = @transform_1, window_bounds = array<i64: 1, 128, 384>}, {transform_indices = @transform_2, window_bounds = array<i64: 1, 1, 384>}, {transform_indices = @transform_3, window_bounds = array<i64: 1, 128, 128>}, {transform_indices = @transform_4, window_bounds = array<i64: 1, 1, 128>}, {transform_indices = @transform_5, window_bounds = array<i64: 1, 1, 128>}, {transform_indices = @transform_6, window_bounds = array<i64: 1, 1, 128>}, {transform_indices = @transform_7, window_bounds = array<i64: 1, 128, 2048>}, {transform_indices = @transform_8, window_bounds = array<i64: 1, 1, 2048>}, {transform_indices = @transform_9, window_bounds = array<i64: 1, 2048, 128>}, {transform_indices = @transform_10, window_bounds = array<i64: 1, 1, 128>}, {transform_indices = @transform_11, window_bounds = array<i64: 1, 1, 128>}, {transform_indices = @transform_12, window_bounds = array<i64: 1, 1, 128>}, {pipeline_mode = #tpu.pipeline_mode<synchronous>, transform_indices = @transform_13, window_bounds = array<i64: 128, 2048>}, {pipeline_mode = #tpu.pipeline_mode<synchronous>, transform_indices = @transform_14, window_bounds = array<i64: 1, 2048>}, {pipeline_mode = #tpu.pipeline_mode<synchronous>, transform_indices = @transform_15, window_bounds = array<i64: 16, 2048>}]} {
    %c0_i32 = arith.constant 0 : i32
    %0 = arith.cmpi eq, %arg0, %c0_i32 : i32
    %1 = arith.extui %0 : i1 to i32
    %c0_i32_0 = arith.constant 0 : i32
    %2 = arith.cmpi ne, %1, %c0_i32_0 : i32
    scf.if %2 {
      %c0_113 = arith.constant 0 : index
      %c0_114 = arith.constant 0 : index
      %312 = vector.load %arg1[%c0_113, %c0_114] : memref<16x128xf32, #tpu.memory_space<vmem>>, vector<16x128xf32>
      %c0_115 = arith.constant 0 : index
      %c0_116 = arith.constant 0 : index
      %313 = vector.load %arg17[%c0_115, %c0_116] : memref<16x128xf32, #tpu.memory_space<vmem>>, vector<16x128xf32>
      tpu.vector_store %arg17[%c0_115, %c0_116], %312 {strides = array<i32>} : memref<16x128xf32, #tpu.memory_space<vmem>>, vector<16x128xf32>,
    } else {
    }
    %c0 = arith.constant 0 : index
    %c0_1 = arith.constant 0 : index
    %3 = vector.load %arg17[%c0, %c0_1] : memref<16x128xf32, #tpu.memory_space<vmem>>, vector<16x128xf32>
    %4 = arith.truncf %3 : vector<16x128xf32> to vector<16x128xbf16>
    %c0_2 = arith.constant 0 : index
    %c0_3 = arith.constant 0 : index
    %c0_4 = arith.constant 0 : index
    %5 = vector.load %arg2[%c0_2, %c0_3, %c0_4] : memref<1x128x384xbf16, #tpu.memory_space<vmem>>, vector<1x128x384xbf16>
    %6 = vector.shape_cast %5 : vector<1x128x384xbf16> to vector<128x384xbf16>
    %cst = arith.constant dense<0.000000e+00> : vector<16x384xf32>
    %7 = tpu.matmul %4, %6, %cst {dimension_numbers = #tpu.dot_dimension_numbers<[1], [0], [0], [1], [0, 0, 1, 1], [], []>} : vector<16x128xbf16>, vector<128x384xbf16>, vector<16x384xf32> -> vector<16x384xf32>
    %c0_5 = arith.constant 0 : index
    %c0_6 = arith.constant 0 : index
    %c0_7 = arith.constant 0 : index
    %8 = vector.load %arg3[%c0_5, %c0_6, %c0_7] : memref<1x1x384xf32, #tpu.memory_space<vmem>>, vector<1x1x384xf32>
    %9 = vector.shape_cast %8 : vector<1x1x384xf32> to vector<1x384xf32>
    %10 = vector.broadcast %9 : vector<1x384xf32> to vector<16x384xf32>
    %11 = arith.addf %7, %10 : vector<16x384xf32>
    %12 = tpu.iota {dimensions = array<i32: 0>} : vector<16x16xi32>
    %13 = tpu.iota {dimensions = array<i32: 1>} : vector<16x16xi32>
    %c2_i32 = arith.constant 2 : i32
    %c0_i32_8 = arith.constant 0 : i32
    %14 = arith.cmpi eq, %c2_i32, %c0_i32_8 : i32
    %c1_i32 = arith.constant 1 : i32
    %15 = arith.select %14, %c1_i32, %c2_i32 : i32
    %16 = vector.broadcast %15 : i32 to vector<16x16xi32>
    %17 = arith.remsi %12, %16 : vector<16x16xi32>
    %c0_i32_9 = arith.constant 0 : i32
    %18 = vector.broadcast %c0_i32_9 : i32 to vector<16x16xi32>
    %19 = arith.cmpi ne, %17, %18 : vector<16x16xi32>
    %c0_i32_10 = arith.constant 0 : i32
    %20 = vector.broadcast %c0_i32_10 : i32 to vector<16x16xi32>
    %21 = arith.cmpi slt, %17, %20 : vector<16x16xi32>
    %c0_i32_11 = arith.constant 0 : i32
    %22 = arith.cmpi slt, %15, %c0_i32_11 : i32
    %23 = vector.broadcast %22 : i1 to vector<16x16xi1>
    %24 = vector.broadcast %23 : vector<16x16xi1> to vector<16x16xi1>
    %25 = arith.xori %21, %24 : vector<16x16xi1>
    %26 = arith.andi %25, %19 : vector<16x16xi1>
    %27 = vector.broadcast %15 : i32 to vector<16x16xi32>
    %28 = arith.addi %17, %27 : vector<16x16xi32>
    %29 = arith.select %26, %28, %17 : vector<16x16xi1>, vector<16x16xi32>
    %c2_i32_12 = arith.constant 2 : i32
    %c0_i32_13 = arith.constant 0 : i32
    %30 = arith.cmpi eq, %c2_i32_12, %c0_i32_13 : i32
    %c1_i32_14 = arith.constant 1 : i32
    %31 = arith.select %30, %c1_i32_14, %c2_i32_12 : i32
    %32 = vector.broadcast %31 : i32 to vector<16x16xi32>
    %33 = arith.remsi %13, %32 : vector<16x16xi32>
    %c0_i32_15 = arith.constant 0 : i32
    %34 = vector.broadcast %c0_i32_15 : i32 to vector<16x16xi32>
    %35 = arith.cmpi ne, %33, %34 : vector<16x16xi32>
    %c0_i32_16 = arith.constant 0 : i32
    %36 = vector.broadcast %c0_i32_16 : i32 to vector<16x16xi32>
    %37 = arith.cmpi slt, %33, %36 : vector<16x16xi32>
    %c0_i32_17 = arith.constant 0 : i32
    %38 = arith.cmpi slt, %31, %c0_i32_17 : i32
    %39 = vector.broadcast %38 : i1 to vector<16x16xi1>
    %40 = vector.broadcast %39 : vector<16x16xi1> to vector<16x16xi1>
    %41 = arith.xori %37, %40 : vector<16x16xi1>
    %42 = arith.andi %41, %35 : vector<16x16xi1>
    %43 = vector.broadcast %31 : i32 to vector<16x16xi32>
    %44 = arith.addi %33, %43 : vector<16x16xi32>
    %45 = arith.select %42, %44, %33 : vector<16x16xi1>, vector<16x16xi32>
    %46 = arith.cmpi eq, %29, %45 : vector<16x16xi32>
    %47 = vector.extract_strided_slice %11 {offsets = [0, 0], sizes = [16, 16], strides = [1, 1]} : vector<16x384xf32> to vector<16x16xf32>
    %cst_18 = arith.constant 2.500000e-01 : f32
    %48 = vector.broadcast %cst_18 : f32 to vector<16x16xf32>
    %49 = arith.mulf %47, %48 : vector<16x16xf32>
    %50 = arith.truncf %49 : vector<16x16xf32> to vector<16x16xbf16>
    %51 = vector.extract_strided_slice %11 {offsets = [0, 128], sizes = [16, 16], strides = [1, 1]} : vector<16x384xf32> to vector<16x16xf32>
    %52 = arith.truncf %51 : vector<16x16xf32> to vector<16x16xbf16>
    %53 = vector.extract_strided_slice %11 {offsets = [0, 256], sizes = [16, 16], strides = [1, 1]} : vector<16x384xf32> to vector<16x16xf32>
    %54 = arith.truncf %53 : vector<16x16xf32> to vector<16x16xbf16>
    %cst_19 = arith.constant dense<0.000000e+00> : vector<16x16xf32>
    %55 = tpu.matmul %50, %52, %cst_19 {dimension_numbers = #tpu.dot_dimension_numbers<[1], [1], [0], [0], [0, 0, 1, 0], [], []>} : vector<16x16xbf16>, vector<16x16xbf16>, vector<16x16xf32> -> vector<16x16xf32>
    %cst_20 = arith.constant -1.000000e+30 : f32
    %56 = vector.broadcast %cst_20 : f32 to vector<16x16xf32>
    %57 = arith.select %46, %55, %56 : vector<16x16xi1>, vector<16x16xf32>
    %cst_21 = arith.constant dense<0xFF800000> : vector<16xf32>
    %58 = vector.multi_reduction <maximumf>, %57, %cst_21 [1] : vector<16x16xf32> to vector<16xf32>
    %59 = vector.shape_cast %58 : vector<16xf32> to vector<16x1xf32>
    %60 = vector.broadcast %59 : vector<16x1xf32> to vector<16x16xf32>
    %61 = arith.subf %57, %60 : vector<16x16xf32>
    %62 = math.exp %61 : vector<16x16xf32>
    %cst_22 = arith.constant dense<0.000000e+00> : vector<16xf32>
    %63 = vector.multi_reduction <add>, %62, %cst_22 [1] : vector<16x16xf32> to vector<16xf32>
    %64 = vector.shape_cast %63 : vector<16xf32> to vector<16x1xf32>
    %65 = tpu.reciprocal %64 {approx = true} : vector<16x1xf32> -> vector<16x1xf32>
    %66 = vector.broadcast %65 : vector<16x1xf32> to vector<16x16xf32>
    %67 = arith.mulf %62, %66 : vector<16x16xf32>
    %68 = arith.truncf %67 : vector<16x16xf32> to vector<16x16xbf16>
    %cst_23 = arith.constant dense<0.000000e+00> : vector<16x16xf32>
    %69 = tpu.matmul %68, %54, %cst_23 {dimension_numbers = #tpu.dot_dimension_numbers<[1], [0], [0], [1], [0, 0, 1, 1], [], []>} : vector<16x16xbf16>, vector<16x16xbf16>, vector<16x16xf32> -> vector<16x16xf32>
    %70 = vector.extract_strided_slice %11 {offsets = [0, 16], sizes = [16, 16], strides = [1, 1]} : vector<16x384xf32> to vector<16x16xf32>
    %cst_24 = arith.constant 2.500000e-01 : f32
    %71 = vector.broadcast %cst_24 : f32 to vector<16x16xf32>
    %72 = arith.mulf %70, %71 : vector<16x16xf32>
    %73 = arith.truncf %72 : vector<16x16xf32> to vector<16x16xbf16>
    %74 = vector.extract_strided_slice %11 {offsets = [0, 144], sizes = [16, 16], strides = [1, 1]} : vector<16x384xf32> to vector<16x16xf32>
    %75 = arith.truncf %74 : vector<16x16xf32> to vector<16x16xbf16>
    %76 = vector.extract_strided_slice %11 {offsets = [0, 272], sizes = [16, 16], strides = [1, 1]} : vector<16x384xf32> to vector<16x16xf32>
    %77 = arith.truncf %76 : vector<16x16xf32> to vector<16x16xbf16>
    %cst_25 = arith.constant dense<0.000000e+00> : vector<16x16xf32>
    %78 = tpu.matmul %73, %75, %cst_25 {dimension_numbers = #tpu.dot_dimension_numbers<[1], [1], [0], [0], [0, 0, 1, 0], [], []>} : vector<16x16xbf16>, vector<16x16xbf16>, vector<16x16xf32> -> vector<16x16xf32>
    %cst_26 = arith.constant -1.000000e+30 : f32
    %79 = vector.broadcast %cst_26 : f32 to vector<16x16xf32>
    %80 = arith.select %46, %78, %79 : vector<16x16xi1>, vector<16x16xf32>
    %cst_27 = arith.constant dense<0xFF800000> : vector<16xf32>
    %81 = vector.multi_reduction <maximumf>, %80, %cst_27 [1] : vector<16x16xf32> to vector<16xf32>
    %82 = vector.shape_cast %81 : vector<16xf32> to vector<16x1xf32>
    %83 = vector.broadcast %82 : vector<16x1xf32> to vector<16x16xf32>
    %84 = arith.subf %80, %83 : vector<16x16xf32>
    %85 = math.exp %84 : vector<16x16xf32>
    %cst_28 = arith.constant dense<0.000000e+00> : vector<16xf32>
    %86 = vector.multi_reduction <add>, %85, %cst_28 [1] : vector<16x16xf32> to vector<16xf32>
    %87 = vector.shape_cast %86 : vector<16xf32> to vector<16x1xf32>
    %88 = tpu.reciprocal %87 {approx = true} : vector<16x1xf32> -> vector<16x1xf32>
    %89 = vector.broadcast %88 : vector<16x1xf32> to vector<16x16xf32>
    %90 = arith.mulf %85, %89 : vector<16x16xf32>
    %91 = arith.truncf %90 : vector<16x16xf32> to vector<16x16xbf16>
    %cst_29 = arith.constant dense<0.000000e+00> : vector<16x16xf32>
    %92 = tpu.matmul %91, %77, %cst_29 {dimension_numbers = #tpu.dot_dimension_numbers<[1], [0], [0], [1], [0, 0, 1, 1], [], []>} : vector<16x16xbf16>, vector<16x16xbf16>, vector<16x16xf32> -> vector<16x16xf32>
    %93 = vector.extract_strided_slice %11 {offsets = [0, 32], sizes = [16, 16], strides = [1, 1]} : vector<16x384xf32> to vector<16x16xf32>
    %cst_30 = arith.constant 2.500000e-01 : f32
    %94 = vector.broadcast %cst_30 : f32 to vector<16x16xf32>
    %95 = arith.mulf %93, %94 : vector<16x16xf32>
    %96 = arith.truncf %95 : vector<16x16xf32> to vector<16x16xbf16>
    %97 = vector.extract_strided_slice %11 {offsets = [0, 160], sizes = [16, 16], strides = [1, 1]} : vector<16x384xf32> to vector<16x16xf32>
    %98 = arith.truncf %97 : vector<16x16xf32> to vector<16x16xbf16>
    %99 = vector.extract_strided_slice %11 {offsets = [0, 288], sizes = [16, 16], strides = [1, 1]} : vector<16x384xf32> to vector<16x16xf32>
    %100 = arith.truncf %99 : vector<16x16xf32> to vector<16x16xbf16>
    %cst_31 = arith.constant dense<0.000000e+00> : vector<16x16xf32>
    %101 = tpu.matmul %96, %98, %cst_31 {dimension_numbers = #tpu.dot_dimension_numbers<[1], [1], [0], [0], [0, 0, 1, 0], [], []>} : vector<16x16xbf16>, vector<16x16xbf16>, vector<16x16xf32> -> vector<16x16xf32>
    %cst_32 = arith.constant -1.000000e+30 : f32
    %102 = vector.broadcast %cst_32 : f32 to vector<16x16xf32>
    %103 = arith.select %46, %101, %102 : vector<16x16xi1>, vector<16x16xf32>
    %cst_33 = arith.constant dense<0xFF800000> : vector<16xf32>
    %104 = vector.multi_reduction <maximumf>, %103, %cst_33 [1] : vector<16x16xf32> to vector<16xf32>
    %105 = vector.shape_cast %104 : vector<16xf32> to vector<16x1xf32>
    %106 = vector.broadcast %105 : vector<16x1xf32> to vector<16x16xf32>
    %107 = arith.subf %103, %106 : vector<16x16xf32>
    %108 = math.exp %107 : vector<16x16xf32>
    %cst_34 = arith.constant dense<0.000000e+00> : vector<16xf32>
    %109 = vector.multi_reduction <add>, %108, %cst_34 [1] : vector<16x16xf32> to vector<16xf32>
    %110 = vector.shape_cast %109 : vector<16xf32> to vector<16x1xf32>
    %111 = tpu.reciprocal %110 {approx = true} : vector<16x1xf32> -> vector<16x1xf32>
    %112 = vector.broadcast %111 : vector<16x1xf32> to vector<16x16xf32>
    %113 = arith.mulf %108, %112 : vector<16x16xf32>
    %114 = arith.truncf %113 : vector<16x16xf32> to vector<16x16xbf16>
    %cst_35 = arith.constant dense<0.000000e+00> : vector<16x16xf32>
    %115 = tpu.matmul %114, %100, %cst_35 {dimension_numbers = #tpu.dot_dimension_numbers<[1], [0], [0], [1], [0, 0, 1, 1], [], []>} : vector<16x16xbf16>, vector<16x16xbf16>, vector<16x16xf32> -> vector<16x16xf32>
    %116 = vector.extract_strided_slice %11 {offsets = [0, 48], sizes = [16, 16], strides = [1, 1]} : vector<16x384xf32> to vector<16x16xf32>
    %cst_36 = arith.constant 2.500000e-01 : f32
    %117 = vector.broadcast %cst_36 : f32 to vector<16x16xf32>
    %118 = arith.mulf %116, %117 : vector<16x16xf32>
    %119 = arith.truncf %118 : vector<16x16xf32> to vector<16x16xbf16>
    %120 = vector.extract_strided_slice %11 {offsets = [0, 176], sizes = [16, 16], strides = [1, 1]} : vector<16x384xf32> to vector<16x16xf32>
    %121 = arith.truncf %120 : vector<16x16xf32> to vector<16x16xbf16>
    %122 = vector.extract_strided_slice %11 {offsets = [0, 304], sizes = [16, 16], strides = [1, 1]} : vector<16x384xf32> to vector<16x16xf32>
    %123 = arith.truncf %122 : vector<16x16xf32> to vector<16x16xbf16>
    %cst_37 = arith.constant dense<0.000000e+00> : vector<16x16xf32>
    %124 = tpu.matmul %119, %121, %cst_37 {dimension_numbers = #tpu.dot_dimension_numbers<[1], [1], [0], [0], [0, 0, 1, 0], [], []>} : vector<16x16xbf16>, vector<16x16xbf16>, vector<16x16xf32> -> vector<16x16xf32>
    %cst_38 = arith.constant -1.000000e+30 : f32
    %125 = vector.broadcast %cst_38 : f32 to vector<16x16xf32>
    %126 = arith.select %46, %124, %125 : vector<16x16xi1>, vector<16x16xf32>
    %cst_39 = arith.constant dense<0xFF800000> : vector<16xf32>
    %127 = vector.multi_reduction <maximumf>, %126, %cst_39 [1] : vector<16x16xf32> to vector<16xf32>
    %128 = vector.shape_cast %127 : vector<16xf32> to vector<16x1xf32>
    %129 = vector.broadcast %128 : vector<16x1xf32> to vector<16x16xf32>
    %130 = arith.subf %126, %129 : vector<16x16xf32>
    %131 = math.exp %130 : vector<16x16xf32>
    %cst_40 = arith.constant dense<0.000000e+00> : vector<16xf32>
    %132 = vector.multi_reduction <add>, %131, %cst_40 [1] : vector<16x16xf32> to vector<16xf32>
    %133 = vector.shape_cast %132 : vector<16xf32> to vector<16x1xf32>
    %134 = tpu.reciprocal %133 {approx = true} : vector<16x1xf32> -> vector<16x1xf32>
    %135 = vector.broadcast %134 : vector<16x1xf32> to vector<16x16xf32>
    %136 = arith.mulf %131, %135 : vector<16x16xf32>
    %137 = arith.truncf %136 : vector<16x16xf32> to vector<16x16xbf16>
    %cst_41 = arith.constant dense<0.000000e+00> : vector<16x16xf32>
    %138 = tpu.matmul %137, %123, %cst_41 {dimension_numbers = #tpu.dot_dimension_numbers<[1], [0], [0], [1], [0, 0, 1, 1], [], []>} : vector<16x16xbf16>, vector<16x16xbf16>, vector<16x16xf32> -> vector<16x16xf32>
    %139 = vector.extract_strided_slice %11 {offsets = [0, 64], sizes = [16, 16], strides = [1, 1]} : vector<16x384xf32> to vector<16x16xf32>
    %cst_42 = arith.constant 2.500000e-01 : f32
    %140 = vector.broadcast %cst_42 : f32 to vector<16x16xf32>
    %141 = arith.mulf %139, %140 : vector<16x16xf32>
    %142 = arith.truncf %141 : vector<16x16xf32> to vector<16x16xbf16>
    %143 = vector.extract_strided_slice %11 {offsets = [0, 192], sizes = [16, 16], strides = [1, 1]} : vector<16x384xf32> to vector<16x16xf32>
    %144 = arith.truncf %143 : vector<16x16xf32> to vector<16x16xbf16>
    %145 = vector.extract_strided_slice %11 {offsets = [0, 320], sizes = [16, 16], strides = [1, 1]} : vector<16x384xf32> to vector<16x16xf32>
    %146 = arith.truncf %145 : vector<16x16xf32> to vector<16x16xbf16>
    %cst_43 = arith.constant dense<0.000000e+00> : vector<16x16xf32>
    %147 = tpu.matmul %142, %144, %cst_43 {dimension_numbers = #tpu.dot_dimension_numbers<[1], [1], [0], [0], [0, 0, 1, 0], [], []>} : vector<16x16xbf16>, vector<16x16xbf16>, vector<16x16xf32> -> vector<16x16xf32>
    %cst_44 = arith.constant -1.000000e+30 : f32
    %148 = vector.broadcast %cst_44 : f32 to vector<16x16xf32>
    %149 = arith.select %46, %147, %148 : vector<16x16xi1>, vector<16x16xf32>
    %cst_45 = arith.constant dense<0xFF800000> : vector<16xf32>
    %150 = vector.multi_reduction <maximumf>, %149, %cst_45 [1] : vector<16x16xf32> to vector<16xf32>
    %151 = vector.shape_cast %150 : vector<16xf32> to vector<16x1xf32>
    %152 = vector.broadcast %151 : vector<16x1xf32> to vector<16x16xf32>
    %153 = arith.subf %149, %152 : vector<16x16xf32>
    %154 = math.exp %153 : vector<16x16xf32>
    %cst_46 = arith.constant dense<0.000000e+00> : vector<16xf32>
    %155 = vector.multi_reduction <add>, %154, %cst_46 [1] : vector<16x16xf32> to vector<16xf32>
    %156 = vector.shape_cast %155 : vector<16xf32> to vector<16x1xf32>
    %157 = tpu.reciprocal %156 {approx = true} : vector<16x1xf32> -> vector<16x1xf32>
    %158 = vector.broadcast %157 : vector<16x1xf32> to vector<16x16xf32>
    %159 = arith.mulf %154, %158 : vector<16x16xf32>
    %160 = arith.truncf %159 : vector<16x16xf32> to vector<16x16xbf16>
    %cst_47 = arith.constant dense<0.000000e+00> : vector<16x16xf32>
    %161 = tpu.matmul %160, %146, %cst_47 {dimension_numbers = #tpu.dot_dimension_numbers<[1], [0], [0], [1], [0, 0, 1, 1], [], []>} : vector<16x16xbf16>, vector<16x16xbf16>, vector<16x16xf32> -> vector<16x16xf32>
    %162 = vector.extract_strided_slice %11 {offsets = [0, 80], sizes = [16, 16], strides = [1, 1]} : vector<16x384xf32> to vector<16x16xf32>
    %cst_48 = arith.constant 2.500000e-01 : f32
    %163 = vector.broadcast %cst_48 : f32 to vector<16x16xf32>
    %164 = arith.mulf %162, %163 : vector<16x16xf32>
    %165 = arith.truncf %164 : vector<16x16xf32> to vector<16x16xbf16>
    %166 = vector.extract_strided_slice %11 {offsets = [0, 208], sizes = [16, 16], strides = [1, 1]} : vector<16x384xf32> to vector<16x16xf32>
    %167 = arith.truncf %166 : vector<16x16xf32> to vector<16x16xbf16>
    %168 = vector.extract_strided_slice %11 {offsets = [0, 336], sizes = [16, 16], strides = [1, 1]} : vector<16x384xf32> to vector<16x16xf32>
    %169 = arith.truncf %168 : vector<16x16xf32> to vector<16x16xbf16>
    %cst_49 = arith.constant dense<0.000000e+00> : vector<16x16xf32>
    %170 = tpu.matmul %165, %167, %cst_49 {dimension_numbers = #tpu.dot_dimension_numbers<[1], [1], [0], [0], [0, 0, 1, 0], [], []>} : vector<16x16xbf16>, vector<16x16xbf16>, vector<16x16xf32> -> vector<16x16xf32>
    %cst_50 = arith.constant -1.000000e+30 : f32
    %171 = vector.broadcast %cst_50 : f32 to vector<16x16xf32>
    %172 = arith.select %46, %170, %171 : vector<16x16xi1>, vector<16x16xf32>
    %cst_51 = arith.constant dense<0xFF800000> : vector<16xf32>
    %173 = vector.multi_reduction <maximumf>, %172, %cst_51 [1] : vector<16x16xf32> to vector<16xf32>
    %174 = vector.shape_cast %173 : vector<16xf32> to vector<16x1xf32>
    %175 = vector.broadcast %174 : vector<16x1xf32> to vector<16x16xf32>
    %176 = arith.subf %172, %175 : vector<16x16xf32>
    %177 = math.exp %176 : vector<16x16xf32>
    %cst_52 = arith.constant dense<0.000000e+00> : vector<16xf32>
    %178 = vector.multi_reduction <add>, %177, %cst_52 [1] : vector<16x16xf32> to vector<16xf32>
    %179 = vector.shape_cast %178 : vector<16xf32> to vector<16x1xf32>
    %180 = tpu.reciprocal %179 {approx = true} : vector<16x1xf32> -> vector<16x1xf32>
    %181 = vector.broadcast %180 : vector<16x1xf32> to vector<16x16xf32>
    %182 = arith.mulf %177, %181 : vector<16x16xf32>
    %183 = arith.truncf %182 : vector<16x16xf32> to vector<16x16xbf16>
    %cst_53 = arith.constant dense<0.000000e+00> : vector<16x16xf32>
    %184 = tpu.matmul %183, %169, %cst_53 {dimension_numbers = #tpu.dot_dimension_numbers<[1], [0], [0], [1], [0, 0, 1, 1], [], []>} : vector<16x16xbf16>, vector<16x16xbf16>, vector<16x16xf32> -> vector<16x16xf32>
    %185 = vector.extract_strided_slice %11 {offsets = [0, 96], sizes = [16, 16], strides = [1, 1]} : vector<16x384xf32> to vector<16x16xf32>
    %cst_54 = arith.constant 2.500000e-01 : f32
    %186 = vector.broadcast %cst_54 : f32 to vector<16x16xf32>
    %187 = arith.mulf %185, %186 : vector<16x16xf32>
    %188 = arith.truncf %187 : vector<16x16xf32> to vector<16x16xbf16>
    %189 = vector.extract_strided_slice %11 {offsets = [0, 224], sizes = [16, 16], strides = [1, 1]} : vector<16x384xf32> to vector<16x16xf32>
    %190 = arith.truncf %189 : vector<16x16xf32> to vector<16x16xbf16>
    %191 = vector.extract_strided_slice %11 {offsets = [0, 352], sizes = [16, 16], strides = [1, 1]} : vector<16x384xf32> to vector<16x16xf32>
    %192 = arith.truncf %191 : vector<16x16xf32> to vector<16x16xbf16>
    %cst_55 = arith.constant dense<0.000000e+00> : vector<16x16xf32>
    %193 = tpu.matmul %188, %190, %cst_55 {dimension_numbers = #tpu.dot_dimension_numbers<[1], [1], [0], [0], [0, 0, 1, 0], [], []>} : vector<16x16xbf16>, vector<16x16xbf16>, vector<16x16xf32> -> vector<16x16xf32>
    %cst_56 = arith.constant -1.000000e+30 : f32
    %194 = vector.broadcast %cst_56 : f32 to vector<16x16xf32>
    %195 = arith.select %46, %193, %194 : vector<16x16xi1>, vector<16x16xf32>
    %cst_57 = arith.constant dense<0xFF800000> : vector<16xf32>
    %196 = vector.multi_reduction <maximumf>, %195, %cst_57 [1] : vector<16x16xf32> to vector<16xf32>
    %197 = vector.shape_cast %196 : vector<16xf32> to vector<16x1xf32>
    %198 = vector.broadcast %197 : vector<16x1xf32> to vector<16x16xf32>
    %199 = arith.subf %195, %198 : vector<16x16xf32>
    %200 = math.exp %199 : vector<16x16xf32>
    %cst_58 = arith.constant dense<0.000000e+00> : vector<16xf32>
    %201 = vector.multi_reduction <add>, %200, %cst_58 [1] : vector<16x16xf32> to vector<16xf32>
    %202 = vector.shape_cast %201 : vector<16xf32> to vector<16x1xf32>
    %203 = tpu.reciprocal %202 {approx = true} : vector<16x1xf32> -> vector<16x1xf32>
    %204 = vector.broadcast %203 : vector<16x1xf32> to vector<16x16xf32>
    %205 = arith.mulf %200, %204 : vector<16x16xf32>
    %206 = arith.truncf %205 : vector<16x16xf32> to vector<16x16xbf16>
    %cst_59 = arith.constant dense<0.000000e+00> : vector<16x16xf32>
    %207 = tpu.matmul %206, %192, %cst_59 {dimension_numbers = #tpu.dot_dimension_numbers<[1], [0], [0], [1], [0, 0, 1, 1], [], []>} : vector<16x16xbf16>, vector<16x16xbf16>, vector<16x16xf32> -> vector<16x16xf32>
    %208 = vector.extract_strided_slice %11 {offsets = [0, 112], sizes = [16, 16], strides = [1, 1]} : vector<16x384xf32> to vector<16x16xf32>
    %cst_60 = arith.constant 2.500000e-01 : f32
    %209 = vector.broadcast %cst_60 : f32 to vector<16x16xf32>
    %210 = arith.mulf %208, %209 : vector<16x16xf32>
    %211 = arith.truncf %210 : vector<16x16xf32> to vector<16x16xbf16>
    %212 = vector.extract_strided_slice %11 {offsets = [0, 240], sizes = [16, 16], strides = [1, 1]} : vector<16x384xf32> to vector<16x16xf32>
    %213 = arith.truncf %212 : vector<16x16xf32> to vector<16x16xbf16>
    %214 = vector.extract_strided_slice %11 {offsets = [0, 368], sizes = [16, 16], strides = [1, 1]} : vector<16x384xf32> to vector<16x16xf32>
    %215 = arith.truncf %214 : vector<16x16xf32> to vector<16x16xbf16>
    %cst_61 = arith.constant dense<0.000000e+00> : vector<16x16xf32>
    %216 = tpu.matmul %211, %213, %cst_61 {dimension_numbers = #tpu.dot_dimension_numbers<[1], [1], [0], [0], [0, 0, 1, 0], [], []>} : vector<16x16xbf16>, vector<16x16xbf16>, vector<16x16xf32> -> vector<16x16xf32>
    %cst_62 = arith.constant -1.000000e+30 : f32
    %217 = vector.broadcast %cst_62 : f32 to vector<16x16xf32>
    %218 = arith.select %46, %216, %217 : vector<16x16xi1>, vector<16x16xf32>
    %cst_63 = arith.constant dense<0xFF800000> : vector<16xf32>
    %219 = vector.multi_reduction <maximumf>, %218, %cst_63 [1] : vector<16x16xf32> to vector<16xf32>
    %220 = vector.shape_cast %219 : vector<16xf32> to vector<16x1xf32>
    %221 = vector.broadcast %220 : vector<16x1xf32> to vector<16x16xf32>
    %222 = arith.subf %218, %221 : vector<16x16xf32>
    %223 = math.exp %222 : vector<16x16xf32>
    %cst_64 = arith.constant dense<0.000000e+00> : vector<16xf32>
    %224 = vector.multi_reduction <add>, %223, %cst_64 [1] : vector<16x16xf32> to vector<16xf32>
    %225 = vector.shape_cast %224 : vector<16xf32> to vector<16x1xf32>
    %226 = tpu.reciprocal %225 {approx = true} : vector<16x1xf32> -> vector<16x1xf32>
    %227 = vector.broadcast %226 : vector<16x1xf32> to vector<16x16xf32>
    %228 = arith.mulf %223, %227 : vector<16x16xf32>
    %229 = arith.truncf %228 : vector<16x16xf32> to vector<16x16xbf16>
    %cst_65 = arith.constant dense<0.000000e+00> : vector<16x16xf32>
    %230 = tpu.matmul %229, %215, %cst_65 {dimension_numbers = #tpu.dot_dimension_numbers<[1], [0], [0], [1], [0, 0, 1, 1], [], []>} : vector<16x16xbf16>, vector<16x16xbf16>, vector<16x16xf32> -> vector<16x16xf32>
    %231 = tpu.concatenate %69, %92, %115, %138, %161, %184, %207, %230 in 1 : vector<16x16xf32>, vector<16x16xf32>, vector<16x16xf32>, vector<16x16xf32>, vector<16x16xf32>, vector<16x16xf32>, vector<16x16xf32>, vector<16x16xf32> -> vector<16x128xf32>
    %232 = arith.truncf %231 : vector<16x128xf32> to vector<16x128xbf16>
    %c0_66 = arith.constant 0 : index
    %c0_67 = arith.constant 0 : index
    %c0_68 = arith.constant 0 : index
    %233 = vector.load %arg4[%c0_66, %c0_67, %c0_68] : memref<1x128x128xbf16, #tpu.memory_space<vmem>>, vector<1x128x128xbf16>
    %234 = vector.shape_cast %233 : vector<1x128x128xbf16> to vector<128x128xbf16>
    %cst_69 = arith.constant dense<0.000000e+00> : vector<16x128xf32>
    %235 = tpu.matmul %232, %234, %cst_69 {dimension_numbers = #tpu.dot_dimension_numbers<[1], [0], [0], [1], [0, 0, 1, 1], [], []>} : vector<16x128xbf16>, vector<128x128xbf16>, vector<16x128xf32> -> vector<16x128xf32>
    %c0_70 = arith.constant 0 : index
    %c0_71 = arith.constant 0 : index
    %c0_72 = arith.constant 0 : index
    %236 = vector.load %arg5[%c0_70, %c0_71, %c0_72] : memref<1x1x128xf32, #tpu.memory_space<vmem>>, vector<1x1x128xf32>
    %237 = vector.shape_cast %236 : vector<1x1x128xf32> to vector<1x128xf32>
    %238 = vector.broadcast %237 : vector<1x128xf32> to vector<16x128xf32>
    %239 = arith.addf %235, %238 : vector<16x128xf32>
    %240 = arith.addf %3, %239 : vector<16x128xf32>
    %c0_73 = arith.constant 0 : index
    %c0_74 = arith.constant 0 : index
    %c0_75 = arith.constant 0 : index
    %241 = vector.load %arg6[%c0_73, %c0_74, %c0_75] : memref<1x1x128xf32, #tpu.memory_space<vmem>>, vector<1x1x128xf32>
    %242 = vector.shape_cast %241 : vector<1x1x128xf32> to vector<1x128xf32>
    %c0_76 = arith.constant 0 : index
    %c0_77 = arith.constant 0 : index
    %c0_78 = arith.constant 0 : index
    %243 = vector.load %arg7[%c0_76, %c0_77, %c0_78] : memref<1x1x128xf32, #tpu.memory_space<vmem>>, vector<1x1x128xf32>
    %244 = vector.shape_cast %243 : vector<1x1x128xf32> to vector<1x128xf32>
    %cst_79 = arith.constant dense<0.000000e+00> : vector<16xf32>
    %245 = vector.multi_reduction <add>, %240, %cst_79 [1] : vector<16x128xf32> to vector<16xf32>
    %246 = vector.shape_cast %245 : vector<16xf32> to vector<16x1xf32>
    %cst_80 = arith.constant 1.280000e+02 : f32
    %247 = vector.broadcast %cst_80 : f32 to vector<16x1xf32>
    %248 = arith.divf %246, %247 : vector<16x1xf32>
    %249 = vector.broadcast %248 : vector<16x1xf32> to vector<16x128xf32>
    %250 = arith.subf %240, %249 : vector<16x128xf32>
    %251 = arith.mulf %250, %250 : vector<16x128xf32>
    %cst_81 = arith.constant dense<0.000000e+00> : vector<16xf32>
    %252 = vector.multi_reduction <add>, %251, %cst_81 [1] : vector<16x128xf32> to vector<16xf32>
    %253 = vector.shape_cast %252 : vector<16xf32> to vector<16x1xf32>
    %cst_82 = arith.constant 1.280000e+02 : f32
    %254 = vector.broadcast %cst_82 : f32 to vector<16x1xf32>
    %255 = arith.divf %253, %254 : vector<16x1xf32>
    %cst_83 = arith.constant 9.99999974E-6 : f32
    %256 = vector.broadcast %cst_83 : f32 to vector<16x1xf32>
    %257 = arith.addf %255, %256 : vector<16x1xf32>
    %258 = math.rsqrt %257 : vector<16x1xf32>
    %259 = vector.broadcast %258 : vector<16x1xf32> to vector<16x128xf32>
    %260 = arith.mulf %250, %259 : vector<16x128xf32>
    %261 = vector.broadcast %242 : vector<1x128xf32> to vector<16x128xf32>
    %262 = arith.mulf %260, %261 : vector<16x128xf32>
    %263 = vector.broadcast %244 : vector<1x128xf32> to vector<16x128xf32>
    %264 = arith.addf %262, %263 : vector<16x128xf32>
    %265 = arith.truncf %264 : vector<16x128xf32> to vector<16x128xbf16>
    %c0_84 = arith.constant 0 : index
    %c0_85 = arith.constant 0 : index
    %c0_86 = arith.constant 0 : index
    %266 = vector.load %arg8[%c0_84, %c0_85, %c0_86] : memref<1x128x2048xbf16, #tpu.memory_space<vmem>>, vector<1x128x2048xbf16>
    %267 = vector.shape_cast %266 : vector<1x128x2048xbf16> to vector<128x2048xbf16>
    %cst_87 = arith.constant dense<0.000000e+00> : vector<16x2048xf32>
    %268 = tpu.matmul %265, %267, %cst_87 {dimension_numbers = #tpu.dot_dimension_numbers<[1], [0], [0], [1], [0, 0, 1, 1], [], []>} : vector<16x128xbf16>, vector<128x2048xbf16>, vector<16x2048xf32> -> vector<16x2048xf32>
    %c0_88 = arith.constant 0 : index
    %c0_89 = arith.constant 0 : index
    %c0_90 = arith.constant 0 : index
    %269 = vector.load %arg9[%c0_88, %c0_89, %c0_90] : memref<1x1x2048xf32, #tpu.memory_space<vmem>>, vector<1x1x2048xf32>
    %270 = vector.shape_cast %269 : vector<1x1x2048xf32> to vector<1x2048xf32>
    %271 = vector.broadcast %270 : vector<1x2048xf32> to vector<16x2048xf32>
    %272 = arith.addf %268, %271 : vector<16x2048xf32>
    %cst_91 = arith.constant 0.000000e+00 : f32
    %273 = vector.broadcast %cst_91 : f32 to vector<16x2048xf32>
    %274 = arith.maximumf %272, %273 : vector<16x2048xf32>
    %275 = arith.truncf %274 : vector<16x2048xf32> to vector<16x2048xbf16>
    %c0_92 = arith.constant 0 : index
    %c0_93 = arith.constant 0 : index
    %c0_94 = arith.constant 0 : index
    %276 = vector.load %arg10[%c0_92, %c0_93, %c0_94] : memref<1x2048x128xbf16, #tpu.memory_space<vmem>>, vector<1x2048x128xbf16>
    %277 = vector.shape_cast %276 : vector<1x2048x128xbf16> to vector<2048x128xbf16>
    %cst_95 = arith.constant dense<0.000000e+00> : vector<16x128xf32>
    %278 = tpu.matmul %275, %277, %cst_95 {dimension_numbers = #tpu.dot_dimension_numbers<[1], [0], [0], [1], [0, 0, 1, 1], [], []>} : vector<16x2048xbf16>, vector<2048x128xbf16>, vector<16x128xf32> -> vector<16x128xf32>
    %c0_96 = arith.constant 0 : index
    %c0_97 = arith.constant 0 : index
    %c0_98 = arith.constant 0 : index
    %279 = vector.load %arg11[%c0_96, %c0_97, %c0_98] : memref<1x1x128xf32, #tpu.memory_space<vmem>>, vector<1x1x128xf32>
    %280 = vector.shape_cast %279 : vector<1x1x128xf32> to vector<1x128xf32>
    %281 = vector.broadcast %280 : vector<1x128xf32> to vector<16x128xf32>
    %282 = arith.addf %278, %281 : vector<16x128xf32>
    %283 = arith.addf %264, %282 : vector<16x128xf32>
    %c0_99 = arith.constant 0 : index
    %c0_100 = arith.constant 0 : index
    %c0_101 = arith.constant 0 : index
    %284 = vector.load %arg12[%c0_99, %c0_100, %c0_101] : memref<1x1x128xf32, #tpu.memory_space<vmem>>, vector<1x1x128xf32>
    %285 = vector.shape_cast %284 : vector<1x1x128xf32> to vector<1x128xf32>
    %c0_102 = arith.constant 0 : index
    %c0_103 = arith.constant 0 : index
    %c0_104 = arith.constant 0 : index
    %286 = vector.load %arg13[%c0_102, %c0_103, %c0_104] : memref<1x1x128xf32, #tpu.memory_space<vmem>>, vector<1x1x128xf32>
    %287 = vector.shape_cast %286 : vector<1x1x128xf32> to vector<1x128xf32>
    %cst_105 = arith.constant dense<0.000000e+00> : vector<16xf32>
    %288 = vector.multi_reduction <add>, %283, %cst_105 [1] : vector<16x128xf32> to vector<16xf32>
    %289 = vector.shape_cast %288 : vector<16xf32> to vector<16x1xf32>
    %cst_106 = arith.constant 1.280000e+02 : f32
    %290 = vector.broadcast %cst_106 : f32 to vector<16x1xf32>
    %291 = arith.divf %289, %290 : vector<16x1xf32>
    %292 = vector.broadcast %291 : vector<16x1xf32> to vector<16x128xf32>
    %293 = arith.subf %283, %292 : vector<16x128xf32>
    %294 = arith.mulf %293, %293 : vector<16x128xf32>
    %cst_107 = arith.constant dense<0.000000e+00> : vector<16xf32>
    %295 = vector.multi_reduction <add>, %294, %cst_107 [1] : vector<16x128xf32> to vector<16xf32>
    %296 = vector.shape_cast %295 : vector<16xf32> to vector<16x1xf32>
    %cst_108 = arith.constant 1.280000e+02 : f32
    %297 = vector.broadcast %cst_108 : f32 to vector<16x1xf32>
    %298 = arith.divf %296, %297 : vector<16x1xf32>
    %cst_109 = arith.constant 9.99999974E-6 : f32
    %299 = vector.broadcast %cst_109 : f32 to vector<16x1xf32>
    %300 = arith.addf %298, %299 : vector<16x1xf32>
    %301 = math.rsqrt %300 : vector<16x1xf32>
    %302 = vector.broadcast %301 : vector<16x1xf32> to vector<16x128xf32>
    %303 = arith.mulf %293, %302 : vector<16x128xf32>
    %304 = vector.broadcast %285 : vector<1x128xf32> to vector<16x128xf32>
    %305 = arith.mulf %303, %304 : vector<16x128xf32>
    %306 = vector.broadcast %287 : vector<1x128xf32> to vector<16x128xf32>
    %307 = arith.addf %305, %306 : vector<16x128xf32>
    %c0_110 = arith.constant 0 : index
    %c0_111 = arith.constant 0 : index
    %308 = vector.load %arg17[%c0_110, %c0_111] : memref<16x128xf32, #tpu.memory_space<vmem>>, vector<16x128xf32>
    tpu.vector_store %arg17[%c0_110, %c0_111], %307 {strides = array<i32>} : memref<16x128xf32, #tpu.memory_space<vmem>>, vector<16x128xf32>,
    %c7_i32 = arith.constant 7 : i32
    %309 = arith.cmpi eq, %arg0, %c7_i32 : i32
    %310 = arith.extui %309 : i1 to i32
    %c0_i32_112 = arith.constant 0 : i32
    %311 = arith.cmpi ne, %310, %c0_i32_112 : i32
    scf.if %311 {
      %312 = arith.truncf %307 : vector<16x128xf32> to vector<16x128xbf16>
      %c0_113 = arith.constant 0 : index
      %c0_114 = arith.constant 0 : index
      %313 = vector.load %arg14[%c0_113, %c0_114] : memref<128x2048xbf16, #tpu.memory_space<vmem>>, vector<128x2048xbf16>
      %cst_115 = arith.constant dense<0.000000e+00> : vector<16x2048xf32>
      %314 = tpu.matmul %312, %313, %cst_115 {dimension_numbers = #tpu.dot_dimension_numbers<[1], [0], [0], [1], [0, 0, 1, 1], [], []>} : vector<16x128xbf16>, vector<128x2048xbf16>, vector<16x2048xf32> -> vector<16x2048xf32>
      %c0_116 = arith.constant 0 : index
      %c0_117 = arith.constant 0 : index
      %315 = vector.load %arg15[%c0_116, %c0_117] : memref<1x2048xf32, #tpu.memory_space<vmem>>, vector<1x2048xf32>
      %316 = vector.broadcast %315 : vector<1x2048xf32> to vector<16x2048xf32>
      %317 = arith.addf %314, %316 : vector<16x2048xf32>
      %cst_118 = arith.constant dense<0xFF800000> : vector<16xf32>
      %318 = vector.multi_reduction <maximumf>, %317, %cst_118 [1] : vector<16x2048xf32> to vector<16xf32>
      %319 = vector.shape_cast %318 : vector<16xf32> to vector<16x1xf32>
      %320 = vector.broadcast %319 : vector<16x1xf32> to vector<16x2048xf32>
      %321 = arith.subf %317, %320 : vector<16x2048xf32>
      %322 = math.exp %321 : vector<16x2048xf32>
      %cst_119 = arith.constant dense<0.000000e+00> : vector<16xf32>
      %323 = vector.multi_reduction <add>, %322, %cst_119 [1] : vector<16x2048xf32> to vector<16xf32>
      %324 = vector.shape_cast %323 : vector<16xf32> to vector<16x1xf32>
      %325 = math.log %324 : vector<16x1xf32>
      %326 = vector.broadcast %325 : vector<16x1xf32> to vector<16x2048xf32>
      %327 = arith.subf %321, %326 : vector<16x2048xf32>
      %c0_120 = arith.constant 0 : index
      %c0_121 = arith.constant 0 : index
      %328 = vector.load %arg16[%c0_120, %c0_121] : memref<16x2048xf32, #tpu.memory_space<vmem>>, vector<16x2048xf32>
      tpu.vector_store %arg16[%c0_120, %c0_121], %327 {strides = array<i32>} : memref<16x2048xf32, #tpu.memory_space<vmem>>, vector<16x2048xf32>,
    } else {
    }
    return
  }
  func.func @transform_0(%arg0: i32) -> (i32, i32) {
    %c0_i32 = arith.constant 0 : i32
    %c0_i32_0 = arith.constant 0 : i32
    %c0_i32_1 = arith.constant 0 : i32
    return %c0_i32, %c0_i32_0 : i32, i32
  }
  func.func @transform_1(%arg0: i32) -> (i32, i32, i32) {
    %c0_i32 = arith.constant 0 : i32
    %c0_i32_0 = arith.constant 0 : i32
    %c0_i32_1 = arith.constant 0 : i32
    return %arg0, %c0_i32, %c0_i32_0 : i32, i32, i32
  }
  func.func @transform_2(%arg0: i32) -> (i32, i32, i32) {
    %c0_i32 = arith.constant 0 : i32
    %c0_i32_0 = arith.constant 0 : i32
    %c0_i32_1 = arith.constant 0 : i32
    return %arg0, %c0_i32, %c0_i32_0 : i32, i32, i32
  }
  func.func @transform_3(%arg0: i32) -> (i32, i32, i32) {
    %c0_i32 = arith.constant 0 : i32
    %c0_i32_0 = arith.constant 0 : i32
    %c0_i32_1 = arith.constant 0 : i32
    return %arg0, %c0_i32, %c0_i32_0 : i32, i32, i32
  }
  func.func @transform_4(%arg0: i32) -> (i32, i32, i32) {
    %c0_i32 = arith.constant 0 : i32
    %c0_i32_0 = arith.constant 0 : i32
    %c0_i32_1 = arith.constant 0 : i32
    return %arg0, %c0_i32, %c0_i32_0 : i32, i32, i32
  }
  func.func @transform_5(%arg0: i32) -> (i32, i32, i32) {
    %c0_i32 = arith.constant 0 : i32
    %c0_i32_0 = arith.constant 0 : i32
    %c0_i32_1 = arith.constant 0 : i32
    return %arg0, %c0_i32, %c0_i32_0 : i32, i32, i32
  }
  func.func @transform_6(%arg0: i32) -> (i32, i32, i32) {
    %c0_i32 = arith.constant 0 : i32
    %c0_i32_0 = arith.constant 0 : i32
    %c0_i32_1 = arith.constant 0 : i32
    return %arg0, %c0_i32, %c0_i32_0 : i32, i32, i32
  }
  func.func @transform_7(%arg0: i32) -> (i32, i32, i32) {
    %c0_i32 = arith.constant 0 : i32
    %c0_i32_0 = arith.constant 0 : i32
    %c0_i32_1 = arith.constant 0 : i32
    return %arg0, %c0_i32, %c0_i32_0 : i32, i32, i32
  }
  func.func @transform_8(%arg0: i32) -> (i32, i32, i32) {
    %c0_i32 = arith.constant 0 : i32
    %c0_i32_0 = arith.constant 0 : i32
    %c0_i32_1 = arith.constant 0 : i32
    return %arg0, %c0_i32, %c0_i32_0 : i32, i32, i32
  }
  func.func @transform_9(%arg0: i32) -> (i32, i32, i32) {
    %c0_i32 = arith.constant 0 : i32
    %c0_i32_0 = arith.constant 0 : i32
    %c0_i32_1 = arith.constant 0 : i32
    return %arg0, %c0_i32, %c0_i32_0 : i32, i32, i32
  }
  func.func @transform_10(%arg0: i32) -> (i32, i32, i32) {
    %c0_i32 = arith.constant 0 : i32
    %c0_i32_0 = arith.constant 0 : i32
    %c0_i32_1 = arith.constant 0 : i32
    return %arg0, %c0_i32, %c0_i32_0 : i32, i32, i32
  }
  func.func @transform_11(%arg0: i32) -> (i32, i32, i32) {
    %c0_i32 = arith.constant 0 : i32
    %c0_i32_0 = arith.constant 0 : i32
    %c0_i32_1 = arith.constant 0 : i32
    return %arg0, %c0_i32, %c0_i32_0 : i32, i32, i32
  }
  func.func @transform_12(%arg0: i32) -> (i32, i32, i32) {
    %c0_i32 = arith.constant 0 : i32
    %c0_i32_0 = arith.constant 0 : i32
    %c0_i32_1 = arith.constant 0 : i32
    return %arg0, %c0_i32, %c0_i32_0 : i32, i32, i32
  }
  func.func @transform_13(%arg0: i32) -> (i32, i32) {
    %c0_i32 = arith.constant 0 : i32
    %c0_i32_0 = arith.constant 0 : i32
    %c0_i32_1 = arith.constant 0 : i32
    return %c0_i32, %c0_i32_0 : i32, i32
  }
  func.func @transform_14(%arg0: i32) -> (i32, i32) {
    %c0_i32 = arith.constant 0 : i32
    %c0_i32_0 = arith.constant 0 : i32
    %c0_i32_1 = arith.constant 0 : i32
    return %c0_i32, %c0_i32_0 : i32, i32
  }
  func.func @transform_15(%arg0: i32) -> (i32, i32) {
    %c0_i32 = arith.constant 0 : i32
    %c0_i32_0 = arith.constant 0 : i32
    %c0_i32_1 = arith.constant 0 : i32
    return %c0_i32, %c0_i32_0 : i32, i32
  }
}

</mosaic_0001>

<bundles_post_ra>
// kernel: tpu_custom_call.1
= control target key start
LH: loop header
LB: loop body
LE: loop exit
PB: predicated region body
PF: predicated region fallthrough
CT: control target
= control target key end

     0   :  { %s10521_s0 = inlined_call_operand.hbm [shape: f32[16,128], index: 0, kind: input, shape index: {}]   ;;  %s10522_s1 = inlined_call_operand.hbm [shape: bf16[8,128,384], index: 1, kind: input, shape index: {}]   ;;  %s10523_s2 = inlined_call_operand.hbm [shape: f32[8,1,384], index: 2, kind: input, shape index: {}]   ;;  %s10524_s3 = inlined_call_operand.hbm [shape: bf16[8,128,128], index: 3, kind: input, shape index: {}]   ;;  %s10525_s4 = inlined_call_operand.hbm [shape: f32[8,1,128], index: 4, kind: input, shape index: {}]   ;;  %s10526_s5 = inlined_call_operand.hbm [shape: f32[8,1,128], index: 5, kind: input, shape index: {}]   ;;  %s10527_s6 = inlined_call_operand.hbm [shape: f32[8,1,128], index: 6, kind: input, shape index: {}]   ;;  %s10528_s7 = inlined_call_operand.hbm [shape: bf16[8,128,2048], index: 7, kind: input, shape index: {}]   ;;  %s10529_s8 = inlined_call_operand.hbm [shape: f32[8,1,2048], index: 8, kind: input, shape index: {}]   ;;  %s10530_s9 = inlined_call_operand.hbm [shape: bf16[8,2048,128], index: 9, kind: input, shape index: {}]   ;;  %s10531_s10 = inlined_call_operand.hbm [shape: f32[8,1,128], index: 10, kind: input, shape index: {}]   ;;  %s10532_s11 = inlined_call_operand.hbm [shape: f32[8,1,128], index: 11, kind: input, shape index: {}]   ;;  %s10533_s12 = inlined_call_operand.hbm [shape: f32[8,1,128], index: 12, kind: input, shape index: {}]   ;;  %s10534_s13 = inlined_call_operand.hbm [shape: bf16[128,2048], index: 13, kind: input, shape index: {}]   ;;  %s10535_s14 = inlined_call_operand.hbm [shape: f32[1,2048], index: 14, kind: input, shape index: {}]   ;;  %s10536_s15 = inlined_call_operand.hbm [shape: f32[16,2048], index: 15, kind: output, shape index: {}]  }
   0x1   :  { %10551 = sst [smem:[#allocation44_spill]] %s10521_s0 }
   0x2   :  { %10552 = sst [smem:[#allocation45_spill]] %s10522_s1 }
   0x3   :  { %10553 = sst [smem:[#allocation46_spill]] %s10524_s3 }
   0x4   :  { %10554 = sst [smem:[#allocation47_spill]] %s10526_s5 }
   0x5   :  { %10555 = sst [smem:[#allocation48_spill]] %s10534_s13 }
   0x6   :  { %10556 = sst [smem:[#allocation49_spill]] %s10535_s14 }
   0x7   :  { %10557 = sst [smem:[#allocation50_spill]] %s10536_s15 }
   0x8   :  { %20 = vsyncpa [#allocation4], 0 }
   0x9   :  { %21 = vsyncpa [#allocation7], 0 }
   0xa   :  { %23 = vsyncpa [#allocation7 + $0x1], 0 }
   0xb   :  { %24 = vsyncpa [#allocation10], 0 }
   0xc   :  { %26 = vsyncpa [#allocation10 + $0x1], 0 }
   0xd   :  { %27 = vsyncpa [#allocation13], 0 }
   0xe   :  { %29 = vsyncpa [#allocation13 + $0x1], 0 }
   0xf   :  { %30 = vsyncpa [#allocation16], 0 }
  0x10   :  { %32 = vsyncpa [#allocation16 + $0x1], 0 }
  0x11   :  { %33 = vsyncpa [#allocation19], 0 }
  0x12   :  { %35 = vsyncpa [#allocation19 + $0x1], 0 }
  0x13   :  { %36 = vsyncpa [#allocation22], 0 }
  0x14   :  { %38 = vsyncpa [#allocation22 + $0x1], 0 }
  0x15   :  { %39 = vsyncpa [#allocation25], 0 }
  0x16   :  { %40 = vsyncpa [#allocation5], 0  ;;  %s8997_s18 = smov 0   ;;  %s8999_s19 = smov 0  }
  0x17   :  { %s9001_s20 = smov 0   ;;  %s9003_s21 = smov 0  }
  0x18 LB: > { %10558 = sst [smem:[#allocation37_spill]] %s8884_s19  ;;  %s9016_s22 = sadd.s32 4294967295, %s8892_s21   ;;  %s8892_s21 = sphi %s9003_s21, %s10591_s21   ;;  %s8888_s20 = sphi %s9001_s20, %s10594_s20   ;;  %s8884_s19 = sphi %s8999_s19, %s10593_s19   ;;  %s8880_s18 = sphi %s8997_s18, %s10592_s18  }
  0x19   : > { %10559 = sst [smem:[#allocation38_spill]] %s8888_s20  ;;  %s9019_s23 = sadd.s32 1, %s8892_s21  }
  0x1a   : > { %10560 = sst [smem:[#allocation39_spill]] %s9016_s22  ;;  %s71_s24 = ssub.s32 %s8892_s21, %s9019_s23 }
  0x1b   : > { %10561 = sst [smem:[#allocation40_spill]] %s9019_s23  ;;  %s74_s25 = sadd.s32 1, %s8888_s20 }
  0x1c   : > { %p72_p0 = scmp.eq.s32.totalorder %s71_s24, 0  ;;  %p81_p1 = scmp.ne.s32.totalorder %s8888_s20, %s8884_s19 }
  0x1d   : > { %p82_p2 = scmp.eq.s32.totalorder %s8892_s21, 0  ;;  %p87_p3 = scmp.ne.s32.totalorder %s8884_s19, %s8880_s18 }
  0x1e   : > { %s9029_s26 = scalar_select %p72_p0, %s8888_s20, %s74_s25  }
  0x1f   : > { %p9031_p4 = por %p82_p2, %p81_p1  ;;  %p88_p5 = scmp.eq.s32.totalorder %s9016_s22, 0 }
  0x20   : > { %10562 = sst [smem:[#allocation41_spill]] %s9029_s26  ;;  %p5940_p6 = scmp.ge.s32.totalorder %s8892_s21, 1 }
  0x21   : > { %p447_p7 = scmp.lt.s32.totalorder %s8892_s21, 9  ;;  %p9040_p8 = por %p88_p5, %p87_p3 }
  0x22   : > { %p5941_p9 = scmp.ne.s32.totalorder %s9016_s22, 0  ;;  %s10568_s13 = sld [smem:[#allocation48_spill]] }
  0x23   : > { %s10564_s28 = scalar_select %p9040_p8, 1, 0 }
  0x24   : > { %p9045_p10 = pnand %p5940_p6, %p447_p7  ;;  %s8894_s18 = smov [#allocation24]  }
  0x25   : > { %10565 = sst [smem:[#allocation42_spill]] %s10564_s28  ;;  %s474_s24 = sshll.u32 %s8894_s18, 4  ;;  %s475_s24 = int_to_ptr.vmem [resolvable:$true] %s474_s24 }
  0x26   : > { %s10566_s29 = scalar_select %p9045_p10, 1, 0 }
  0x27   : > { %p8116_p11 = pneg %p9045_p10  ;;  %s10570_s0 = sld [smem:[#allocation44_spill]] }
  0x28   : > { %10567 = sst [smem:[#allocation43_spill]] %s10566_s29  ;;  %s472_s17 = sshll.u32 %s10568_s13, 4  ;;  %s473_s17 = int_to_ptr.hbm [resolvable:$true] %s472_s17 }
  0x29   : > { %p9056_p12 = pnand %p8116_p11, %p88_p5  ;;  %s8895_s30 = smov 1024  }
  0x2a   : > { %s8896_s16 = smov 64   ;;  %s8897_s13 = smov [#allocation3]  }
  0x2b   : > { %8122 = dma.hbm_to_vmem [thread:$0]  (!%p9056_p12), %s473_s17, 16384, %s475_s24, [#allocation25], %s8895_s30, %s8895_s30, %s8896_s16  }
  0x2c   : > { %s460_s18 = sshll.u32 %s8897_s13, 4  ;;  %s8898_s28 = smov 128   ;;  %s461_s18 = int_to_ptr.vmem [resolvable:$true] %s460_s18 }
  0x2d   : > { %s458_s15 = sshll.u32 %s10570_s0, 4  ;;  %s8899_s19 = smov 8   ;;  %s459_s15 = int_to_ptr.hbm [resolvable:$true] %s458_s15 }
  0x2e   : > { %8119 = dma.hbm_to_vmem [thread:$0]  (!%p9056_p12), %s459_s15, 256, %s461_s18, [#allocation4], %s8898_s28, %s8898_s28, %s8899_s19  }
  0x2f   : > { %s10571_s14 = sld [smem:[#allocation49_spill]]  ;;  %s8900_s26 = smov [#allocation26]  }
  0x30   : > { %s489_s0 = sshll.u32 %s8900_s26, 4  ;;  %p5944_p13 = scmp.ge.s32.totalorder %s8892_s21, 8  ;;  %s490_s0 = int_to_ptr.vmem [resolvable:$true] %s489_s0 }
  0x31   : > { %s9074_s13 = sand.u32 (!%p5944_p13), 1, %s8892_s21   ;;  %s9077_s15 = sand.u32 (!%p5944_p13), 1, %s8888_s20  }
  0x32   : > { %496 = sbr.rel (%p5944_p13) target bundleno = 245 (0xf5), region = 28  ;;  %s10572_s1 = sld [smem:[#allocation45_spill]] (!%p5944_p13) }
  0x33   : > { %s8070_s19 = smul.u32 (!%p5944_p13), 192, %s9077_s15  ;;  %s10546_s30 = scalar_lea.sflag (!%p5944_p13), [#allocation7], %s9074_s13 }
  0x34   : > { %s8071_s22 = smul.u32 (!%p5944_p13), 192, %s8892_s21 }
  0x35   : > { %s487_s23 = sshll.u32 %s10571_s14, 4  ;;  %s488_s23 = int_to_ptr.hbm [resolvable:$true] %s487_s23 }
  0x36   : > { %8125 = dma.hbm_to_vmem [thread:$0]  (!%p9056_p12), %s488_s23, 256, %s490_s0, [#allocation25]  }
  0x37   : > { %s504_s0 = scalar_lea.vmem [#allocation6], %s8070_s19 }
  0x38   : > { %s509_s17 = scalar_lea.hbm %s10572_s1, %s8071_s22  ;;  %s512_s24 = sshll.u32 %s504_s0, 4  ;;  %s513_s24 = int_to_ptr.vmem [resolvable:$true] %s512_s24 }
  0x39   : > { %s510_s25 = sshll.u32 %s509_s17, 4  ;;  %s8468_s14 = scalar_lea.hbm %s10572_s1, 1536  ;;  %s511_s25 = int_to_ptr.hbm [resolvable:$true] %s510_s25 }
  0x3a   : > { %s8462_s16 = sshra.s32 %s511_s25, 4  ;;  %s8463_s16 = int_to_ptr.hbm [resolvable:$true] %s8462_s16 }
  0x3b   : > { %s8464_s18 = scalar_lea.hbm %s8463_s16, 192  ;;  %p8469_p3 = scmp.lt.s32.totalorder %s8463_s16, %s10572_s1 }
  0x3c   : > { %p8465_p0 = scmp.ne.s32.totalorder %s8463_s16, %s8464_s18  ;;  %p8470_p6 = scmp.lt.s32.totalorder %s8468_s14, %s8464_s18 }
  0x3e   : > { %p8466_p1 = pnand %p8465_p0, %p9031_p4  ;;  %p8471_p7 = por %p8470_p6, %p8469_p3 }
  0x40   : > { %p8467_p2 = pneg %p8466_p1 }
  0x42   : > { %p8472_p11 = pnand %p8471_p7, %p8467_p2 }
  0x44   : > { %8475 = shalt.err (!%p8472_p11)
}
  0x45   : > { %s8901_s19 = smov 192   ;;  %s8902_s22 = smov 12  }
  0x46   : > { %8082 = dma.hbm_to_vmem [thread:$0]  (%p9031_p4), %s511_s25, 3072, %s513_s24, %s10546_s30, %s8901_s19, %s8901_s19, %s8902_s22  }
  0x47   : > { %s5946_s29 = sshll.u32 %s9077_s15, 6  ;;  %s7651_s17 = sshll.u32 %s8892_s21, 6 }
  0x48   : > { %s10573_s3 = sld [smem:[#allocation46_spill]]  ;;  %s545_s18 = scalar_lea.vmem [#allocation9], %s5946_s29 }
  0x49   : > { %s553_s23 = sshll.u32 %s545_s18, 4  ;;  %s10547_s26 = scalar_lea.sflag [#allocation10], %s9074_s13  ;;  %s554_s23 = int_to_ptr.vmem [resolvable:$true] %s553_s23 }
  0x4e   : > { %s550_s14 = scalar_lea.hbm %s10573_s3, %s7651_s17  ;;  %s8496_s19 = scalar_lea.hbm %s10573_s3, 512 }
  0x4f   : > { %s551_s16 = sshll.u32 %s550_s14, 4  ;;  %s552_s16 = int_to_ptr.hbm [resolvable:$true] %s551_s16 }
  0x50   : > { %s8490_s28 = sshra.s32 %s552_s16, 4  ;;  %s8491_s28 = int_to_ptr.hbm [resolvable:$true] %s8490_s28 }
  0x51   : > { %s8492_s1 = scalar_lea.hbm %s8491_s28, 64  ;;  %p8497_p1 = scmp.lt.s32.totalorder %s8491_s28, %s10573_s3 }
  0x52   : > { %p8493_p12 = scmp.ne.s32.totalorder %s8491_s28, %s8492_s1  ;;  %p8498_p2 = scmp.lt.s32.totalorder %s8496_s19, %s8492_s1 }
  0x54   : > { %p8494_p13 = pnand %p8493_p12, %p9031_p4  ;;  %p8499_p3 = por %p8498_p2, %p8497_p1 }
  0x56   : > { %p8495_p0 = pneg %p8494_p13 }
  0x58   : > { %p8500_p6 = pnand %p8499_p3, %p8495_p0 }
  0x5a   : > { %8503 = shalt.err (!%p8500_p6)
}
  0x5b   : > { %s8903_s29 = smov 64   ;;  %s10549_s17 = smov 4  }
  0x5c   : > { %8084 = dma.hbm_to_vmem [thread:$0]  (%p9031_p4), %s552_s16, 1024, %s554_s23, %s10547_s26, %s8903_s29, %s8903_s29, %s10549_s17  }
  0x5d   : > { %s10574_s5 = sld [smem:[#allocation47_spill]]  ;;  %s583_s18 = scalar_lea.vmem [#allocation12], %s9077_s15 }
  0x5e   : > { %s590_s28 = sshll.u32 %s583_s18, 4  ;;  %s10548_s25 = scalar_lea.sflag [#allocation13], %s9074_s13  ;;  %s591_s28 = int_to_ptr.vmem [resolvable:$true] %s590_s28 }
  0x63   : > { %s586_s1 = scalar_lea.hbm %s10574_s5, %s8892_s21  ;;  %s8524_s16 = scalar_lea.hbm %s10574_s5, 8 }
  0x64   : > { %s588_s24 = sshll.u32 %s586_s1, 4  ;;  %s589_s24 = int_to_ptr.hbm [resolvable:$true] %s588_s24 }
  0x65   : > { %s8518_s19 = sshra.s32 %s589_s24, 4  ;;  %s8519_s19 = int_to_ptr.hbm [resolvable:$true] %s8518_s19 }
  0x66   : > { %s8520_s22 = scalar_lea.hbm %s8519_s19, 1  ;;  %p8525_p13 = scmp.lt.s32.totalorder %s8519_s19, %s10574_s5 }
  0x67   : > { %p8521_p7 = scmp.ne.s32.totalorder %s8519_s19, %s8520_s22  ;;  %p8526_p0 = scmp.lt.s32.totalorder %s8524_s16, %s8520_s22 }
  0x69   : > { %p8522_p11 = pnand %p8521_p7, %p9031_p4  ;;  %p8527_p1 = por %p8526_p0, %p8525_p13 }
  0x6b   : > { %p8523_p12 = pneg %p8522_p11 }
  0x6d   : > { %p8528_p2 = pnand %p8527_p1, %p8523_p12 }
  0x6f   : > { %8531 = shalt.err (!%p8528_p2)
}
  0x70   : > { %8086 = dma.hbm_to_vmem [thread:$0]  (%p9031_p4), %s589_s24, 16, %s591_s28, %s10548_s25  }
  0x71   : > { %s5949_s14 = sshll.u32 %s9077_s15, 10  ;;  %s7652_s30 = sshll.u32 %s8892_s21, 10 }
  0x72   : > { %s623_s0 = scalar_lea.hbm %s10528_s7, %s7652_s30  ;;  %s618_s22 = scalar_lea.vmem [#allocation15], %s5949_s14 }
  0x73   : > { %s624_s19 = sshll.u32 %s623_s0, 4  ;;  %s626_s16 = sshll.u32 %s618_s22, 4  ;;  %s625_s19 = int_to_ptr.hbm [resolvable:$true] %s624_s19  ;;  %s627_s16 = int_to_ptr.vmem [resolvable:$true] %s626_s16 }
  0x74   : > { %s615_s23 = scalar_lea.sflag [#allocation16], %s9074_s13  ;;  %s8546_s20 = sshra.s32 %s625_s19, 4  ;;  %s8547_s20 = int_to_ptr.hbm [resolvable:$true] %s8546_s20 }
  0x75   : > { %s8548_s26 = scalar_lea.hbm %s8547_s20, 1024  ;;  %s8552_s25 = scalar_lea.hbm %s10528_s7, 8192 }
  0x76   : > { %p8549_p3 = scmp.ne.s32.totalorder %s8547_s20, %s8548_s26  ;;  %p8553_p11 = scmp.lt.s32.totalorder %s8547_s20, %s10528_s7 }
  0x77   : > { %p8554_p12 = scmp.lt.s32.totalorder %s8552_s25, %s8548_s26 }
  0x78   : > { %p8550_p6 = pnand %p8549_p3, %p9031_p4 }
  0x79   : > { %p8555_p13 = por %p8554_p12, %p8553_p11 }
  0x7a   : > { %p8551_p7 = pneg %p8550_p6 }
  0x7c   : > { %p8556_p0 = pnand %p8555_p13, %p8551_p7 }
  0x7e   : > { %8559 = shalt.err (!%p8556_p0)
}
  0x7f   : > { %s8905_s18 = smov 1024   ;;  %s664_s28 = scalar_lea.hbm %s10530_s9, %s7652_s30 }
  0x80   : > { %8088 = dma.hbm_to_vmem [thread:$0]  (%p9031_p4), %s625_s19, 16384, %s627_s16, %s615_s23, %s8905_s18, %s8905_s18, %s8903_s29  }
  0x81   : > { %s665_s24 = sshll.u32 %s664_s28, 4  ;;  %s659_s17 = scalar_lea.vmem [#allocation18], %s5949_s14  ;;  %s666_s24 = int_to_ptr.hbm [resolvable:$true] %s665_s24 }
  0x82   : > { %s667_s20 = sshll.u32 %s659_s17, 4  ;;  %s10550_s26 = scalar_lea.sflag [#allocation19], %s9074_s13  ;;  %s668_s20 = int_to_ptr.vmem [resolvable:$true] %s667_s20 }
  0x83   : > { %s8574_s25 = sshra.s32 %s666_s24, 4  ;;  %s8580_s19 = scalar_lea.hbm %s10530_s9, 8192  ;;  %s8575_s25 = int_to_ptr.hbm [resolvable:$true] %s8574_s25 }
  0x84   : > { %s8576_s1 = scalar_lea.hbm %s8575_s25, 1024  ;;  %p8581_p6 = scmp.lt.s32.totalorder %s8575_s25, %s10530_s9 }
  0x85   : > { %p8577_p1 = scmp.ne.s32.totalorder %s8575_s25, %s8576_s1  ;;  %p8582_p7 = scmp.lt.s32.totalorder %s8580_s19, %s8576_s1 }
  0x87   : > { %p8578_p2 = pnand %p8577_p1, %p9031_p4  ;;  %p8583_p11 = por %p8582_p7, %p8581_p6 }
  0x89   : > { %p8579_p3 = pneg %p8578_p2 }
  0x8b   : > { %p8584_p12 = pnand %p8583_p11, %p8579_p3 }
  0x8d   : > { %8587 = shalt.err (!%p8584_p12)
}
  0x8e   : > { %s10575_s14 = smov 4   ;;  %s700_s30 = scalar_lea.hbm %s10532_s11, %s8892_s21 }
  0x8f   : > { %8090 = dma.hbm_to_vmem [thread:$0]  (%p9031_p4), %s666_s24, 16384, %s668_s20, %s10550_s26, %s8903_s29, %s8903_s29, %s10575_s14  }
  0x90   : > { %s697_s0 = scalar_lea.vmem [#allocation21], %s9077_s15  ;;  %s702_s28 = sshll.u32 %s700_s30, 4  ;;  %s703_s28 = int_to_ptr.hbm [resolvable:$true] %s702_s28 }
  0x91   : > { %s704_s22 = sshll.u32 %s697_s0, 4  ;;  %s8072_s17 = smul.u32 3, %s9077_s15  ;;  %s705_s22 = int_to_ptr.vmem [resolvable:$true] %s704_s22 }
  0x92   : > { %s695_s25 = scalar_lea.sflag [#allocation22], %s9074_s13  ;;  %s8602_s1 = sshra.s32 %s703_s28, 4  ;;  %s8603_s1 = int_to_ptr.hbm [resolvable:$true] %s8602_s1 }
  0x93   : > { %s8604_s19 = scalar_lea.hbm %s8603_s1, 1  ;;  %s8608_s24 = scalar_lea.hbm %s10532_s11, 8 }
  0x94   : > { %p8605_p13 = scmp.ne.s32.totalorder %s8603_s1, %s8604_s19  ;;  %p8609_p2 = scmp.lt.s32.totalorder %s8603_s1, %s10532_s11 }
  0x95   : > { %p8610_p3 = scmp.lt.s32.totalorder %s8608_s24, %s8604_s19 }
  0x96   : > { %p8606_p0 = pnand %p8605_p13, %p9031_p4 }
  0x97   : > { %p8611_p6 = por %p8610_p3, %p8609_p2 }
  0x98   : > { %p8607_p1 = pneg %p8606_p0 }
  0x9a   : > { %p8612_p7 = pnand %p8611_p6, %p8607_p1 }
  0x9c   : > { %8615 = shalt.err (!%p8612_p7)
}
  0x9d   : > { %8092 = dma.hbm_to_vmem [thread:$0]  (%p9031_p4), %s703_s28, 16, %s705_s22, %s695_s25  }
  0x9e   : > { %s8073_s14 = smul.u32 3, %s8892_s21  ;;  %s526_s3 = scalar_lea.vmem [#allocation8], %s8072_s17 }
  0x9f   : > { %s534_s5 = sshll.u32 %s526_s3, 4  ;;  %s569_s24 = scalar_lea.hbm %s10525_s4, %s8892_s21  ;;  %s535_s5 = int_to_ptr.vmem [resolvable:$true] %s534_s5 }
  0xa0   : > { %s530_s16 = scalar_lea.hbm %s10523_s2, %s8073_s14  ;;  %s9201_s20 = sshll.u32 %s569_s24, 4  ;;  %s572_s20 = int_to_ptr.hbm [resolvable:$true] %s9201_s20 }
  0xa1   : > { %s532_s1 = sshll.u32 %s530_s16, 4  ;;  %s8636_s17 = scalar_lea.hbm %s10523_s2, 24  ;;  %s533_s1 = int_to_ptr.hbm [resolvable:$true] %s532_s1 }
  0xa2   : > { %s8630_s18 = sshra.s32 %s533_s1, 4  ;;  %s8631_s18 = int_to_ptr.hbm [resolvable:$true] %s8630_s18 }
  0xa3   : > { %s8632_s26 = scalar_lea.hbm %s8631_s18, 3  ;;  %p8637_p0 = scmp.lt.s32.totalorder %s8631_s18, %s10523_s2 }
  0xa4   : > { %p8633_p11 = scmp.ne.s32.totalorder %s8631_s18, %s8632_s26  ;;  %p8638_p1 = scmp.lt.s32.totalorder %s8636_s17, %s8632_s26 }
  0xa6   : > { %p8634_p12 = pnand %p8633_p11, %p9031_p4  ;;  %p8639_p2 = por %p8638_p1, %p8637_p0 }
  0xa8   : > { %p8635_p13 = pneg %p8634_p12 }
  0xaa   : > { %p8640_p3 = pnand %p8639_p2, %p8635_p13 }
  0xac   : > { %8643 = shalt.err (!%p8640_p3)
}
  0xad   : > { %s10576_s30 = scalar_lea.sflag [#allocation7], %s9074_s13  ;;  %s566_s0 = scalar_lea.vmem [#allocation11], %s9077_s15 }
  0xae   : > { %8083 = dma.hbm_to_vmem [thread:$0]  (%p9031_p4), %s533_s1, 48, %s535_s5, %s10576_s30  }
  0xaf   : > { %s573_s16 = sshll.u32 %s566_s0, 4  ;;  %s8658_s19 = sshra.s32 %s572_s20, 4  ;;  %s574_s16 = int_to_ptr.vmem [resolvable:$true] %s573_s16  ;;  %s8659_s19 = int_to_ptr.hbm [resolvable:$true] %s8658_s19 }
  0xb0   : > { %s8660_s29 = scalar_lea.hbm %s8659_s19, 1  ;;  %s8664_s18 = scalar_lea.hbm %s10525_s4, 8 }
  0xb1   : > { %p8661_p6 = scmp.ne.s32.totalorder %s8659_s19, %s8660_s29  ;;  %p8665_p12 = scmp.lt.s32.totalorder %s8659_s19, %s10525_s4 }
  0xb2   : > { %p8666_p13 = scmp.lt.s32.totalorder %s8664_s18, %s8660_s29 }
  0xb3   : > { %p8662_p7 = pnand %p8661_p6, %p9031_p4 }
  0xb4   : > { %p8667_p0 = por %p8666_p13, %p8665_p12 }
  0xb5   : > { %p8663_p11 = pneg %p8662_p7 }
  0xb7   : > { %p8668_p1 = pnand %p8667_p0, %p8663_p11 }
  0xb9   : > { %8671 = shalt.err (!%p8668_p1)
}
  0xba   : > { %s10577_s5 = scalar_lea.sflag [#allocation10], %s9074_s13  ;;  %s603_s14 = scalar_lea.hbm %s10527_s6, %s8892_s21 }
  0xbb   : > { %8085 = dma.hbm_to_vmem [thread:$0]  (%p9031_p4), %s572_s20, 16, %s574_s16, %s10577_s5  }
  0xbc   : > { %s600_s3 = scalar_lea.vmem [#allocation14], %s9077_s15  ;;  %s605_s0 = sshll.u32 %s603_s14, 4  ;;  %s606_s0 = int_to_ptr.hbm [resolvable:$true] %s605_s0 }
  0xbd   : > { %s607_s30 = sshll.u32 %s600_s3, 4  ;;  %s5952_s19 = sshll.u32 %s9077_s15, 4  ;;  %s608_s30 = int_to_ptr.vmem [resolvable:$true] %s607_s30 }
  0xbe   : > { %s8686_s29 = sshra.s32 %s606_s0, 4  ;;  %s8692_s20 = scalar_lea.hbm %s10527_s6, 8  ;;  %s8687_s29 = int_to_ptr.hbm [resolvable:$true] %s8686_s29 }
  0xbf   : > { %s8688_s26 = scalar_lea.hbm %s8687_s29, 1  ;;  %p8693_p7 = scmp.lt.s32.totalorder %s8687_s29, %s10527_s6 }
  0xc0   : > { %p8689_p2 = scmp.ne.s32.totalorder %s8687_s29, %s8688_s26  ;;  %p8694_p11 = scmp.lt.s32.totalorder %s8692_s20, %s8688_s26 }
  0xc2   : > { %p8690_p3 = pnand %p8689_p2, %p9031_p4  ;;  %p8695_p12 = por %p8694_p11, %p8693_p7 }
  0xc4   : > { %p8691_p6 = pneg %p8690_p3 }
  0xc6   : > { %p8696_p13 = pnand %p8695_p12, %p8691_p6 }
  0xc8   : > { %8699 = shalt.err (!%p8696_p13)
}
  0xc9   : > { %s10578_s28 = scalar_lea.sflag [#allocation13], %s9074_s13  ;;  %s5953_s5 = sshll.u32 %s8892_s21, 4 }
  0xca   : > { %8087 = dma.hbm_to_vmem [thread:$0]  (%p9031_p4), %s606_s0, 16, %s608_s30, %s10578_s28  }
  0xcb   : > { %s644_s14 = scalar_lea.hbm %s10529_s8, %s5953_s5  ;;  %s640_s3 = scalar_lea.vmem [#allocation17], %s5952_s19 }
  0xcc   : > { %s648_s24 = sshll.u32 %s640_s3, 4  ;;  %s646_s18 = sshll.u32 %s644_s14, 4  ;;  %s649_s24 = int_to_ptr.vmem [resolvable:$true] %s648_s24  ;;  %s647_s18 = int_to_ptr.hbm [resolvable:$true] %s646_s18 }
  0xcd   : > { %s8714_s29 = sshra.s32 %s647_s18, 4  ;;  %s8720_s30 = scalar_lea.hbm %s10529_s8, 128  ;;  %s8715_s29 = int_to_ptr.hbm [resolvable:$true] %s8714_s29 }
  0xce   : > { %s8716_s26 = scalar_lea.hbm %s8715_s29, 16  ;;  %p8721_p3 = scmp.lt.s32.totalorder %s8715_s29, %s10529_s8 }
  0xcf   : > { %p8717_p0 = scmp.ne.s32.totalorder %s8715_s29, %s8716_s26  ;;  %p8722_p6 = scmp.lt.s32.totalorder %s8720_s30, %s8716_s26 }
  0xd1   : > { %p8718_p1 = pnand %p8717_p0, %p9031_p4  ;;  %p8723_p7 = por %p8722_p6, %p8721_p3 }
  0xd3   : > { %p8719_p2 = pneg %p8718_p1 }
  0xd5   : > { %p8724_p11 = pnand %p8723_p7, %p8719_p2 }
  0xd7   : > { %8727 = shalt.err (!%p8724_p11)
}
  0xd8   : > { %8089 = dma.hbm_to_vmem [thread:$0]  (%p9031_p4), %s647_s18, 256, %s649_s24, %s615_s23  }
  0xd9   : > { %s683_s5 = scalar_lea.hbm %s10531_s10, %s8892_s21  ;;  %s680_s1 = scalar_lea.vmem [#allocation20], %s9077_s15 }
  0xda   : > { %s687_s17 = sshll.u32 %s680_s1, 4  ;;  %s685_s14 = sshll.u32 %s683_s5, 4  ;;  %s688_s17 = int_to_ptr.vmem [resolvable:$true] %s687_s17  ;;  %s686_s14 = int_to_ptr.hbm [resolvable:$true] %s685_s14 }
  0xdb   : > { %s8742_s3 = sshra.s32 %s686_s14, 4  ;;  %s8748_s23 = scalar_lea.hbm %s10531_s10, 8  ;;  %s8743_s3 = int_to_ptr.hbm [resolvable:$true] %s8742_s3 }
  0xdc   : > { %s8744_s29 = scalar_lea.hbm %s8743_s3, 1  ;;  %p8749_p1 = scmp.lt.s32.totalorder %s8743_s3, %s10531_s10 }
  0xdd   : > { %p8745_p12 = scmp.ne.s32.totalorder %s8743_s3, %s8744_s29  ;;  %p8750_p2 = scmp.lt.s32.totalorder %s8748_s23, %s8744_s29 }
  0xdf   : > { %p8746_p13 = pnand %p8745_p12, %p9031_p4  ;;  %p8751_p3 = por %p8750_p2, %p8749_p1 }
  0xe1   : > { %p8747_p0 = pneg %p8746_p13 }
  0xe3   : > { %p8752_p6 = pnand %p8751_p3, %p8747_p0 }
  0xe5   : > { %8755 = shalt.err (!%p8752_p6)
}
  0xe6   : > { %s10579_s16 = scalar_lea.sflag [#allocation19], %s9074_s13  ;;  %s717_s22 = scalar_lea.hbm %s10533_s12, %s8892_s21 }
  0xe7   : > { %8091 = dma.hbm_to_vmem [thread:$0]  (%p9031_p4), %s686_s14, 16, %s688_s17, %s10579_s16  }
  0xe8   : > { %s714_s19 = scalar_lea.vmem [#allocation23], %s9077_s15  ;;  %s719_s5 = sshll.u32 %s717_s22, 4  ;;  %s720_s5 = int_to_ptr.hbm [resolvable:$true] %s719_s5 }
  0xe9   : > { %s721_s28 = sshll.u32 %s714_s19, 4  ;;  %s8770_s1 = sshra.s32 %s720_s5, 4  ;;  %s722_s28 = int_to_ptr.vmem [resolvable:$true] %s721_s28  ;;  %s8771_s1 = int_to_ptr.hbm [resolvable:$true] %s8770_s1 }
  0xea   : > { %s8772_s3 = scalar_lea.hbm %s8771_s1, 1  ;;  %s8776_s17 = scalar_lea.hbm %s10533_s12, 8 }
  0xeb   : > { %p8773_p7 = scmp.ne.s32.totalorder %s8771_s1, %s8772_s3  ;;  %p8777_p13 = scmp.lt.s32.totalorder %s8771_s1, %s10533_s12 }
  0xec   : > { %p8778_p0 = scmp.lt.s32.totalorder %s8776_s17, %s8772_s3 }
  0xed   : > { %p8774_p11 = pnand %p8773_p7, %p9031_p4 }
  0xee   : > { %p8779_p1 = por %p8778_p0, %p8777_p13 }
  0xef   : > { %p8775_p12 = pneg %p8774_p11 }
  0xf1   : > { %p8780_p2 = pnand %p8779_p1, %p8775_p12 }
  0xf3   : > { %8783 = shalt.err (!%p8780_p2)
}
  0xf4   : > { %8093 = dma.hbm_to_vmem [thread:$0]  (%p9031_p4), %s720_s5, 16, %s722_s28, %s695_s25  }
  0xf5 PF: > { %730 = sbr.rel (%p9045_p10) target bundleno = 3305 (0xce9), region = 80  ;;  %s10581_s15 = sld [smem:[#allocation39_spill]] (!%p9045_p10) }
  0xfa   : > { %8843 = dma.done.wait (%p88_p5), [#allocation4], 256  }
  0xfb   : > { %8845 = vsyncadd (%p88_p5), [#allocation4], 4294967040  ;;  %s10582_s23 = sld [smem:[#allocation37_spill]]  ;;  %s9304_s18 = sand.u32 1, %s10581_s15  }
  0xfc   : > { %s738_s25 = scalar_lea.sflag [#allocation7], %s9304_s18 }
 0x101   : > { %s9307_s27 = sand.u32 1, %s10582_s23  }
 0x102   : > { %s8074_s13 = smul.u32 192, %s9307_s27 }
 0x104   : > { %s9311_s16 = scalar_lea.vmem [#allocation6], %s8074_s13 }
 0x105   : > { %8847 = dma.done.wait (%p9040_p8), %s738_s25, 3120  }
 0x106   : > { %8849 = vsyncadd (%p9040_p8), %s738_s25, 4294964176  ;;  %s8075_s30 = smul.u32 3, %s9307_s27  ;;  %s5959_s0 = sshll.u32 %s9307_s27, 6 }
 0x107   : > { %s758_s19 = scalar_lea.sflag [#allocation10], %s9304_s18  ;;  %s9322_s28 = scalar_lea.vmem [#allocation9], %s5959_s0 }
 0x108   : > { %s9319_s22 = scalar_lea.vmem [#allocation8], %s8075_s30 }
 0x109   : > { %8851 = dma.done.wait (%p9040_p8), %s758_s19, 1040  }
 0x10a   : > { %8853 = vsyncadd (%p9040_p8), %s758_s19, 4294966256  ;;  %s770_s5 = scalar_lea.vmem [#allocation11], %s9307_s27  ;;  %s777_s1 = scalar_lea.sflag [#allocation13], %s9304_s18 }
 0x10b   : > { %s779_s3 = scalar_lea.vmem [#allocation12], %s9307_s27 }
 0x10c   : > { %8855 = dma.done.wait (%p9040_p8), %s777_s1, 32  }
 0x10d   : > { %8857 = vsyncadd (%p9040_p8), %s777_s1, 4294967264  ;;  %s5960_s29 = sshll.u32 %s9307_s27, 10  ;;  %s788_s26 = scalar_lea.vmem [#allocation14], %s9307_s27 }
 0x10e   : > { %s795_s17 = scalar_lea.sflag [#allocation16], %s9304_s18  ;;  %s9338_s14 = scalar_lea.vmem [#allocation15], %s5960_s29 }
 0x10f   : > { %8859 = dma.done.wait (%p9040_p8), %s795_s17, 16640  }
 0x110   : > { %8861 = vsyncadd (%p9040_p8), %s795_s17, 4294950656  ;;  %s5961_s20 = sshll.u32 %s9307_s27, 4  ;;  %s815_s23 = scalar_lea.sflag [#allocation19], %s9304_s18 }
 0x111   : > { %s9345_s21 = scalar_lea.vmem [#allocation17], %s5961_s20  ;;  %s9348_s13 = scalar_lea.vmem [#allocation18], %s5960_s29 }
 0x112   : > { %8863 = dma.done.wait (%p9040_p8), %s815_s23, 16400  }
 0x113   : > { %8865 = vsyncadd (%p9040_p8), %s815_s23, 4294950896  ;;  %s827_s25 = scalar_lea.vmem [#allocation20], %s9307_s27  ;;  %s834_s30 = scalar_lea.sflag [#allocation22], %s9304_s18 }
 0x114   : > { %s836_s0 = scalar_lea.vmem [#allocation21], %s9307_s27 }
 0x115   : > { %8867 = dma.done.wait (%p9040_p8), %s834_s30, 32  }
 0x116   : > { %8869 = vsyncadd (%p9040_p8), %s834_s30, 4294967264  ;;  %s845_s19 = scalar_lea.vmem [#allocation23], %s9307_s27 }
 0x117   : > { %8871 = dma.done.wait (%p88_p5), [#allocation25], 16640  }
 0x118   : > { %8873 = vsyncadd (%p88_p5), [#allocation25], 4294950656  ;;  %951 = sbr.rel (%p5941_p9) target bundleno = 288 (0x120), region = 144 }
 0x11d   : > { %v952_v0 = vld [vmem:[#allocation3] sm:$0xff]  ;;  %v953_v1 = vld [vmem:[#allocation3 + $0x8] sm:$0xff] }
 0x11e   : > { %954 = vst [vmem:[#allocation2] sm:$0xff] %v952_v0 }
 0x11f   : > { %955 = vst [vmem:[#allocation2 + $0x8] sm:$0xff] %v953_v1 }
 0x120 PF: > { %v6052_v2 = vld [vmem:[%s9311_s16 + $0xa8] sm:$0xf]  ;;  %v7676_v3 = vld [vmem:[%s9311_s16 + $0xb0] sm:$0xf0]  ;;  %v7675_v4 = vld [vmem:[%s9311_s16 + $0xac] sm:$0xf] }
 0x121   : > { %v6053_v5 = vor.u32 %v7676_v3, %v6052_v2  ;;  %v6054_v6 = vld [vmem:[%s9311_s16 + $0xb4] sm:$0xf0]  ;;  %v6040_v7 = vld [vmem:[%s9311_s16 + $0x90] sm:$0xf]  ;;  %v7673_v8 = vld [vmem:[%s9311_s16 + $0x98] sm:$0xf0] }
 0x122   : > { %v6057_v9 = vor.u32 %v7675_v4, %v6054_v6  ;;  %v7672_v10 = vld [vmem:[%s9311_s16 + $0x94] sm:$0xf]  ;;  %v6042_v11 = vld [vmem:[%s9311_s16 + $0x9c] sm:$0xf0]  ;;  %v6041_v12 = vor.u32 %v7673_v8, %v6040_v7  ;;  %v6028_v14 = vld [vmem:[%s9311_s16 + $0x78] sm:$0xf] }
 0x123   : > { %1127 = vmatpush.bf16.msra.mxu0 %v6053_v5  ;;  %v6045_v13 = vor.u32 %v7672_v10, %v6042_v11  ;;  %v7670_v15 = vld [vmem:[%s9311_s16 + $0x80] sm:$0xf0]  ;;  %v7669_v16 = vld [vmem:[%s9311_s16 + $0x7c] sm:$0xf]  ;;  %v6030_v17 = vld [vmem:[%s9311_s16 + $0x84] sm:$0xf0] }
 0x124   : > { %1141 = vmatpush.bf16.msra.mxu1 %v6057_v9  ;;  %v6029_v18 = vor.u32 %v7670_v15, %v6028_v14  ;;  %v6033_v19 = vor.u32 %v7669_v16, %v6030_v17  ;;  %v6016_v20 = vld [vmem:[%s9311_s16 + $0x60] sm:$0xf]  ;;  %v7667_v21 = vld [vmem:[%s9311_s16 + $0x68] sm:$0xf0]  ;;  %v7666_v22 = vld [vmem:[%s9311_s16 + $0x64] sm:$0xf] }
 0x125   : > { %v6018_v23 = vld [vmem:[%s9311_s16 + $0x6c] sm:$0xf0]  ;;  %v6017_v24 = vor.u32 %v7667_v21, %v6016_v20  ;;  %v6004_v25 = vld [vmem:[%s9311_s16 + $0x48] sm:$0xf]  ;;  %v7677_v27 = vld [vmem:[%s9311_s16 + $0xb8] sm:$0xf0] }
 0x126   : > { %v6060_v26 = vld [vmem:[%s9311_s16 + $0xb0] sm:$0xf]  ;;  %v6021_v28 = vor.u32 %v7666_v22, %v6018_v23  ;;  %v7664_v29 = vld [vmem:[%s9311_s16 + $0x50] sm:$0xf0]  ;;  %v6048_v31 = vld [vmem:[%s9311_s16 + $0x98] sm:$0xf] }
 0x127   : > { %1128 = vmatpush.bf16.msra.mxu0 %v6041_v12  ;;  %v6061_v30 = vor.u32 %v7677_v27, %v6060_v26  ;;  %v7674_v32 = vld [vmem:[%s9311_s16 + $0xa0] sm:$0xf0]  ;;  %v7663_v33 = vld [vmem:[%s9311_s16 + $0x4c] sm:$0xf]  ;;  %v6006_v34 = vld [vmem:[%s9311_s16 + $0x54] sm:$0xf0]  ;;  %v6005_v36 = vor.u32 %v7664_v29, %v6004_v25 }
 0x128   : > { %1142 = vmatpush.bf16.msra.mxu1 %v6045_v13  ;;  %v6049_v35 = vor.u32 %v7674_v32, %v6048_v31  ;;  %v6036_v37 = vld [vmem:[%s9311_s16 + $0x80] sm:$0xf]  ;;  %v7671_v38 = vld [vmem:[%s9311_s16 + $0x88] sm:$0xf0]  ;;  %v6009_v39 = vor.u32 %v7663_v33, %v6006_v34  ;;  %v5992_v40 = vld [vmem:[%s9311_s16 + $0x30] sm:$0xf] }
 0x129   : > { %1155 = vmatpush.bf16.msra.mxu2 %v6061_v30  ;;  %v7661_v41 = vld [vmem:[%s9311_s16 + $0x38] sm:$0xf0]  ;;  %v7660_v42 = vld [vmem:[%s9311_s16 + $0x34] sm:$0xf]  ;;  %v5994_v43 = vld [vmem:[%s9311_s16 + $0x3c] sm:$0xf0]  ;;  %v6037_v44 = vor.u32 %v7671_v38, %v6036_v37 }
 0x12a   : > { %v5993_v45 = vor.u32 %v7661_v41, %v5992_v40  ;;  %v6024_v46 = vld [vmem:[%s9311_s16 + $0x68] sm:$0xf]  ;;  %v7668_v47 = vld [vmem:[%s9311_s16 + $0x70] sm:$0xf0]  ;;  %v5997_v48 = vor.u32 %v7660_v42, %v5994_v43  ;;  %v5980_v49 = vld [vmem:[%s9311_s16 + $0x18] sm:$0xf]  ;;  %v1169_v42 = vlaneseq }
 0x12b   : > { %1129 = vmatpush.bf16.msra.mxu0 %v6029_v18  ;;  %v7658_v50 = vld [vmem:[%s9311_s16 + $0x20] sm:$0xf0]  ;;  %v7657_v51 = vld [vmem:[%s9311_s16 + $0x1c] sm:$0xf]  ;;  %v5982_v52 = vld [vmem:[%s9311_s16 + $0x24] sm:$0xf0]  ;;  %v6025_v53 = vor.u32 %v7668_v47, %v6024_v46 }
 0x12c   : > { %1143 = vmatpush.bf16.msra.mxu1 %v6033_v19  ;;  %v5981_v54 = vor.u32 %v7658_v50, %v5980_v49  ;;  %v6012_v55 = vld [vmem:[%s9311_s16 + $0x50] sm:$0xf]  ;;  %v7665_v56 = vld [vmem:[%s9311_s16 + $0x58] sm:$0xf0]  ;;  %v5985_v57 = vor.u32 %v7657_v51, %v5982_v52  ;;  %v5968_v58 = vld [vmem:[%s9311_s16] sm:$0xf] }
 0x12d   : > { %1156 = vmatpush.bf16.msra.mxu2 %v6049_v35  ;;  %v7655_v59 = vld [vmem:[%s9311_s16 + $0x8] sm:$0xf0]  ;;  %v7654_v60 = vld [vmem:[%s9311_s16 + $0x4] sm:$0xf]  ;;  %v5970_v61 = vld [vmem:[%s9311_s16 + $0xc] sm:$0xf0]  ;;  %v6013_v63 = vor.u32 %v7665_v56, %v6012_v55 }
 0x12e   : > { %v9410_v62 = vld [vmem:[#allocation2] sm:$0xff]  ;;  %v5969_v0 = vor.u32 %v7655_v59, %v5968_v58  ;;  %v9412_v1 = vld [vmem:[#allocation2 + $0x8] sm:$0xff]  ;;  %v6000_v2 = vld [vmem:[%s9311_s16 + $0x38] sm:$0xf]  ;;  %v5973_v4 = vor.u32 %v7654_v60, %v5970_v61  ;;  %vm1217_vm0 = vcmask 130048   ;;  %s8906_s15 = smov 112  }
 0x12f   : > { %1130 = vmatpush.bf16.msra.mxu0 %v6017_v24  ;;  %v7662_v3 = vld [vmem:[%s9311_s16 + $0x40] sm:$0xf0]  ;;  %v958_v5 = vpack.c.bf16 %v9412_v1, %v9410_v62  ;;  %v5988_v7 = vld [vmem:[%s9311_s16 + $0x20] sm:$0xf]  ;;  %v7659_v8 = vld [vmem:[%s9311_s16 + $0x28] sm:$0xf0] }
 0x130   : > { %1144 = vmatpush.bf16.msra.mxu1 %v6021_v28  ;;  %v6001_v6 = vor.u32 %v7662_v3, %v6000_v2  ;;  %v5989_v9 = vor.u32 %v7659_v8, %v5988_v7  ;;  %v5976_v10 = vld [vmem:[%s9311_s16 + $0x8] sm:$0xf]  ;;  %v7656_v11 = vld [vmem:[%s9311_s16 + $0x10] sm:$0xf0]  ;;  %v991_v15 = vld [vmem:[%s9319_s22] sm:$0x7] }
 0x131   : > { %1157 = vmatpush.bf16.msra.mxu2 %v6037_v44  ;;  %v5977_v12 = vor.u32 %v7656_v11, %v5976_v10  ;;  %v994_v16 = vperm.slane %v991_v15, 1  ;;  %v993_v19 = vperm.slane %v991_v15, 0  ;;  %s8907_s24 = smov 96   ;;  %v995_v30 = vperm.slane %v991_v15, 2  ;;  %s8908_s18 = smov 80  }
 0x132   : > { %s8909_s16 = smov 64   ;;  %s8910_s22 = smov 16   ;;  %v1170_v43 = vshrl.u32 %v1169_v42, 7  ;;  %v1173_v44 = vand.u32 127, %v1169_v42  ;;  %vm1824_vm3 = vcmask 261120   ;;  %vm1827_vm4 = vcmask 392192  }
 0x133   : > { %1131 = vmatpush.bf16.msra.mxu0 %v6005_v36  ;;  %s8911_s1 = smov 48   ;;  %s8912_s29 = smov 32   ;;  %vm1830_vm5 = vcmask 523264   ;;  %vm1833_vm6 = vcmask 654336   ;;  %vm1836_vm7 = vcmask 785408   ;;  %vm1839_vm8 = vcmask 916480  }
 0x134   : > { %1145 = vmatpush.bf16.msra.mxu1 %v6009_v39  ;;  %v1178_v46 = vand.u32 1, %v1170_v43  ;;  %v1202_v47 = vand.u32 1, %v1173_v44  ;;  %v1171_v49 = vadd.s32 8, %v1170_v43  ;;  %s10588_s27 = sld [smem:[#allocation39_spill]] }
 0x135   : > { %1158 = vmatpush.bf16.msra.mxu2 %v6025_v53 }
 0x136   : > { %vm9455_vm1 = vcmp.eq.s32.totalorder %v1178_v46, %v1202_v47  ;;  %v1185_v53 = vand.u32 1, %v1171_v49 }
 0x137   : > { %1132 = vmatpush.bf16.msra.mxu0 %v5993_v45 }
 0x138   : > { %1146 = vmatpush.bf16.msra.mxu1 %v5997_v48  ;;  %vm9462_vm2 = vcmp.eq.s32.totalorder %v1185_v53, %v1202_v47 }
 0x139   : > { %1159 = vmatpush.bf16.msra.mxu2 %v6013_v63 }
 0x13a   : > { %p7134_p4 = scmp.ne.s32.totalorder %s10588_s27, 7 }
 0x13b   : > { %1133 = vmatpush.bf16.msra.mxu0 %v5981_v54 }
 0x13c   : > { %1147 = vmatpush.bf16.msra.mxu1 %v5985_v57 }
 0x13d   : > { %1160 = vmatpush.bf16.msra.mxu2 %v6001_v6 }
 0x13f   : > { %1134 = vmatpush.bf16.msra.mxu0 %v5969_v0 }
 0x140   : > { %1148 = vmatpush.bf16.msra.mxu1 %v5973_v4 }
 0x141   : > { %1161 = vmatpush.bf16.msra.mxu2 %v5989_v9 }
 0x142   : > { %1135 = vmatmul.bf16.vlgmr.msra.gmra.mxu0 %v958_v5 }
 0x143   : > { %1149 = vmatmul.bf16.vlgmr.msra.gmra.mxu1 %v958_v5 }
 0x145   : > { %1162 = vmatpush.bf16.msra.mxu2 %v5977_v12 }
 0x148   : > { %1163 = vmatmul.bf16.vlgmr.msra.gmra.mxu2 %v958_v5 }
 0x1bf   : > { %v1136_v13 = vpop.f32.mrf.mxu0 }
 0x1c0   : > { %v1150_v14 = vpop.f32.mrf.mxu1  ;;  %v1137_v24 = vadd.f32 %v1136_v13, %v993_v19 }
 0x1c1   : > { %v1151_v20 = vadd.f32 %v1150_v14, %v994_v16 }
 0x1c2   : > { %v1212_v27 = vmul.f32 0.25, %v1137_v24 }
 0x1c7   : > { %v1138_v17 = vpop.f32.mrf.mxu0 }
 0x1c8   : > { %v1152_v18 = vpop.f32.mrf.mxu1  ;;  %v1139_v22 = vadd.f32 %v1138_v17, %v993_v19 }
 0x1c9   : > { %v1153_v21 = vadd.f32 %v1152_v18, %v994_v16 }
 0x1ca   : > { %v1213_v26 = vmul.f32 0.25, %v1139_v22 }
 0x1cb   : > { %v9423_v23 = vpack.c.bf16 %v1153_v21, %v1151_v20  ;;  %v1164_v29 = vpop.f32.mrf.mxu2 }
 0x1cc   : > { %v9429_v28 = vpack.c.bf16 %v1213_v26, %v1212_v27  ;;  %v1165_v31 = vadd.f32 %v1164_v29, %v995_v30 }
 0x1cd   : > { %1284 = vrot.lane.b32.xlu2 %v9423_v23, %s8906_s15  ;;  %v1222_v25 = vsel %vm1217_vm0, %v9423_v23, 0 }
 0x1ce   : > { %1231 = vmatpush.bf16.xpose.msra.mxu3 %v1222_v25 }
 0x1d3   : > { %v1166_v32 = vpop.f32.mrf.mxu2 }
 0x1d4   : > { %v1167_v33 = vadd.f32 %v1166_v32, %v995_v30 }
 0x1d5   : > { %1281 = vrot.lane.b32.xlu2 %v9429_v28, %s8906_s15  ;;  %6062 = vmatmul.msk.bf16.vlgmr.msra.gmra.mxu3 %vm1217_vm0, %v9429_v28 }
 0x1d6   : > { %v9439_v34 = vpack.c.bf16 %v1167_v33, %v1165_v31 }
 0x1d8   : > { %1273 = vmatpush.bf16.msrb.mxu3 %v9439_v34 }
 0x1dd   : > { %1352 = vrot.lane.b32.xlu2 %v9429_v28, %s8907_s24 }
 0x1e5   : > { %1421 = vrot.lane.b32.xlu2 %v9429_v28, %s8908_s18 }
 0x1ed   : > { %1492 = vrot.lane.b32.xlu2 %v9423_v23, %s8909_s16 }
 0x1f5   : > { %1490 = vrot.lane.b32.xlu2 %v9429_v28, %s8909_s16 }
 0x1fd   : > { %1699 = vrot.lane.b32.xlu2 %v9423_v23, %s8910_s22 }
 0x227   : > { %v1285_v35 = vpop.permute.xlu2 %1284 }
 0x228   : > { %v1290_v36 = vsel %vm1217_vm0, %v1285_v35, 0 }
 0x229   : > { %1299 = vmatpush.bf16.xpose.msra.mxu3 %v1290_v36 }
 0x22f   : > { %v9449_v37 = vpop.permute.xlu2 %1281 }
 0x237   : > { %v1353_v38 = vpop.permute.xlu2 %1352 }
 0x23f   : > { %v9451_v39 = vpop.permute.xlu2 %1421 }
 0x247   : > { %v1493_v40 = vpop.permute.xlu2 %1492 }
 0x248   : > { %v1498_v41 = vsel %vm1217_vm0, %v1493_v40, 0 }
 0x249   : > { %1507 = vmatpush.bf16.xpose.msrb.mxu1 %v1498_v41 }
 0x24f   : > { %v1491_v45 = vpop.permute.xlu2 %1490 }
 0x250   : > { %6070 = vmatmul.msk.bf16.vlgmr.msrb.gmra.mxu1 %vm1217_vm0, %v1491_v45 }
 0x257   : > { %v1700_v32 = vpop.permute.xlu2 %1699 }
 0x258   : > { %v1233_v50 = vpop.f32.mrf.mxu3  ;;  %v1705_v35 = vsel %vm1217_vm0, %v1700_v32, 0 }
 0x259   : > { %v1238_v51 = vsel %vm9455_vm1, %v1233_v50, -1e+30 }
 0x25a   : > { %v1240_v52 = vsel %vm1217_vm0, %v1238_v51, -inf }
 0x25b   : > { %1241 = vmax.xlane.f32.xlu0 %v1240_v52 }
 0x260   : > { %v1235_v55 = vpop.f32.mrf.mxu3 }
 0x261   : > { %v1239_v56 = vsel %vm9462_vm2, %v1235_v55, -1e+30 }
 0x262   : > { %v1243_v57 = vsel %vm1217_vm0, %v1239_v56, -inf }
 0x263   : > { %1244 = vmax.xlane.f32.xlu0 %v1243_v57 }
 0x277   : > { %1354 = vrot.lane.b32.xlu0 %v9423_v23, %s8907_s24 }
 0x27f   : > { %1561 = vrot.lane.b32.xlu0 %v9423_v23, %s8911_s1 }
 0x287   : > { %1630 = vrot.lane.b32.xlu0 %v9423_v23, %s8912_s29 }
 0x28f   : > { %1697 = vrot.lane.b32.xlu0 %v9429_v28, %s8910_s22 }
 0x2cd   : > { %v1509_v11 = vpop.f32.mrf.mxu1 }
 0x2ce   : > { %v1242_v58 = vpop.xlane.xlu0 %1241  ;;  %v1514_v36 = vsel %vm9455_vm1, %v1509_v11, -1e+30 }
 0x2cf   : > { %v1246_v59 = vsub.f32 %v1238_v51, %v1242_v58 }
 0x2d1   : > { %v1248_v60 = vmul.f32 1.442695, %v1246_v59 }
 0x2d3   : > { %8230 = vpow2.f32 %v1248_v60 }
 0x2d5   : > { %v1511_v12 = vpop.f32.mrf.mxu1 }
 0x2d6   : > { %v1245_v61 = vpop.xlane.xlu0 %1244  ;;  %v9490_v13 = vsel %vm9462_vm2, %v1511_v12, -1e+30 }
 0x2d7   : > { %v1247_v63 = vsub.f32 %v1239_v56, %v1245_v61  ;;  %v1519_v14 = vsel %vm1217_vm0, %v9490_v13, -inf }
 0x2d9   : > { %v8231_v0 = vpop.eup %8230  ;;  %v1250_v2 = vmul.f32 1.442695, %v1247_v63 }
 0x2da   : > { %v1252_v3 = vsel %vm1217_vm0, %v8231_v0, 0.0 }
 0x2db   : > { %8232 = vpow2.f32 %v1250_v2  ;;  %1253 = vadd.xlane.f32.xlu1 %v1252_v3 }
 0x2e1   : > { %v8233_v4 = vpop.eup %8232 }
 0x2e2   : > { %v1255_v5 = vsel %vm1217_vm0, %v8233_v4, 0.0 }
 0x2e3   : > { %1256 = vadd.xlane.f32.xlu1 %v1255_v5 }
 0x2e9   : > { %v1355_v6 = vpop.permute.xlu0 %1354 }
 0x2ea   : > { %v1360_v7 = vsel %vm1217_vm0, %v1355_v6, 0 }
 0x2eb   : > { %1369 = vmatpush.bf16.xpose.msrb.mxu2 %v1360_v7 }
 0x2f1   : > { %v1562_v8 = vpop.permute.xlu0 %1561 }
 0x2f2   : > { %6066 = vmatmul.msk.bf16.vlgmr.msrb.gmra.mxu2 %vm1217_vm0, %v1353_v38  ;;  %v1567_v24 = vsel %vm1217_vm0, %v1562_v8, 0 }
 0x2f9   : > { %v1631_v9 = vpop.permute.xlu0 %1630 }
 0x2fa   : > { %v1636_v10 = vsel %vm1217_vm0, %v1631_v9, 0 }
 0x2fb   : > { %1645 = vmatpush.bf16.xpose.msra.mxu1 %v1636_v10 }
 0x2fc   : > { %1423 = vrot.lane.b32.xlu1 %v9423_v23, %s8908_s18 }
 0x301   : > { %v1698_v38 = vpop.permute.xlu0 %1697 }
 0x304   : > { %1559 = vrot.lane.b32.xlu1 %v9429_v28, %s8911_s1 }
 0x30c   : > { %1628 = vrot.lane.b32.xlu1 %v9429_v28, %s8912_s29 }
 0x336   : > { %1520 = vmax.xlane.f32.xlu1 %v1519_v14 }
 0x34e   : > { %v1254_v15 = vpop.xlane.xlu1 %1253 }
 0x34f   : > { %8234 = vrcp.f32 %v1254_v15 }
 0x355   : > { %v8235_v17 = vpop.eup %8234 }
 0x356   : > { %v1257_v16 = vpop.xlane.xlu1 %1256  ;;  %v1260_v19 = vmul.f32 %v8235_v17, %v8231_v0 }
 0x357   : > { %8236 = vrcp.f32 %v1257_v16 }
 0x35d   : > { %v8237_v18 = vpop.eup %8236 }
 0x35e   : > { %v1261_v20 = vmul.f32 %v8237_v18, %v8233_v4 }
 0x360   : > { %v1262_v21 = vpack.c.bf16 %v1261_v20, %v1260_v19 }
 0x362   : > { %6063 = vmatmul.msk.bf16.vlgmr.msrb.gmra.mxu3 %vm1217_vm0, %v1262_v21 }
 0x36e   : > { %v1424_v22 = vpop.permute.xlu1 %1423 }
 0x36f   : > { %v1429_v23 = vsel %vm1217_vm0, %v1424_v22, 0 }
 0x370   : > { %1438 = vmatpush.bf16.xpose.msrb.mxu3 %v1429_v23 }
 0x372   : > { %6064 = vmatmul.msk.bf16.vlgmr.msra.gmra.mxu3 %vm1217_vm0, %v9449_v37  ;;  %v1516_v37 = vsel %vm1217_vm0, %v1514_v36, -inf }
 0x375   : > { %v1371_v25 = vpop.f32.mrf.mxu2 }
 0x376   : > { %v1376_v26 = vsel %vm9455_vm1, %v1371_v25, -1e+30  ;;  %v1560_v27 = vpop.permute.xlu1 %1559 }
 0x377   : > { %v1378_v28 = vsel %vm1217_vm0, %v1376_v26, -inf }
 0x378   : > { %1576 = vmatpush.bf16.xpose.msra.mxu3 %v1567_v24  ;;  %1379 = vmax.xlane.f32.xlu0 %v1378_v28 }
 0x37d   : > { %v1373_v29 = vpop.f32.mrf.mxu2 }
 0x37e   : > { %v1377_v30 = vsel %vm9462_vm2, %v1373_v29, -1e+30  ;;  %v1629_v31 = vpop.permute.xlu1 %1628 }
 0x37f   : > { %6074 = vmatmul.msk.bf16.vlgmr.msra.gmra.mxu1 %vm1217_vm0, %v1629_v31  ;;  %v1381_v33 = vsel %vm1217_vm0, %v1377_v30, -inf }
 0x380   : > { %1382 = vmax.xlane.f32.xlu2 %v1381_v33 }
 0x382   : > { %6068 = vmatmul.msk.bf16.vlgmr.msrb.gmra.mxu3 %vm1217_vm0, %v9451_v39 }
 0x383   : > { %1714 = vmatpush.bf16.xpose.msrb.mxu3 %v1705_v35 }
 0x388   : > { %1517 = vmax.xlane.f32.xlu2 %v1516_v37 }
 0x392   : > { %6072 = vmatmul.msk.bf16.vlgmr.msra.gmra.mxu3 %vm1217_vm0, %v1560_v27 }
 0x3a2   : > { %6076 = vmatmul.msk.bf16.vlgmr.msrb.gmra.mxu3 %vm1217_vm0, %v1698_v38 }
 0x3a9   : > { %v1521_v6 = vpop.xlane.xlu1 %1520 }
 0x3aa   : > { %v1523_v8 = vsub.f32 %v9490_v13, %v1521_v6 }
 0x3ac   : > { %v1526_v11 = vmul.f32 1.442695, %v1523_v8 }
 0x3e5   : > { %v9514_v40 = vpop.f32.mrf.mxu3 }
 0x3eb   : > { %v1380_v47 = vpop.xlane.xlu0 %1379 }
 0x3ec   : > { %v1384_v50 = vsub.f32 %v1376_v26, %v1380_v47 }
 0x3ed   : > { %v9516_v41 = vpop.f32.mrf.mxu3 }
 0x3ee   : > { %v1386_v57 = vmul.f32 1.442695, %v1384_v50 }
 0x3f3   : > { %v1383_v42 = vpop.xlane.xlu2 %1382 }
 0x3f4   : > { %v1385_v43 = vsub.f32 %v1377_v30, %v1383_v42 }
 0x3f5   : > { %v1301_v44 = vpop.f32.mrf.mxu3 }
 0x3f6   : > { %v1388_v39 = vmul.f32 1.442695, %v1385_v43  ;;  %v9520_v45 = vsel %vm9455_vm1, %v1301_v44, -1e+30 }
 0x3f7   : > { %v1308_v46 = vsel %vm1217_vm0, %v9520_v45, -inf }
 0x3f8   : > { %8238 = vpow2.f32 %v1388_v39  ;;  %1309 = vmax.xlane.f32.xlu2 %v1308_v46 }
 0x3f9   : > { %8240 = vpow2.f32 %v1386_v57 }
 0x3fa   : > { %8242 = vpow2.f32 %v1526_v11 }
 0x3fb   : > { %v1518_v9 = vpop.xlane.xlu2 %1517 }
 0x3fc   : > { %v1647_v49 = vpop.f32.mrf.mxu1  ;;  %v1522_v12 = vsub.f32 %v1514_v36, %v1518_v9 }
 0x3fd   : > { %v9526_v51 = vsel %vm9455_vm1, %v1647_v49, -1e+30  ;;  %v1303_v56 = vpop.f32.mrf.mxu3 }
 0x3fe   : > { %v9528_v52 = vpop.eup %8238  ;;  %v1654_v53 = vsel %vm1217_vm0, %v9526_v51, -inf  ;;  %v1307_v58 = vsel %vm9462_vm2, %v1303_v56, -1e+30  ;;  %v1524_v16 = vmul.f32 1.442695, %v1522_v12 }
 0x3ff   : > { %1655 = vmax.xlane.f32.xlu1 %v1654_v53  ;;  %v1393_v55 = vsel %vm1217_vm0, %v9528_v52, 0.0  ;;  %v1311_v61 = vsel %vm1217_vm0, %v1307_v58, -inf  ;;  %v9543_v0 = vpop.eup %8240 }
 0x400   : > { %1394 = vadd.xlane.f32.xlu2 %v1393_v55  ;;  %v1390_v2 = vsel %vm1217_vm0, %v9543_v0, 0.0  ;;  %8244 = vpow2.f32 %v1524_v16  ;;  %v9568_v19 = vpop.eup %8242 }
 0x401   : > { %v1531_v21 = vsel %vm1217_vm0, %v9568_v19, 0.0 }
 0x404   : > { %v1649_v59 = vpop.f32.mrf.mxu1 }
 0x405   : > { %v9538_v60 = vsel %vm9462_vm2, %v1649_v59, -1e+30  ;;  %v1440_v3 = vpop.f32.mrf.mxu3 }
 0x406   : > { %v1657_v63 = vsel %vm1217_vm0, %v9538_v60, -inf  ;;  %v1445_v13 = vsel %vm9455_vm1, %v1440_v3, -1e+30  ;;  %v9573_v22 = vpop.eup %8244 }
 0x407   : > { %1312 = vmax.xlane.f32.xlu1 %v1311_v61  ;;  %1658 = vmax.xlane.f32.xlu0 %v1657_v63  ;;  %v1447_v20 = vsel %vm1217_vm0, %v1445_v13, -inf  ;;  %v1528_v24 = vsel %vm1217_vm0, %v9573_v22, 0.0 }
 0x40d   : > { %v1442_v4 = vpop.f32.mrf.mxu3 }
 0x40e   : > { %v9577_v23 = vsel %vm9462_vm2, %v1442_v4, -1e+30 }
 0x40f   : > { %1391 = vadd.xlane.f32.xlu0 %v1390_v2  ;;  %v1450_v26 = vsel %vm1217_vm0, %v9577_v23, -inf }
 0x415   : > { %v1578_v5 = vpop.f32.mrf.mxu3 }
 0x416   : > { %v9589_v28 = vsel %vm9455_vm1, %v1578_v5, -1e+30 }
 0x417   : > { %v1585_v30 = vsel %vm1217_vm0, %v9589_v28, -inf }
 0x418   : > { %1470 = vrot.lane.b32.xlu2 %v9439_v34, %s8908_s18 }
 0x41d   : > { %v1580_v7 = vpop.f32.mrf.mxu3 }
 0x41e   : > { %v9556_v10 = vsel %vm9462_vm2, %v1580_v7, -1e+30 }
 0x41f   : > { %v1588_v14 = vsel %vm1217_vm0, %v9556_v10, -inf }
 0x420   : > { %1332 = vrot.lane.b32.xlu1 %v9439_v34, %s8906_s15 }
 0x423   : > { %1401 = vrot.lane.b32.xlu0 %v9439_v34, %s8907_s24 }
 0x425   : > { %v1716_v15 = vpop.f32.mrf.mxu3 }
 0x426   : > { %v9562_v17 = vsel %vm9455_vm1, %v1716_v15, -1e+30 }
 0x427   : > { %v1723_v18 = vsel %vm1217_vm0, %v9562_v17, -inf }
 0x42d   : > { %v1718_v25 = vpop.f32.mrf.mxu3 }
 0x42e   : > { %v9585_v27 = vsel %vm9462_vm2, %v1718_v25, -1e+30 }
 0x42f   : > { %v1726_v29 = vsel %vm1217_vm0, %v9585_v27, -inf }
 0x441   : > { %1589 = vmax.xlane.f32.xlu2 %v1588_v14 }
 0x449   : > { %1724 = vmax.xlane.f32.xlu2 %v1723_v18 }
 0x44a   : > { %1448 = vmax.xlane.f32.xlu1 %v1447_v20 }
 0x44d   : > { %1532 = vadd.xlane.f32.xlu0 %v1531_v21 }
 0x452   : > { %1529 = vadd.xlane.f32.xlu1 %v1528_v24 }
 0x455   : > { %1451 = vmax.xlane.f32.xlu0 %v1450_v26 }
 0x45a   : > { %1727 = vmax.xlane.f32.xlu1 %v1726_v29 }
 0x45d   : > { %1586 = vmax.xlane.f32.xlu0 %v1585_v30 }
 0x46b   : > { %v1310_v31 = vpop.xlane.xlu2 %1309 }
 0x46c   : > { %v1314_v32 = vsub.f32 %v9520_v45, %v1310_v31 }
 0x46e   : > { %v1316_v33 = vmul.f32 1.442695, %v1314_v32 }
 0x470   : > { %8246 = vpow2.f32 %v1316_v33 }
 0x472   : > { %v9596_v54 = vpop.xlane.xlu1 %1655 }
 0x473   : > { %v1395_v45 = vpop.xlane.xlu2 %1394  ;;  %v1660_v21 = vsub.f32 %v9526_v51, %v9596_v54 }
 0x476   : > { %v9598_v35 = vpop.eup %8246 }
 0x477   : > { %v1320_v48 = vsel %vm1217_vm0, %v9598_v35, 0.0 }
 0x478   : > { %1321 = vadd.xlane.f32.xlu0 %v1320_v48 }
 0x47a   : > { %v1313_v36 = vpop.xlane.xlu1 %1312  ;;  %v9602_v42 = vpop.xlane.xlu0 %1658 }
 0x47b   : > { %v1315_v37 = vsub.f32 %v1307_v58, %v1313_v36  ;;  %v1471_v50 = vpop.permute.xlu2 %1470  ;;  %v1661_v25 = vsub.f32 %v9538_v60, %v9602_v42 }
 0x47d   : > { %v1318_v38 = vmul.f32 1.442695, %v1315_v37  ;;  %v1664_v51 = vmul.f32 1.442695, %v1661_v25 }
 0x47f   : > { %8248 = vpow2.f32 %v1318_v38 }
 0x482   : > { %v1392_v39 = vpop.xlane.xlu0 %1391 }
 0x483   : > { %8250 = vrcp.f32 %v1392_v39 }
 0x484   : > { %8252 = vrcp.f32 %v1395_v45 }
 0x485   : > { %v9604_v43 = vpop.eup %8248 }
 0x486   : > { %v1323_v44 = vsel %vm1217_vm0, %v9604_v43, 0.0 }
 0x487   : > { %1324 = vadd.xlane.f32.xlu2 %v1323_v44 }
 0x489   : > { %v8251_v46 = vpop.eup %8250 }
 0x48a   : > { %v8253_v47 = vpop.eup %8252  ;;  %v1398_v53 = vmul.f32 %v8251_v46, %v9543_v0 }
 0x48b   : > { %v1399_v55 = vmul.f32 %v8253_v47, %v9528_v52 }
 0x48d   : > { %v1400_v57 = vpack.c.bf16 %v1399_v55, %v1398_v53 }
 0x492   : > { %v1333_v49 = vpop.permute.xlu1 %1332 }
 0x493   : > { %1345 = vmatpush.bf16.msrb.mxu0 %v1333_v49 }
 0x495   : > { %v1402_v56 = vpop.permute.xlu0 %1401 }
 0x496   : > { %1414 = vmatpush.bf16.msra.mxu2 %v1402_v56 }
 0x497   : > { %1483 = vmatpush.bf16.msra.mxu0 %v1471_v50 }
 0x499   : > { %6067 = vmatmul.msk.bf16.vlgmr.msra.gmra.mxu2 %vm1217_vm0, %v1400_v57 }
 0x4b4   : > { %v1590_v58 = vpop.xlane.xlu2 %1589 }
 0x4b5   : > { %v1592_v59 = vsub.f32 %v9556_v10, %v1590_v58 }
 0x4b7   : > { %v1595_v61 = vmul.f32 1.442695, %v1592_v59 }
 0x4b9   : > { %8254 = vpow2.f32 %v1595_v61 }
 0x4bc   : > { %v1725_v31 = vpop.xlane.xlu2 %1724 }
 0x4bd   : > { %v1449_v63 = vpop.xlane.xlu1 %1448  ;;  %v1729_v32 = vsub.f32 %v9562_v17, %v1725_v31 }
 0x4be   : > { %v1453_v2 = vsub.f32 %v1445_v13, %v1449_v63 }
 0x4bf   : > { %v9612_v3 = vpop.eup %8254  ;;  %v1731_v54 = vmul.f32 1.442695, %v1729_v32 }
 0x4c0   : > { %v1455_v4 = vmul.f32 1.442695, %v1453_v2  ;;  %v1533_v0 = vpop.xlane.xlu0 %1532  ;;  %v1600_v5 = vsel %vm1217_vm0, %v9612_v3, 0.0 }
 0x4c1   : > { %1601 = vadd.xlane.f32.xlu1 %v1600_v5 }
 0x4c2   : > { %8256 = vpow2.f32 %v1455_v4 }
 0x4c3   : > { %8258 = vrcp.f32 %v1533_v0 }
 0x4c5   : > { %v1530_v52 = vpop.xlane.xlu1 %1529 }
 0x4c6   : > { %8260 = vrcp.f32 %v1530_v52 }
 0x4c8   : > { %v9616_v6 = vpop.eup %8256  ;;  %v1452_v7 = vpop.xlane.xlu0 %1451 }
 0x4c9   : > { %v1454_v8 = vsub.f32 %v9577_v23, %v1452_v7  ;;  %v1459_v9 = vsel %vm1217_vm0, %v9616_v6, 0.0  ;;  %v8259_v10 = vpop.eup %8258 }
 0x4ca   : > { %1460 = vadd.xlane.f32.xlu0 %v1459_v9  ;;  %v9622_v14 = vmul.f32 %v8259_v10, %v9568_v19  ;;  %v1662_v19 = vmul.f32 1.442695, %v1660_v21 }
 0x4cb   : > { %v1457_v11 = vmul.f32 1.442695, %v1454_v8 }
 0x4cc   : > { %v8261_v12 = vpop.eup %8260 }
 0x4cd   : > { %v9625_v15 = vmul.f32 %v8261_v12, %v9573_v22  ;;  %8262 = vpow2.f32 %v1457_v11  ;;  %v1728_v33 = vpop.xlane.xlu1 %1727 }
 0x4ce   : > { %v1730_v48 = vsub.f32 %v9585_v27, %v1728_v33 }
 0x4cf   : > { %v1538_v16 = vpack.c.bf16 %v9622_v14, %v9625_v15 }
 0x4d0   : > { %v1587_v13 = vpop.xlane.xlu0 %1586  ;;  %v1733_v37 = vmul.f32 1.442695, %v1730_v48 }
 0x4d1   : > { %v1591_v18 = vsub.f32 %v9589_v28, %v1587_v13 }
 0x4d3   : > { %v8263_v20 = vpop.eup %8262  ;;  %v1593_v23 = vmul.f32 1.442695, %v1591_v18 }
 0x4d4   : > { %v1462_v24 = vsel %vm1217_vm0, %v8263_v20, 0.0 }
 0x4d5   : > { %8264 = vpow2.f32 %v1593_v23  ;;  %1463 = vadd.xlane.f32.xlu2 %v1462_v24 }
 0x4d6   : > { %8266 = vpow2.f32 %v1662_v19 }
 0x4d7   : > { %8268 = vpow2.f32 %v1664_v51 }
 0x4da   : > { %1539 = vrot.lane.b32.xlu1 %v9439_v34, %s8909_s16 }
 0x4db   : > { %v9635_v22 = vpop.eup %8264 }
 0x4dc   : > { %v1597_v26 = vsel %vm1217_vm0, %v9635_v22, 0.0  ;;  %v9643_v28 = vpop.eup %8266 }
 0x4dd   : > { %1598 = vadd.xlane.f32.xlu2 %v1597_v26  ;;  %v1666_v29 = vsel %vm1217_vm0, %v9643_v28, 0.0  ;;  %v9647_v30 = vpop.eup %8268 }
 0x4de   : > { %1608 = vrot.lane.b32.xlu0 %v9439_v34, %s8911_s1  ;;  %v1669_v60 = vsel %vm1217_vm0, %v9647_v30, 0.0 }
 0x4e5   : > { %1667 = vadd.xlane.f32.xlu2 %v1666_v29 }
 0x4eb   : > { %v1322_v36 = vpop.xlane.xlu0 %1321 }
 0x4ec   : > { %8270 = vrcp.f32 %v1322_v36 }
 0x4ed   : > { %1670 = vadd.xlane.f32.xlu2 %v1669_v60  ;;  %8272 = vpow2.f32 %v1731_v54 }
 0x4f2   : > { %v8271_v42 = vpop.eup %8270 }
 0x4f3   : > { %v8273_v44 = vpop.eup %8272  ;;  %v1328_v45 = vmul.f32 %v8271_v42, %v9598_v35 }
 0x4f4   : > { %v1735_v17 = vsel %vm1217_vm0, %v8273_v44, 0.0 }
 0x4fa   : > { %v1325_v38 = vpop.xlane.xlu2 %1324 }
 0x4fb   : > { %8274 = vrcp.f32 %v1325_v38 }
 0x4fc   : > { %8276 = vpow2.f32 %v1733_v37 }
 0x501   : > { %v8275_v39 = vpop.eup %8274 }
 0x502   : > { %v1329_v46 = vmul.f32 %v8275_v39, %v9604_v43  ;;  %v8277_v47 = vpop.eup %8276  ;;  %v7685_v39 = vld [vmem:[%s9322_s28 + $0x38] sm:$0xff] }
 0x503   : > { %v1738_v27 = vsel %vm1217_vm0, %v8277_v47, 0.0  ;;  %1911 = vmatpush.bf16.msrb.mxu1 %v7685_v39  ;;  %v7799_v39 = vld [vmem:[%s9338_s14 + $0x38c] sm:$0xf] }
 0x504   : > { %1736 = vadd.xlane.f32.xlu1 %v1735_v17  ;;  %v1330_v49 = vpack.c.bf16 %v1329_v46, %v1328_v45  ;;  %v7684_v45 = vld [vmem:[%s9322_s28 + $0x30] sm:$0xff]  ;;  %v7683_v46 = vld [vmem:[%s9322_s28 + $0x28] sm:$0xff]  ;;  %v7682_v17 = vld [vmem:[%s9322_s28 + $0x20] sm:$0xff] }
 0x505   : > { %1677 = vrot.lane.b32.xlu2 %v9439_v34, %s8912_s29 }
 0x506   : > { %6065 = vmatmul.msk.bf16.vlgmr.msrb.gmra.mxu0 %vm1217_vm0, %v1330_v49  ;;  %v7680_v49 = vld [vmem:[%s9322_s28 + $0x10] sm:$0xff] }
 0x507   : > { %1912 = vmatpush.bf16.msrb.mxu1 %v7684_v45  ;;  %v6570_v45 = vld [vmem:[%s9338_s14 + $0x3c8] sm:$0xf0] }
 0x508   : > { %1739 = vadd.xlane.f32.xlu0 %v1738_v27  ;;  %v7679_v27 = vld [vmem:[%s9322_s28 + $0x8] sm:$0xff] }
 0x50b   : > { %1913 = vmatpush.bf16.msrb.mxu1 %v7683_v46  ;;  %v6496_v46 = vld [vmem:[%s9338_s14 + $0x300] sm:$0xf] }
 0x50d   : > { %1746 = vrot.lane.b32.xlu2 %v9439_v34, %s8910_s22 }
 0x50f   : > { %1914 = vmatpush.bf16.msrb.mxu1 %v7682_v17  ;;  %v6573_v17 = vor.u32 %v7799_v39, %v6570_v45  ;;  %v7726_v39 = vld [vmem:[%s9338_s14 + $0x13c] sm:$0xf0]  ;;  %v7718_v45 = vld [vmem:[%s9338_s14 + $0x104] sm:$0xf] }
 0x51c   : > { %v1416_v50 = vpop.f32.mrf.mxu2 }
 0x524   : > { %v1418_v35 = vpop.f32.mrf.mxu2 }
 0x525   : > { %v8189_v53 = vpack.i.bf16 %v1418_v35, %v1416_v50  ;;  %v7678_v35 = vld [vmem:[%s9322_s28] sm:$0xff] }
 0x527   : > { %8190 = vrot.lane.b32.xlu1 %v8189_v53, %s8912_s29 }
 0x534   : > { %v1602_v43 = vpop.xlane.xlu1 %1601 }
 0x53d   : > { %v1461_v55 = vpop.xlane.xlu0 %1460 }
 0x53e   : > { %8278 = vrcp.f32 %v1461_v55 }
 0x544   : > { %v8279_v58 = vpop.eup %8278 }
 0x545   : > { %v1467_v61 = vmul.f32 %v8279_v58, %v9616_v6 }
 0x548   : > { %v1464_v56 = vpop.xlane.xlu2 %1463 }
 0x549   : > { %8280 = vrcp.f32 %v1464_v56 }
 0x54c   : > { %v1540_v57 = vpop.permute.xlu1 %1539 }
 0x54d   : > { %1552 = vmatpush.bf16.msrb.mxu2 %v1540_v57 }
 0x54f   : > { %v8281_v59 = vpop.eup %8280 }
 0x550   : > { %v1468_v63 = vmul.f32 %v8281_v59, %v8263_v20  ;;  %6071 = vmatmul.msk.bf16.vlgmr.msrb.gmra.mxu2 %vm1217_vm0, %v1538_v16  ;;  %v1599_v34 = vpop.xlane.xlu2 %1598  ;;  %v1609_v2 = vpop.permute.xlu0 %1608 }
 0x551   : > { %1621 = vmatpush.bf16.msrb.mxu0 %v1609_v2  ;;  %8282 = vrcp.f32 %v1599_v34 }
 0x552   : > { %v1469_v4 = vpack.c.bf16 %v1468_v63, %v1467_v61  ;;  %8284 = vrcp.f32 %v1602_v43 }
 0x554   : > { %6069 = vmatmul.msk.bf16.vlgmr.msra.gmra.mxu0 %vm1217_vm0, %v1469_v4 }
 0x557   : > { %v8283_v5 = vpop.eup %8282 }
 0x558   : > { %v1668_v0 = vpop.xlane.xlu2 %1667  ;;  %v8285_v52 = vpop.eup %8284  ;;  %v1605_v7 = vmul.f32 %v8283_v5, %v9635_v22 }
 0x559   : > { %8286 = vrcp.f32 %v1668_v0  ;;  %v1606_v6 = vmul.f32 %v8285_v52, %v9612_v3 }
 0x55b   : > { %v1607_v9 = vpack.c.bf16 %v1606_v6, %v1605_v7 }
 0x55f   : > { %v8287_v10 = vpop.eup %8286 }
 0x560   : > { %v1671_v8 = vpop.xlane.xlu2 %1670  ;;  %v1674_v12 = vmul.f32 %v8287_v10, %v9643_v28 }
 0x561   : > { %8288 = vrcp.f32 %v1671_v8 }
 0x564   : > { %6073 = vmatmul.msk.bf16.vlgmr.msrb.gmra.mxu0 %vm1217_vm0, %v1607_v9 }
 0x567   : > { %v8289_v11 = vpop.eup %8288 }
 0x568   : > { %v1675_v14 = vmul.f32 %v8289_v11, %v9647_v30  ;;  %v1678_v15 = vpop.permute.xlu2 %1677 }
 0x569   : > { %1690 = vmatpush.bf16.msra.mxu2 %v1678_v15 }
 0x56a   : > { %v1676_v16 = vpack.c.bf16 %v1675_v14, %v1674_v12 }
 0x56c   : > { %6075 = vmatmul.msk.bf16.vlgmr.msra.gmra.mxu2 %vm1217_vm0, %v1676_v16 }
 0x570   : > { %v1747_v13 = vpop.permute.xlu2 %1746 }
 0x571   : > { %1759 = vmatpush.bf16.msra.mxu0 %v1747_v13 }
 0x577   : > { %v1737_v18 = vpop.xlane.xlu1 %1736 }
 0x578   : > { %8290 = vrcp.f32 %v1737_v18 }
 0x57b   : > { %v1740_v3 = vpop.xlane.xlu0 %1739 }
 0x57c   : > { %8292 = vrcp.f32 %v1740_v3 }
 0x57e   : > { %v8291_v20 = vpop.eup %8290 }
 0x57f   : > { %v1743_v23 = vmul.f32 %v8291_v20, %v8273_v44 }
 0x582   : > { %v8293_v21 = vpop.eup %8292 }
 0x583   : > { %v1744_v24 = vmul.f32 %v8293_v21, %v8277_v47  ;;  %v1347_v22 = vpop.f32.mrf.mxu0  ;;  %v7681_v47 = vld [vmem:[%s9322_s28 + $0x18] sm:$0xff] }
 0x584   : > { %1915 = vmatpush.bf16.msrb.mxu1 %v7681_v47  ;;  %v7790_v47 = vld [vmem:[%s9338_s14 + $0x33c] sm:$0xf0] }
 0x585   : > { %v1745_v19 = vpack.c.bf16 %v1744_v24, %v1743_v23 }
 0x587   : > { %6077 = vmatmul.msk.bf16.vlgmr.msra.gmra.mxu0 %vm1217_vm0, %v1745_v19 }
 0x588   : > { %1916 = vmatpush.bf16.msrb.mxu1 %v7680_v49  ;;  %v7782_v49 = vld [vmem:[%s9338_s14 + $0x304] sm:$0xf] }
 0x58b   : > { %v1349_v25 = vpop.f32.mrf.mxu0 }
 0x58c   : > { %v8199_v32 = vpack.i.bf16 %v1349_v25, %v1347_v22  ;;  %1917 = vmatpush.bf16.msrb.mxu1 %v7679_v27  ;;  %v8224_v22 = vld [vmem:[%s770_s5] ss:$0 sm:$0xff]  ;;  %v6498_v27 = vld [vmem:[%s9338_s14 + $0x340] sm:$0xf0] }
 0x590   : > { %1918 = vmatpush.bf16.msrb.mxu1 %v7678_v35  ;;  %v6501_v35 = vor.u32 %v7782_v49, %v6498_v27  ;;  %v7727_v49 = vld [vmem:[%s9338_s14 + $0x144] sm:$0xf0] }
 0x594   : > { %2833 = vmatpush.bf16.msra.mxu1 %v6573_v17  ;;  %v6242_v17 = vld [vmem:[%s9338_s14 + $0x140] sm:$0xf0] }
 0x595   : > { %v6245_v27 = vor.u32 %v7718_v45, %v6242_v17  ;;  %v6456_v17 = vld [vmem:[%s9338_s14 + $0x298] sm:$0xf] }
 0x599   : > { %v8191_v58 = vpop.permute.xlu1 %8190 }
 0x59a   : > { %v8193_v2 = vunpack.i.h.bf16 %v8191_v58  ;;  %v8192_v4 = vunpack.i.l.bf16 %v8191_v58  ;;  %v6432_v58 = vld [vmem:[%s9338_s14 + $0x280] sm:$0xf] }
 0x5d1   : > { %v1485_v26 = vpop.f32.mrf.mxu0 }
 0x5d3   : > { %v1554_v51 = vpop.f32.mrf.mxu2 }
 0x5d9   : > { %v1487_v28 = vpop.f32.mrf.mxu0 }
 0x5da   : > { %v8204_v29 = vpack.i.bf16 %v1487_v28, %v1485_v26 }
 0x5db   : > { %v1556_v30 = vpop.f32.mrf.mxu2 }
 0x5dc   : > { %v8194_v60 = vpack.i.bf16 %v1556_v30, %v1554_v51  ;;  %8205 = vrot.lane.b32.xlu0 %v8204_v29, %s8911_s1 }
 0x5de   : > { %8195 = vrot.lane.b32.xlu2 %v8194_v60, %s8909_s16  ;;  %v8913_v60 = vmov 128.0  }
 0x5df   : > { %8294 = vrcp.f32 %v8913_v60 }
 0x5e1   : > { %v1623_v31 = vpop.f32.mrf.mxu0 }
 0x5e6   : > { %8200 = vrot.lane.b32.xlu2 %v8199_v32, %s8910_s22 }
 0x5e9   : > { %v1625_v33 = vpop.f32.mrf.mxu0 }
 0x5ea   : > { %v8209_v54 = vpack.i.bf16 %v1625_v33, %v1623_v31  ;;  %v9704_v31 = vpop.eup %8294  ;;  %v6560_v33 = vld [vmem:[%s9338_s14 + $0x380] sm:$0xf] }
 0x5eb   : > { %vm1938_vm9 = vweird.f32 %v9704_v31 }
 0x5ee   : > { %8210 = vrot.lane.b32.xlu2 %v8209_v54, %s8908_s18  ;;  %v7806_v54 = vld [vmem:[%s9338_s14 + $0x3bc] sm:$0xf0] }
 0x5ef   : > { %v1692_v48 = vpop.f32.mrf.mxu2 }
 0x5f7   : > { %v1694_v36 = vpop.f32.mrf.mxu2 }
 0x5f8   : > { %v8214_v37 = vpack.i.bf16 %v1694_v36, %v1692_v48  ;;  %v7798_v48 = vld [vmem:[%s9338_s14 + $0x384] sm:$0xf] }
 0x5f9   : > { %v6562_v36 = vld [vmem:[%s9338_s14 + $0x3c0] sm:$0xf0] }
 0x5fa   : > { %8215 = vrot.lane.b32.xlu2 %v8214_v37, %s8907_s24  ;;  %v6568_v37 = vld [vmem:[%s9338_s14 + $0x388] sm:$0xf] }
 0x604   : > { %v1761_v38 = vpop.f32.mrf.mxu0 }
 0x60c   : > { %v1763_v42 = vpop.f32.mrf.mxu0 }
 0x60d   : > { %v8219_v44 = vpack.i.bf16 %v1763_v42, %v1761_v38  ;;  %v7807_v38 = vld [vmem:[%s9338_s14 + $0x3c4] sm:$0xf0]  ;;  %v6565_v42 = vor.u32 %v7798_v48, %v6562_v36 }
 0x60f   : > { %8220 = vrot.lane.b32.xlu0 %v8219_v44, %s8906_s15  ;;  %v6569_v44 = vor.u32 %v7807_v38, %v6568_v37  ;;  %2805 = vmatpush.bf16.msra.mxu3 %v6565_v42 }
 0x611   : > { %2819 = vmatpush.bf16.msrb.mxu0 %v6569_v44  ;;  %v6240_v44 = vld [vmem:[%s9338_s14 + $0x100] sm:$0xf] }
 0x613   : > { %2806 = vmatpush.bf16.msra.mxu3 %v6501_v35  ;;  %v6250_v35 = vld [vmem:[%s9338_s14 + $0x148] sm:$0xf0] }
 0x638   : > { %v8196_v50 = vpop.permute.xlu2 %8195 }
 0x639   : > { %v8198_v8 = vunpack.i.h.bf16 %v8196_v50  ;;  %v8197_v9 = vunpack.i.l.bf16 %v8196_v50  ;;  %v6497_v50 = vor.u32 %v7790_v47, %v6496_v46  ;;  %v6241_v46 = vor.u32 %v7726_v39, %v6240_v44  ;;  %v6248_v47 = vld [vmem:[%s9338_s14 + $0x108] sm:$0xf]  ;;  %v7776_v44 = vld [vmem:[%s9338_s14 + $0x2cc] sm:$0xf0]  ;;  %v7768_v39 = vld [vmem:[%s9338_s14 + $0x294] sm:$0xf] }
 0x640   : > { %v8201_v53 = vpop.permute.xlu2 %8200 }
 0x641   : > { %v8203_v43 = vunpack.i.h.bf16 %v8201_v53  ;;  %v8202_v55 = vunpack.i.l.bf16 %v8201_v53  ;;  %v6504_v53 = vld [vmem:[%s9338_s14 + $0x308] sm:$0xf] }
 0x643   : > { %v1823_v59 = vsel %vm1217_vm0, %v9516_v41, %v8203_v43  ;;  %v1822_v61 = vsel %vm1217_vm0, %v9514_v40, %v8202_v55  ;;  %v7791_v43 = vld [vmem:[%s9338_s14 + $0x344] sm:$0xf0]  ;;  %v7783_v55 = vld [vmem:[%s9338_s14 + $0x30c] sm:$0xf] }
 0x644   : > { %v1825_v0 = vsel %vm1824_vm3, %v1822_v61, %v8192_v4  ;;  %v1826_v5 = vsel %vm1824_vm3, %v1823_v59, %v8193_v2  ;;  %v7774_v59 = vld [vmem:[%s9338_s14 + $0x2bc] sm:$0xf0]  ;;  %v6440_v2 = vld [vmem:[%s9338_s14 + $0x288] sm:$0xf] }
 0x648   : > { %v8211_v56 = vpop.permute.xlu2 %8210 }
 0x649   : > { %v8213_v40 = vunpack.i.h.bf16 %v8211_v56  ;;  %v8212_v14 = vunpack.i.l.bf16 %v8211_v56  ;;  %v6505_v56 = vor.u32 %v7791_v43, %v6504_v53  ;;  %v6176_v43 = vld [vmem:[%s9338_s14 + $0x80] sm:$0xf] }
 0x64b   : > { %2820 = vmatpush.bf16.msrb.mxu0 %v6505_v56  ;;  %v7702_v56 = vld [vmem:[%s9338_s14 + $0x84] sm:$0xf] }
 0x64e   : > { %v8206_v57 = vpop.permute.xlu0 %8205 }
 0x64f   : > { %v8208_v63 = vunpack.i.h.bf16 %v8206_v57  ;;  %v8207_v34 = vunpack.i.l.bf16 %v8206_v57  ;;  %v6506_v57 = vld [vmem:[%s9338_s14 + $0x348] sm:$0xf0] }
 0x650   : > { %v6509_v61 = vor.u32 %v7783_v55, %v6506_v57  ;;  %v7710_v55 = vld [vmem:[%s9338_s14 + $0xbc] sm:$0xf0] }
 0x651   : > { %v1829_v52 = vsel %vm1827_vm4, %v1826_v5, %v8208_v63  ;;  %v1828_v7 = vsel %vm1827_vm4, %v1825_v0, %v8207_v34  ;;  %v7766_v63 = vld [vmem:[%s9338_s14 + $0x284] sm:$0xf]  ;;  %v6433_v0 = vor.u32 %v7774_v59, %v6432_v58  ;;  %v7775_v5 = vld [vmem:[%s9338_s14 + $0x2c4] sm:$0xf0]  ;;  %v6177_v57 = vor.u32 %v7710_v55, %v6176_v43  ;;  %v7760_v43 = vld [vmem:[%s9338_s14 + $0x24c] sm:$0xf0] }
 0x652   : > { %v1832_v10 = vsel %vm1830_vm5, %v1829_v52, %v8198_v8  ;;  %v1831_v11 = vsel %vm1830_vm5, %v1828_v7, %v8197_v9  ;;  %v6434_v34 = vld [vmem:[%s9338_s14 + $0x2c0] sm:$0xf0]  ;;  %v7767_v52 = vld [vmem:[%s9338_s14 + $0x28c] sm:$0xf]  ;;  %v6441_v8 = vor.u32 %v7775_v5, %v6440_v2  ;;  %v6368_v9 = vld [vmem:[%s9338_s14 + $0x200] sm:$0xf]  ;;  %2834 = vmatpush.bf16.msra.mxu1 %v6509_v61 }
 0x653   : > { %v1834_v16 = vsel %vm1833_vm6, %v1831_v11, %v8212_v14  ;;  %v1835_v13 = vsel %vm1833_vm6, %v1832_v10, %v8213_v40  ;;  %v6442_v7 = vld [vmem:[%s9338_s14 + $0x2c8] sm:$0xf0]  ;;  %v7758_v10 = vld [vmem:[%s9338_s14 + $0x23c] sm:$0xf0]  ;;  %v7750_v11 = vld [vmem:[%s9338_s14 + $0x204] sm:$0xf] }
 0x654   : > { %v8216_v6 = vpop.permute.xlu2 %8215  ;;  %v6376_v40 = vld [vmem:[%s9338_s14 + $0x208] sm:$0xf]  ;;  %2821 = vmatpush.bf16.msrb.mxu0 %v6441_v8  ;;  %v6178_v58 = vld [vmem:[%s9338_s14 + $0xc0] sm:$0xf0]  ;;  %v7703_v2 = vld [vmem:[%s9338_s14 + $0x8c] sm:$0xf] }
 0x655   : > { %v8218_v41 = vunpack.i.h.bf16 %v8216_v6  ;;  %v8217_v12 = vunpack.i.l.bf16 %v8216_v6  ;;  %v6437_v6 = vor.u32 %v7766_v63, %v6434_v34  ;;  %v7759_v14 = vld [vmem:[%s9338_s14 + $0x244] sm:$0xf0]  ;;  %v6181_v63 = vor.u32 %v7702_v56, %v6178_v58  ;;  %v6112_v5 = vld [vmem:[%s9338_s14] sm:$0xf]  ;;  %v6114_v8 = vld [vmem:[%s9338_s14 + $0x40] sm:$0xf0] }
 0x656   : > { %v6184_v59 = vld [vmem:[%s9338_s14 + $0x88] sm:$0xf]  ;;  %v7752_v55 = vld [vmem:[%s9338_s14 + $0x214] sm:$0xf]  ;;  %v6392_v58 = vld [vmem:[%s9338_s14 + $0x218] sm:$0xf] }
 0x657   : > { %v1837_v20 = vsel %vm1836_vm7, %v1834_v16, %v8217_v12  ;;  %v1838_v21 = vsel %vm1836_vm7, %v1835_v13, %v8218_v41  ;;  %v6445_v41 = vor.u32 %v7767_v52, %v6442_v7  ;;  %v6370_v12 = vld [vmem:[%s9338_s14 + $0x240] sm:$0xf0]  ;;  %v6378_v16 = vld [vmem:[%s9338_s14 + $0x248] sm:$0xf0]  ;;  %2807 = vmatpush.bf16.msra.mxu3 %v6437_v6  ;;  %v7711_v61 = vld [vmem:[%s9338_s14 + $0xc4] sm:$0xf0] }
 0x658   : > { %v6185_v34 = vor.u32 %v7711_v61, %v6184_v59  ;;  %v7694_v52 = vld [vmem:[%s9338_s14 + $0x3c] sm:$0xf0]  ;;  %v7686_v7 = vld [vmem:[%s9338_s14 + $0x4] sm:$0xf]  ;;  %v7761_v59 = vld [vmem:[%s9338_s14 + $0x254] sm:$0xf0] }
 0x659   : > { %2835 = vmatpush.bf16.msra.mxu1 %v6445_v41  ;;  %v6113_v6 = vor.u32 %v7694_v52, %v6112_v5  ;;  %v7744_v5 = vld [vmem:[%s9338_s14 + $0x1cc] sm:$0xf0]  ;;  %v7736_v52 = vld [vmem:[%s9338_s14 + $0x194] sm:$0xf] }
 0x681   : > { %v8221_v15 = vpop.permute.xlu0 %8220 }
 0x682   : > { %v8223_v18 = vunpack.i.h.bf16 %v8221_v15  ;;  %v8222_v3 = vunpack.i.l.bf16 %v8221_v15  ;;  %v7751_v15 = vld [vmem:[%s9338_s14 + $0x20c] sm:$0xf] }
 0x684   : > { %v1840_v23 = vsel %vm1839_vm8, %v1837_v20, %v8222_v3  ;;  %v1841_v24 = vsel %vm1839_vm8, %v1838_v21, %v8223_v18  ;;  %v6369_v18 = vor.u32 %v7758_v10, %v6368_v9  ;;  %v6373_v3 = vor.u32 %v7750_v11, %v6370_v12  ;;  %v6304_v21 = vld [vmem:[%s9338_s14 + $0x180] sm:$0xf]  ;;  %v6120_v9 = vld [vmem:[%s9338_s14 + $0x8] sm:$0xf]  ;;  %v7687_v12 = vld [vmem:[%s9338_s14 + $0xc] sm:$0xf] }
 0x685   : > { %v1842_v19 = vpack.c.bf16 %v1841_v24, %v1840_v23  ;;  %v6377_v20 = vor.u32 %v7759_v14, %v6376_v40  ;;  %v7742_v23 = vld [vmem:[%s9338_s14 + $0x1bc] sm:$0xf0]  ;;  %v7734_v24 = vld [vmem:[%s9338_s14 + $0x184] sm:$0xf]  ;;  %v7695_v10 = vld [vmem:[%s9338_s14 + $0x44] sm:$0xf0]  ;;  %v6117_v11 = vor.u32 %v7686_v7, %v6114_v8 }
 0x686   : > { %2808 = vmatpush.bf16.msra.mxu3 %v6373_v3  ;;  %v6121_v41 = vor.u32 %v7695_v10, %v6120_v9  ;;  %v6122_v40 = vld [vmem:[%s9338_s14 + $0x48] sm:$0xf0]  ;;  %v6576_v14 = vld [vmem:[%s9338_s14 + $0x390] sm:$0xf]  ;;  %v6328_v8 = vld [vmem:[%s9338_s14 + $0x198] sm:$0xf] }
 0x687   : > { %1919 = vmatmul.bf16.vlgmr.msrb.gmra.mxu1 %v1842_v19  ;;  %v6381_v19 = vor.u32 %v7751_v15, %v6378_v16  ;;  %2822 = vmatpush.bf16.msrb.mxu0 %v6377_v20  ;;  %v6125_v15 = vor.u32 %v7687_v12, %v6122_v40  ;;  %v7808_v16 = vld [vmem:[%s9338_s14 + $0x3cc] sm:$0xf0]  ;;  %v7745_v9 = vld [vmem:[%s9338_s14 + $0x1d4] sm:$0xf0]  ;;  %v6330_v12 = vld [vmem:[%s9338_s14 + $0x1d8] sm:$0xf0] }
 0x688   : > { %v6577_v3 = vor.u32 %v7808_v16, %v6576_v14  ;;  %v6256_v14 = vld [vmem:[%s9338_s14 + $0x110] sm:$0xf]  ;;  %v7720_v16 = vld [vmem:[%s9338_s14 + $0x114] sm:$0xf] }
 0x689   : > { %2836 = vmatpush.bf16.msra.mxu1 %v6381_v19 }
 0x704   : > { %v1920_v25 = vpop.f32.mrf.mxu1 }
 0x705   : > { %v1921_v26 = vadd.f32 %v8224_v22, %v1920_v25  ;;  %v6312_v25 = vld [vmem:[%s9338_s14 + $0x188] sm:$0xf] }
 0x707   : > { %v9697_v51 = vadd.f32 %v1921_v26, %v9410_v62  ;;  %v1934_v62 = vmul.f32 128.0, %v9704_v31  ;;  %v7743_v26 = vld [vmem:[%s9338_s14 + $0x1c4] sm:$0xf0] }
 0x709   : > { %1929 = vadd.xlane.f32.xlu1 %v9697_v51  ;;  %v1935_v32 = vsub.f32 1.0, %v1934_v62  ;;  %v6305_v62 = vor.u32 %v7742_v23, %v6304_v21  ;;  %v6584_v21 = vld [vmem:[%s9338_s14 + $0x398] sm:$0xf] }
 0x70a   : > { %v7809_v23 = vld [vmem:[%s9338_s14 + $0x3d4] sm:$0xf0] }
 0x70b   : > { %v1936_v4 = vmul.f32 %v9704_v31, %v1935_v32  ;;  %v6585_v19 = vor.u32 %v7809_v23, %v6584_v21 }
 0x70c   : > { %v1922_v28 = vpop.f32.mrf.mxu1 }
 0x70d   : > { %v1923_v29 = vadd.f32 %v8224_v22, %v1922_v28  ;;  %v1937_v13 = vadd.f32 %v9704_v31, %v1936_v4  ;;  %v6306_v22 = vld [vmem:[%s9338_s14 + $0x1c0] sm:$0xf0]  ;;  %v7735_v28 = vld [vmem:[%s9338_s14 + $0x18c] sm:$0xf] }
 0x70e   : > { %v6309_v32 = vor.u32 %v7734_v24, %v6306_v22  ;;  %v6186_v4 = vld [vmem:[%s9338_s14 + $0xc8] sm:$0xf0]  ;;  %v7801_v24 = vld [vmem:[%s9338_s14 + $0x39c] sm:$0xf] }
 0x70f   : > { %v9701_v30 = vadd.f32 %v1923_v29, %v9412_v1  ;;  %v6561_v1 = vor.u32 %v7806_v54, %v6560_v33  ;;  %v6314_v29 = vld [vmem:[%s9338_s14 + $0x1c8] sm:$0xf0]  ;;  %v9751_v60 = vsel %vm1938_vm9, %v9704_v31, %v1937_v13  ;;  %v6313_v33 = vor.u32 %v7743_v26, %v6312_v25  ;;  %v7800_v13 = vld [vmem:[%s9338_s14 + $0x394] sm:$0xf]  ;;  %v6586_v22 = vld [vmem:[%s9338_s14 + $0x3d8] sm:$0xf0] }
 0x710   : > { %v6317_v48 = vor.u32 %v7735_v28, %v6314_v29  ;;  %2809 = vmatpush.bf16.msra.mxu3 %v6309_v32  ;;  %v6512_v25 = vld [vmem:[%s9338_s14 + $0x310] sm:$0xf]  ;;  %v6589_v28 = vor.u32 %v7801_v24, %v6586_v22  ;;  %v6514_v32 = vld [vmem:[%s9338_s14 + $0x350] sm:$0xf0]  ;;  %v7721_v24 = vld [vmem:[%s9338_s14 + $0x11c] sm:$0xf] }
 0x711   : > { %1931 = vadd.xlane.f32.xlu2 %v9701_v30  ;;  %2791 = vmatpush.bf16.msrb.mxu2 %v6561_v1  ;;  %v7792_v26 = vld [vmem:[%s9338_s14 + $0x34c] sm:$0xf0] }
 0x712   : > { %2823 = vmatpush.bf16.msrb.mxu0 %v6313_v33  ;;  %2837 = vmatpush.bf16.msra.mxu1 %v6317_v48  ;;  %v6513_v29 = vor.u32 %v7792_v26, %v6512_v25  ;;  %v6520_v33 = vld [vmem:[%s9338_s14 + $0x318] sm:$0xf] }
 0x713   : > { %v7793_v48 = vld [vmem:[%s9338_s14 + $0x354] sm:$0xf0] }
 0x714   : > { %2810 = vmatpush.bf16.msra.mxu3 %v6245_v27 }
 0x715   : > { %2792 = vmatpush.bf16.msrb.mxu2 %v6497_v50  ;;  %v7719_v50 = vld [vmem:[%s9338_s14 + $0x10c] sm:$0xf] }
 0x716   : > { %v6253_v53 = vor.u32 %v7719_v50, %v6250_v35  ;;  %v6458_v50 = vld [vmem:[%s9338_s14 + $0x2d8] sm:$0xf0] }
 0x718   : > { %2838 = vmatpush.bf16.msra.mxu1 %v6253_v53  ;;  %2811 = vmatpush.bf16.msra.mxu3 %v6181_v63  ;;  %v6384_v53 = vld [vmem:[%s9338_s14 + $0x210] sm:$0xf]  ;;  %v6393_v63 = vor.u32 %v7761_v59, %v6392_v58 }
 0x719   : > { %2793 = vmatpush.bf16.msrb.mxu2 %v6433_v0  ;;  %v6189_v0 = vor.u32 %v7703_v2, %v6186_v4  ;;  %v6385_v56 = vor.u32 %v7760_v43, %v6384_v53  ;;  %v6394_v2 = vld [vmem:[%s9338_s14 + $0x258] sm:$0xf0] }
 0x71a   : > { %v6138_v53 = vld [vmem:[%s9338_s14 + $0x58] sm:$0xf0] }
 0x71c   : > { %2839 = vmatpush.bf16.msra.mxu1 %v6189_v0  ;;  %2812 = vmatpush.bf16.msra.mxu3 %v6117_v11  ;;  %v6320_v0 = vld [vmem:[%s9338_s14 + $0x190] sm:$0xf]  ;;  %v6329_v11 = vor.u32 %v7745_v9, %v6328_v8  ;;  %v8225_v8 = vld [vmem:[%s779_s3] ss:$0 sm:$0xff] }
 0x71d   : > { %2794 = vmatpush.bf16.msrb.mxu2 %v6369_v18  ;;  %v6578_v18 = vld [vmem:[%s9338_s14 + $0x3d0] sm:$0xf0]  ;;  %v6321_v7 = vor.u32 %v7744_v5, %v6320_v0 }
 0x71e   : > { %v6581_v20 = vor.u32 %v7800_v13, %v6578_v18  ;;  %v6258_v18 = vld [vmem:[%s9338_s14 + $0x150] sm:$0xf0] }
 0x71f   : > { %v6261_v21 = vor.u32 %v7720_v16, %v6258_v18  ;;  %v7810_v16 = vld [vmem:[%s9338_s14 + $0x3dc] sm:$0xf0]  ;;  %v6600_v18 = vld [vmem:[%s9338_s14 + $0x3a8] sm:$0xf] }
 0x720   : > { %2840 = vmatpush.bf16.msra.mxu1 %v6125_v15  ;;  %2861 = vmatpush.bf16.msrb.mxu3 %v6581_v20  ;;  %v7728_v15 = vld [vmem:[%s9338_s14 + $0x14c] sm:$0xf0]  ;;  %v7729_v20 = vld [vmem:[%s9338_s14 + $0x154] sm:$0xf0] }
 0x721   : > { %2795 = vmatpush.bf16.msrb.mxu2 %v6305_v62  ;;  %v7784_v62 = vld [vmem:[%s9338_s14 + $0x314] sm:$0xf]  ;;  %v6257_v13 = vor.u32 %v7728_v15, %v6256_v14  ;;  %v6592_v15 = vld [vmem:[%s9338_s14 + $0x3a0] sm:$0xf] }
 0x724   : > { %2889 = vmatpush.bf16.msrb.mxu1 %v6589_v28  ;;  %v6192_v28 = vld [vmem:[%s9338_s14 + $0x90] sm:$0xf] }
 0x725   : > { %2796 = vmatpush.bf16.msrb.mxu2 %v6241_v46  ;;  %v6450_v46 = vld [vmem:[%s9338_s14 + $0x2d0] sm:$0xf0] }
 0x729   : > { %2797 = vmatpush.bf16.msrb.mxu2 %v6177_v57  ;;  %v6386_v57 = vld [vmem:[%s9338_s14 + $0x250] sm:$0xf0] }
 0x72a   : > { %v6389_v61 = vor.u32 %v7752_v55, %v6386_v57 }
 0x72d   : > { %2798 = vmatpush.bf16.msrb.mxu2 %v6113_v6  ;;  %v6322_v6 = vld [vmem:[%s9338_s14 + $0x1d0] sm:$0xf0] }
 0x72e   : > { %v6325_v10 = vor.u32 %v7736_v52, %v6322_v6 }
 0x731   : > { %2847 = vmatpush.bf16.msra.mxu2 %v6577_v3  ;;  %v6264_v3 = vld [vmem:[%s9338_s14 + $0x118] sm:$0xf] }
 0x732   : > { %v6265_v23 = vor.u32 %v7729_v20, %v6264_v3 }
 0x735   : > { %2848 = vmatpush.bf16.msra.mxu2 %v6513_v29  ;;  %v7712_v29 = vld [vmem:[%s9338_s14 + $0xcc] sm:$0xf0] }
 0x77c   : > { %v1930_v54 = vpop.xlane.xlu1 %1929 }
 0x77d   : > { %v1940_v1 = vmul.f32 %v9751_v60, %v1930_v54  ;;  %v6517_v54 = vor.u32 %v7784_v62, %v6514_v32  ;;  %v7704_v62 = vld [vmem:[%s9338_s14 + $0x94] sm:$0xf]  ;;  %v6193_v32 = vor.u32 %v7712_v29, %v6192_v28 }
 0x77f   : > { %v9755_v36 = vsub.f32 %v9697_v51, %v1940_v1  ;;  %v7785_v1 = vld [vmem:[%s9338_s14 + $0x31c] sm:$0xf]  ;;  %2862 = vmatpush.bf16.msrb.mxu3 %v6517_v54  ;;  %v6200_v54 = vld [vmem:[%s9338_s14 + $0x98] sm:$0xf] }
 0x781   : > { %v1944_v31 = vmul.f32 %v9755_v36, %v9755_v36 }
 0x783   : > { %1946 = vadd.xlane.f32.xlu0 %v1944_v31  ;;  %v6522_v31 = vld [vmem:[%s9338_s14 + $0x358] sm:$0xf0] }
 0x784   : > { %v1932_v37 = vpop.xlane.xlu2 %1931 }
 0x785   : > { %v1941_v38 = vmul.f32 %v9751_v60, %v1932_v37  ;;  %v6521_v37 = vor.u32 %v7793_v48, %v6520_v33  ;;  %v6194_v33 = vld [vmem:[%s9338_s14 + $0xd0] sm:$0xf0]  ;;  %v7713_v48 = vld [vmem:[%s9338_s14 + $0xd4] sm:$0xf0] }
 0x787   : > { %v9761_v42 = vsub.f32 %v9701_v30, %v1941_v38  ;;  %v6249_v30 = vor.u32 %v7727_v49, %v6248_v47  ;;  %v6525_v38 = vor.u32 %v7785_v1, %v6522_v31  ;;  %v7777_v47 = vld [vmem:[%s9338_s14 + $0x2d4] sm:$0xf0]  ;;  %v6453_v49 = vor.u32 %v7768_v39, %v6450_v46  ;;  %v6128_v39 = vld [vmem:[%s9338_s14 + $0x10] sm:$0xf]  ;;  %v7688_v46 = vld [vmem:[%s9338_s14 + $0x14] sm:$0xf] }
 0x788   : > { %v6457_v27 = vor.u32 %v7777_v47, %v6456_v17  ;;  %v6197_v31 = vor.u32 %v7704_v62, %v6194_v33  ;;  %v6130_v47 = vld [vmem:[%s9338_s14 + $0x50] sm:$0xf0]  ;;  %v7786_v62 = vld [vmem:[%s9338_s14 + $0x324] sm:$0xf]  ;;  %v6536_v33 = vld [vmem:[%s9338_s14 + $0x328] sm:$0xf] }
 0x789   : > { %v1945_v51 = vmul.f32 %v9761_v42, %v9761_v42  ;;  %2824 = vmatpush.bf16.msrb.mxu0 %v6249_v30  ;;  %v7769_v30 = vld [vmem:[%s9338_s14 + $0x29c] sm:$0xf]  ;;  %2890 = vmatpush.bf16.msrb.mxu1 %v6525_v38 }
 0x78a   : > { %v6461_v35 = vor.u32 %v7769_v30, %v6458_v50  ;;  %2863 = vmatpush.bf16.msrb.mxu3 %v6453_v49  ;;  %v7705_v38 = vld [vmem:[%s9338_s14 + $0x9c] sm:$0xf]  ;;  %v6136_v49 = vld [vmem:[%s9338_s14 + $0x18] sm:$0xf]  ;;  %v6133_v30 = vor.u32 %v7688_v46, %v6130_v47  ;;  %v6466_v46 = vld [vmem:[%s9338_s14 + $0x2e0] sm:$0xf0] }
 0x78b   : > { %1948 = vadd.xlane.f32.xlu2 %v1945_v51  ;;  %v6448_v51 = vld [vmem:[%s9338_s14 + $0x290] sm:$0xf]  ;;  %v7779_v47 = vld [vmem:[%s9338_s14 + $0x2e4] sm:$0xf0] }
 0x78c   : > { %v6449_v45 = vor.u32 %v7776_v44, %v6448_v51  ;;  %v6202_v51 = vld [vmem:[%s9338_s14 + $0xd8] sm:$0xf0] }
 0x78d   : > { %2825 = vmatpush.bf16.msrb.mxu0 %v6185_v34  ;;  %v7753_v34 = vld [vmem:[%s9338_s14 + $0x21c] sm:$0xf]  ;;  %2891 = vmatpush.bf16.msrb.mxu1 %v6461_v35  ;;  %v6205_v44 = vor.u32 %v7705_v38, %v6202_v51  ;;  %v6464_v38 = vld [vmem:[%s9338_s14 + $0x2a0] sm:$0xf] }
 0x78e   : > { %2849 = vmatpush.bf16.msra.mxu2 %v6449_v45  ;;  %v6397_v4 = vor.u32 %v7753_v34, %v6394_v2  ;;  %2864 = vmatpush.bf16.msrb.mxu3 %v6389_v61  ;;  %v7696_v45 = vld [vmem:[%s9338_s14 + $0x4c] sm:$0xf0]  ;;  %v7689_v35 = vld [vmem:[%s9338_s14 + $0x1c] sm:$0xf]  ;;  %v7778_v51 = vld [vmem:[%s9338_s14 + $0x2dc] sm:$0xf0] }
 0x78f   : > { %v6129_v17 = vor.u32 %v7696_v45, %v6128_v39  ;;  %v6141_v55 = vor.u32 %v7689_v35, %v6138_v53  ;;  %v7770_v45 = vld [vmem:[%s9338_s14 + $0x2a4] sm:$0xf]  ;;  %v6400_v35 = vld [vmem:[%s9338_s14 + $0x220] sm:$0xf] }
 0x790   : > { %v7762_v53 = vld [vmem:[%s9338_s14 + $0x25c] sm:$0xf0] }
 0x791   : > { %2826 = vmatpush.bf16.msrb.mxu0 %v6121_v41  ;;  %v7737_v41 = vld [vmem:[%s9338_s14 + $0x19c] sm:$0xf]  ;;  %2892 = vmatpush.bf16.msrb.mxu1 %v6397_v4 }
 0x792   : > { %2850 = vmatpush.bf16.msra.mxu2 %v6385_v56  ;;  %v6333_v40 = vor.u32 %v7737_v41, %v6330_v12  ;;  %2865 = vmatpush.bf16.msrb.mxu3 %v6325_v10  ;;  %v8226_v41 = vld [vmem:[%s788_s26] ss:$0 sm:$0xff] }
 0x795   : > { %2875 = vmatpush.bf16.msra.mxu0 %v6585_v19  ;;  %v6266_v19 = vld [vmem:[%s9338_s14 + $0x158] sm:$0xf0]  ;;  %2893 = vmatpush.bf16.msrb.mxu1 %v6333_v40 }
 0x796   : > { %2851 = vmatpush.bf16.msra.mxu2 %v6321_v7  ;;  %v6269_v25 = vor.u32 %v7721_v24, %v6266_v19  ;;  %2866 = vmatpush.bf16.msrb.mxu3 %v6261_v21  ;;  %v7811_v21 = vld [vmem:[%s9338_s14 + $0x3e4] sm:$0xf0]  ;;  %v6593_v19 = vor.u32 %v7810_v16, %v6592_v15 }
 0x797   : > { %v6601_v28 = vor.u32 %v7811_v21, %v6600_v18  ;;  %v6280_v18 = vld [vmem:[%s9338_s14 + $0x128] sm:$0xf] }
 0x798   : > { %v7731_v21 = vld [vmem:[%s9338_s14 + $0x164] sm:$0xf0] }
 0x799   : > { %2876 = vmatpush.bf16.msra.mxu0 %v6521_v37  ;;  %v6201_v37 = vor.u32 %v7713_v48, %v6200_v54  ;;  %2894 = vmatpush.bf16.msrb.mxu1 %v6269_v25  ;;  %v6528_v25 = vld [vmem:[%s9338_s14 + $0x320] sm:$0xf]  ;;  %v7795_v54 = vld [vmem:[%s9338_s14 + $0x364] sm:$0xf0]  ;;  %v7787_v48 = vld [vmem:[%s9338_s14 + $0x32c] sm:$0xf] }
 0x79a   : > { %2852 = vmatpush.bf16.msra.mxu2 %v6257_v13  ;;  %2867 = vmatpush.bf16.msrb.mxu3 %v6197_v31  ;;  %v7802_v13 = vld [vmem:[%s9338_s14 + $0x3a4] sm:$0xf] }
 0x79d   : > { %2877 = vmatpush.bf16.msra.mxu0 %v6457_v27  ;;  %v7697_v27 = vld [vmem:[%s9338_s14 + $0x54] sm:$0xf0]  ;;  %2895 = vmatpush.bf16.msrb.mxu1 %v6205_v44  ;;  %v6537_v44 = vor.u32 %v7795_v54, %v6536_v33  ;;  %v6216_v33 = vld [vmem:[%s9338_s14 + $0xa8] sm:$0xf] }
 0x79e   : > { %2853 = vmatpush.bf16.msra.mxu2 %v6193_v32  ;;  %v6137_v50 = vor.u32 %v7697_v27, %v6136_v49  ;;  %2868 = vmatpush.bf16.msrb.mxu3 %v6133_v30  ;;  %v6530_v32 = vld [vmem:[%s9338_s14 + $0x360] sm:$0xf0]  ;;  %v7771_v49 = vld [vmem:[%s9338_s14 + $0x2ac] sm:$0xf]  ;;  %v6465_v30 = vor.u32 %v7778_v51, %v6464_v38  ;;  %v7715_v54 = vld [vmem:[%s9338_s14 + $0xe4] sm:$0xf0] }
 0x79f   : > { %v6474_v27 = vld [vmem:[%s9338_s14 + $0x2e8] sm:$0xf0]  ;;  %v7698_v51 = vld [vmem:[%s9338_s14 + $0x5c] sm:$0xf0] }
 0x7a1   : > { %2878 = vmatpush.bf16.msra.mxu0 %v6393_v63  ;;  %2896 = vmatpush.bf16.msrb.mxu1 %v6141_v55  ;;  %v6477_v55 = vor.u32 %v7771_v49, %v6474_v27  ;;  %v7691_v49 = vld [vmem:[%s9338_s14 + $0x2c] sm:$0xf] }
 0x7a2   : > { %2854 = vmatpush.bf16.msra.mxu2 %v6129_v17  ;;  %v6472_v17 = vld [vmem:[%s9338_s14 + $0x2a8] sm:$0xf]  ;;  %v6154_v27 = vld [vmem:[%s9338_s14 + $0x68] sm:$0xf0] }
 0x7a5   : > { %2879 = vmatpush.bf16.msra.mxu0 %v6329_v11 }
 0x7a9   : > { %2880 = vmatpush.bf16.msra.mxu0 %v6265_v23  ;;  %v7803_v23 = vld [vmem:[%s9338_s14 + $0x3ac] sm:$0xf] }
 0x7ad   : > { %2881 = vmatpush.bf16.msra.mxu0 %v6201_v37  ;;  %v6533_v37 = vor.u32 %v7786_v62, %v6530_v32  ;;  %v7706_v62 = vld [vmem:[%s9338_s14 + $0xa4] sm:$0xf] }
 0x7ae   : > { %v6210_v32 = vld [vmem:[%s9338_s14 + $0xe0] sm:$0xf0] }
 0x7af   : > { %v6213_v38 = vor.u32 %v7706_v62, %v6210_v32  ;;  %v7756_v62 = vld [vmem:[%s9338_s14 + $0x234] sm:$0xf] }
 0x7b0   : > { %v6418_v32 = vld [vmem:[%s9338_s14 + $0x270] sm:$0xf0] }
 0x7b1   : > { %2882 = vmatpush.bf16.msra.mxu0 %v6137_v50  ;;  %v6469_v50 = vor.u32 %v7770_v45, %v6466_v46  ;;  %v6217_v45 = vor.u32 %v7715_v54, %v6216_v33  ;;  %v6424_v33 = vld [vmem:[%s9338_s14 + $0x238] sm:$0xf] }
 0x7b2   : > { %v7765_v54 = vld [vmem:[%s9338_s14 + $0x274] sm:$0xf0] }
 0x7f6   : > { %v1947_v22 = vpop.xlane.xlu0 %1946 }
 0x7f7   : > { %v1950_v26 = vmul.f32 %v1947_v22, %v9751_v60 }
 0x7f9   : > { %v1952_v1 = vadd.f32 1e-05, %v1950_v26  ;;  %v7794_v26 = vld [vmem:[%s9338_s14 + $0x35c] sm:$0xf0] }
 0x7fa   : > { %v6529_v31 = vor.u32 %v7794_v26, %v6528_v25  ;;  %v6208_v25 = vld [vmem:[%s9338_s14 + $0xa0] sm:$0xf] }
 0x7fb   : > { %8296 = vrsqrt.f32 %v1952_v1  ;;  %vm1960_vm11 = vweird.f32 %v1952_v1  ;;  %v7714_v26 = vld [vmem:[%s9338_s14 + $0xdc] sm:$0xf0] }
 0x7fe   : > { %v1949_v43 = vpop.xlane.xlu2 %1948 }
 0x7ff   : > { %v1951_v56 = vmul.f32 %v1949_v43, %v9751_v60  ;;  %v6473_v43 = vor.u32 %v7779_v47, %v6472_v17  ;;  %v6152_v17 = vld [vmem:[%s9338_s14 + $0x28] sm:$0xf] }
 0x800   : > { %v7699_v47 = vld [vmem:[%s9338_s14 + $0x64] sm:$0xf0] }
 0x801   : > { %v8297_v57 = vpop.eup %8296  ;;  %v1953_v58 = vadd.f32 1e-05, %v1951_v56  ;;  %v7754_v56 = vld [vmem:[%s9338_s14 + $0x224] sm:$0xf] }
 0x802   : > { %v1955_v59 = vmul.f32 %v8297_v57, %v1952_v1  ;;  %vm1961_vm10 = vweird.f32 %v8297_v57  ;;  %v6538_v1 = vld [vmem:[%s9338_s14 + $0x368] sm:$0xf0] }
 0x803   : > { %8298 = vrsqrt.f32 %v1953_v58  ;;  %vm1962_vm12 = vmor %vm1960_vm11, %vm1961_vm10  ;;  %vm1970_vm14 = vweird.f32 %v1953_v58  ;;  %v6541_v39 = vor.u32 %v7787_v48, %v6538_v1  ;;  %v7707_v48 = vld [vmem:[%s9338_s14 + $0xac] sm:$0xf] }
 0x804   : > { %v1956_v61 = vmul.f32 %v8297_v57, %v1955_v59  ;;  %v7763_v59 = vld [vmem:[%s9338_s14 + $0x264] sm:$0xf0]  ;;  %v6218_v1 = vld [vmem:[%s9338_s14 + $0xe8] sm:$0xf0] }
 0x805   : > { %v6221_v46 = vor.u32 %v7707_v48, %v6218_v1  ;;  %v7757_v48 = vld [vmem:[%s9338_s14 + $0x23c] sm:$0xf] }
 0x806   : > { %v1957_v63 = vmul.f32 0.5, %v1956_v61  ;;  %v7755_v61 = vld [vmem:[%s9338_s14 + $0x22c] sm:$0xf]  ;;  %v6426_v1 = vld [vmem:[%s9338_s14 + $0x278] sm:$0xf0] }
 0x808   : > { %v1958_v34 = vsub.f32 1.5, %v1957_v63  ;;  %v6410_v63 = vld [vmem:[%s9338_s14 + $0x268] sm:$0xf0] }
 0x809   : > { %v8299_v2 = vpop.eup %8298 }
 0x80a   : > { %v1959_v4 = vmul.f32 %v8297_v57, %v1958_v34  ;;  %v1965_v0 = vmul.f32 %v8299_v2, %v1953_v58  ;;  %vm1971_vm13 = vweird.f32 %v8299_v2  ;;  %v6408_v58 = vld [vmem:[%s9338_s14 + $0x228] sm:$0xf]  ;;  %v6401_v34 = vor.u32 %v7762_v53, %v6400_v35  ;;  %v7804_v35 = vld [vmem:[%s9338_s14 + $0x3b4] sm:$0xf] }
 0x80b   : > { %vm1972_vm15 = vmor %vm1970_vm14, %vm1971_vm13  ;;  %v6610_v53 = vld [vmem:[%s9338_s14 + $0x3f0] sm:$0xf0] }
 0x80c   : > { %v1966_v5 = vmul.f32 %v8299_v2, %v1965_v0  ;;  %v1963_v52 = vsel %vm1962_vm12, %v8297_v57, %v1959_v4  ;;  %v6402_v57 = vld [vmem:[%s9338_s14 + $0x260] sm:$0xf0]  ;;  %v6336_v4 = vld [vmem:[%s9338_s14 + $0x1a0] sm:$0xf] }
 0x80d   : > { %v1974_v9 = vmul.f32 %v1963_v52, %v9755_v36  ;;  %v6594_v36 = vld [vmem:[%s9338_s14 + $0x3e0] sm:$0xf0]  ;;  %v7746_v0 = vld [vmem:[%s9338_s14 + $0x1dc] sm:$0xf0]  ;;  %v6413_v52 = vor.u32 %v7755_v61, %v6410_v63  ;;  %v6153_v61 = vor.u32 %v7699_v47, %v6152_v17  ;;  %v6157_v63 = vor.u32 %v7691_v49, %v6154_v27  ;;  %v6360_v17 = vld [vmem:[%s9338_s14 + $0x1b8] sm:$0xf] }
 0x80e   : > { %v1967_v7 = vmul.f32 0.5, %v1966_v5  ;;  %v6597_v22 = vor.u32 %v7802_v13, %v6594_v36  ;;  %v6409_v5 = vor.u32 %v7763_v59, %v6408_v58  ;;  %v7722_v13 = vld [vmem:[%s9338_s14 + $0x124] sm:$0xf]  ;;  %v7805_v58 = vld [vmem:[%s9338_s14 + $0x3bc] sm:$0xf] }
 0x80f   : > { %v1979_v12 = vmul.f32 %v8225_v8, %v1974_v9  ;;  %v7747_v9 = vld [vmem:[%s9338_s14 + $0x1e4] sm:$0xf0]  ;;  %v6274_v36 = vld [vmem:[%s9338_s14 + $0x160] sm:$0xf0]  ;;  %v6618_v59 = vld [vmem:[%s9338_s14 + $0x3f8] sm:$0xf0] }
 0x810   : > { %v1968_v6 = vsub.f32 1.5, %v1967_v7  ;;  %v7738_v7 = vld [vmem:[%s9338_s14 + $0x1a4] sm:$0xf]  ;;  %v7749_v47 = vld [vmem:[%s9338_s14 + $0x1f4] sm:$0xf0] }
 0x811   : > { %v9866_v3 = vadd.f32 %v8226_v41, %v1979_v12  ;;  %v7741_v49 = vld [vmem:[%s9338_s14 + $0x1bc] sm:$0xf] }
 0x812   : > { %v1969_v10 = vmul.f32 %v8299_v2, %v1968_v6  ;;  %v6338_v6 = vld [vmem:[%s9338_s14 + $0x1e0] sm:$0xf0]  ;;  %v6362_v27 = vld [vmem:[%s9338_s14 + $0x1f8] sm:$0xf0] }
 0x813   : > { %v6341_v12 = vor.u32 %v7738_v7, %v6338_v6  ;;  %v7788_v7 = vld [vmem:[%s9338_s14 + $0x334] sm:$0xf] }
 0x814   : > { %v1973_v11 = vsel %vm1972_vm15, %v8299_v2, %v1969_v10  ;;  %v6405_v2 = vor.u32 %v7754_v56, %v6402_v57  ;;  %v7739_v10 = vld [vmem:[%s9338_s14 + $0x1ac] sm:$0xf]  ;;  %v7813_v57 = vld [vmem:[%s9338_s14 + $0x3f4] sm:$0xf0]  ;;  %v6546_v6 = vld [vmem:[%s9338_s14 + $0x370] sm:$0xf0] }
 0x815   : > { %v1975_v40 = vmul.f32 %v1973_v11, %v9761_v42  ;;  %v6602_v42 = vld [vmem:[%s9338_s14 + $0x3e8] sm:$0xf0] }
 0x816   : > { %v6605_v29 = vor.u32 %v7803_v23, %v6602_v42  ;;  %v6346_v11 = vld [vmem:[%s9338_s14 + $0x1e8] sm:$0xf0] }
 0x817   : > { %v1980_v14 = vmul.f32 %v8225_v8, %v1975_v40  ;;  %v6344_v8 = vld [vmem:[%s9338_s14 + $0x1a8] sm:$0xf]  ;;  %v6272_v40 = vld [vmem:[%s9338_s14 + $0x120] sm:$0xf]  ;;  %v6349_v16 = vor.u32 %v7739_v10, %v6346_v11  ;;  %v7723_v23 = vld [vmem:[%s9338_s14 + $0x12c] sm:$0xf] }
 0x818   : > { %v6345_v15 = vor.u32 %v7747_v9, %v6344_v8  ;;  %v6282_v42 = vld [vmem:[%s9338_s14 + $0x168] sm:$0xf0]  ;;  %v6552_v8 = vld [vmem:[%s9338_s14 + $0x338] sm:$0xf]  ;;  %v7789_v10 = vld [vmem:[%s9338_s14 + $0x33c] sm:$0xf] }
 0x819   : > { %v9868_v20 = vadd.f32 %v8226_v41, %v1980_v14  ;;  %v6337_v41 = vor.u32 %v7746_v0, %v6336_v4  ;;  %v7730_v14 = vld [vmem:[%s9338_s14 + $0x15c] sm:$0xf0]  ;;  %v6544_v4 = vld [vmem:[%s9338_s14 + $0x330] sm:$0xf]  ;;  %v7797_v9 = vld [vmem:[%s9338_s14 + $0x374] sm:$0xf0] }
 0x81a   : > { %v7796_v0 = vld [vmem:[%s9338_s14 + $0x36c] sm:$0xf0]  ;;  %v6554_v11 = vld [vmem:[%s9338_s14 + $0x378] sm:$0xf0] }
 0x81b   : > { %v9875_v24 = vpack.c.bf16 %v9868_v20, %v9866_v3 }
 0x81d   : > { %2799 = vmatmul.bf16.vlgmr.msrb.gmra.mxu2 %v9875_v24  ;;  %2813 = vmatmul.bf16.vlgmr.msra.gmra.mxu3 %v9875_v24 }
 0x81e   : > { %2827 = vmatmul.bf16.vlgmr.msrb.gmra.mxu0 %v9875_v24  ;;  %2841 = vmatmul.bf16.vlgmr.msra.gmra.mxu1 %v9875_v24 }
 0x81f   : > { %2903 = vmatpush.bf16.msrb.mxu2 %v6593_v19  ;;  %2917 = vmatpush.bf16.msra.mxu3 %v6597_v22  ;;  %v6273_v19 = vor.u32 %v7730_v14, %v6272_v40  ;;  %v6277_v22 = vor.u32 %v7722_v13, %v6274_v36  ;;  %v6480_v40 = vld [vmem:[%s9338_s14 + $0x2b0] sm:$0xf]  ;;  %v7772_v13 = vld [vmem:[%s9338_s14 + $0x2b4] sm:$0xf] }
 0x820   : > { %2931 = vmatpush.bf16.msrb.mxu0 %v6601_v28  ;;  %2945 = vmatpush.bf16.msra.mxu1 %v6605_v29  ;;  %v6281_v28 = vor.u32 %v7731_v21, %v6280_v18  ;;  %v6285_v29 = vor.u32 %v7723_v23, %v6282_v42  ;;  %v7780_v14 = vld [vmem:[%s9338_s14 + $0x2ec] sm:$0xf0]  ;;  %v6482_v36 = vld [vmem:[%s9338_s14 + $0x2f0] sm:$0xf0]  ;;  %v6488_v18 = vld [vmem:[%s9338_s14 + $0x2b8] sm:$0xf] }
 0x821   : > { %v7781_v21 = vld [vmem:[%s9338_s14 + $0x2f4] sm:$0xf0]  ;;  %v7773_v23 = vld [vmem:[%s9338_s14 + $0x2bc] sm:$0xf] }
 0x822   : > { %v6490_v42 = vld [vmem:[%s9338_s14 + $0x2f8] sm:$0xf0] }
 0x823   : > { %2904 = vmatpush.bf16.msrb.mxu2 %v6529_v31  ;;  %2918 = vmatpush.bf16.msra.mxu3 %v6533_v37  ;;  %v6144_v31 = vld [vmem:[%s9338_s14 + $0x20] sm:$0xf]  ;;  %v6209_v37 = vor.u32 %v7714_v26, %v6208_v25  ;;  %v6416_v25 = vld [vmem:[%s9338_s14 + $0x230] sm:$0xf] }
 0x824   : > { %2932 = vmatpush.bf16.msrb.mxu0 %v6537_v44  ;;  %2946 = vmatpush.bf16.msra.mxu1 %v6541_v39  ;;  %v7690_v44 = vld [vmem:[%s9338_s14 + $0x24] sm:$0xf]  ;;  %v7764_v26 = vld [vmem:[%s9338_s14 + $0x26c] sm:$0xf0] }
 0x825   : > { %v6146_v39 = vld [vmem:[%s9338_s14 + $0x60] sm:$0xf0] }
 0x826   : > { %v6149_v56 = vor.u32 %v7690_v44, %v6146_v39  ;;  %v6425_v44 = vor.u32 %v7765_v54, %v6424_v33  ;;  %v6429_v39 = vor.u32 %v7757_v48, %v6426_v1  ;;  %v7836_v33 = vld [vmem:[%s9348_s13 + $0xb0] sm:$0xff] }
 0x827   : > { %2905 = vmatpush.bf16.msrb.mxu2 %v6465_v30  ;;  %2919 = vmatpush.bf16.msra.mxu3 %v6469_v50  ;;  %v6608_v30 = vld [vmem:[%s9338_s14 + $0x3b0] sm:$0xf] }
 0x828   : > { %2933 = vmatpush.bf16.msrb.mxu0 %v6473_v43  ;;  %2947 = vmatpush.bf16.msra.mxu1 %v6477_v55  ;;  %v7812_v50 = vld [vmem:[%s9338_s14 + $0x3ec] sm:$0xf0]  ;;  %v6616_v43 = vld [vmem:[%s9338_s14 + $0x3b8] sm:$0xf]  ;;  %v6145_v55 = vor.u32 %v7698_v51, %v6144_v31  ;;  %v6417_v31 = vor.u32 %v7764_v26, %v6416_v25 }
 0x829   : > { %v7748_v51 = vld [vmem:[%s9338_s14 + $0x1ec] sm:$0xf0] }
 0x82a   : > { %v7844_v54 = vld [vmem:[%s9348_s13 + $0xf0] sm:$0xff] }
 0x82b   : > { %2906 = vmatpush.bf16.msrb.mxu2 %v6401_v34  ;;  %2920 = vmatpush.bf16.msra.mxu3 %v6405_v2  ;;  %v6609_v34 = vor.u32 %v7812_v50, %v6608_v30  ;;  %v6613_v2 = vor.u32 %v7804_v35, %v6610_v53  ;;  %v6288_v35 = vld [vmem:[%s9338_s14 + $0x130] sm:$0xf] }
 0x82c   : > { %2934 = vmatpush.bf16.msrb.mxu0 %v6409_v5  ;;  %2948 = vmatpush.bf16.msra.mxu1 %v6413_v52  ;;  %v6617_v5 = vor.u32 %v7813_v57, %v6616_v43  ;;  %v6621_v52 = vor.u32 %v7805_v58, %v6618_v59  ;;  %v7732_v53 = vld [vmem:[%s9338_s14 + $0x16c] sm:$0xf0]  ;;  %v6361_v43 = vor.u32 %v7749_v47, %v6360_v17  ;;  %v6290_v57 = vld [vmem:[%s9338_s14 + $0x170] sm:$0xf0]  ;;  %v6296_v58 = vld [vmem:[%s9338_s14 + $0x138] sm:$0xf] }
 0x82d   : > { %2855 = vmatmul.bf16.vlgmr.msra.gmra.mxu2 %v9875_v24  ;;  %2869 = vmatmul.bf16.vlgmr.msrb.gmra.mxu3 %v9875_v24  ;;  %v7733_v59 = vld [vmem:[%s9338_s14 + $0x174] sm:$0xf0]  ;;  %v7820_v48 = vld [vmem:[%s9348_s13 + $0x30] sm:$0xff] }
 0x82e   : > { %2883 = vmatmul.bf16.vlgmr.msra.gmra.mxu0 %v9875_v24  ;;  %2897 = vmatmul.bf16.vlgmr.msrb.gmra.mxu1 %v9875_v24  ;;  %v7828_v1 = vld [vmem:[%s9348_s13 + $0x70] sm:$0xff]  ;;  %v7841_v17 = vld [vmem:[%s9348_s13 + $0xd8] sm:$0xff] }
 0x82f   : > { %2907 = vmatpush.bf16.msrb.mxu2 %v6337_v41  ;;  %2921 = vmatpush.bf16.msra.mxu3 %v6341_v12  ;;  %v6545_v41 = vor.u32 %v7796_v0, %v6544_v4  ;;  %v6549_v12 = vor.u32 %v7788_v7, %v6546_v6  ;;  %v6224_v4 = vld [vmem:[%s9338_s14 + $0xb0] sm:$0xf]  ;;  %v7708_v7 = vld [vmem:[%s9338_s14 + $0xb4] sm:$0xf]  ;;  %v7817_v47 = vld [vmem:[%s9348_s13 + $0x18] sm:$0xff] }
 0x830   : > { %2935 = vmatpush.bf16.msrb.mxu0 %v6345_v15  ;;  %2949 = vmatpush.bf16.msra.mxu1 %v6349_v16  ;;  %v6553_v15 = vor.u32 %v7797_v9, %v6552_v8  ;;  %v6557_v16 = vor.u32 %v7789_v10, %v6554_v11  ;;  %v7716_v0 = vld [vmem:[%s9338_s14 + $0xec] sm:$0xf0]  ;;  %v6226_v6 = vld [vmem:[%s9338_s14 + $0xf0] sm:$0xf0]  ;;  %v6232_v8 = vld [vmem:[%s9338_s14 + $0xb8] sm:$0xf] }
 0x831   : > { %v7717_v9 = vld [vmem:[%s9338_s14 + $0xf4] sm:$0xf0]  ;;  %v7709_v10 = vld [vmem:[%s9338_s14 + $0xbc] sm:$0xf] }
 0x832   : > { %v6234_v11 = vld [vmem:[%s9338_s14 + $0xf8] sm:$0xf0] }
 0x833   : > { %2908 = vmatpush.bf16.msrb.mxu2 %v6273_v19  ;;  %2922 = vmatpush.bf16.msra.mxu3 %v6277_v22  ;;  %v6481_v19 = vor.u32 %v7780_v14, %v6480_v40  ;;  %v6485_v22 = vor.u32 %v7772_v13, %v6482_v36  ;;  %v6160_v40 = vld [vmem:[%s9338_s14 + $0x30] sm:$0xf]  ;;  %v7692_v13 = vld [vmem:[%s9338_s14 + $0x34] sm:$0xf] }
 0x834   : > { %2936 = vmatpush.bf16.msrb.mxu0 %v6281_v28  ;;  %2950 = vmatpush.bf16.msra.mxu1 %v6285_v29  ;;  %v6489_v28 = vor.u32 %v7781_v21, %v6488_v18  ;;  %v6493_v29 = vor.u32 %v7773_v23, %v6490_v42  ;;  %v7700_v14 = vld [vmem:[%s9338_s14 + $0x6c] sm:$0xf0]  ;;  %v6162_v36 = vld [vmem:[%s9338_s14 + $0x70] sm:$0xf0]  ;;  %v6168_v18 = vld [vmem:[%s9338_s14 + $0x38] sm:$0xf] }
 0x835   : > { %v7701_v21 = vld [vmem:[%s9338_s14 + $0x74] sm:$0xf0]  ;;  %v7693_v23 = vld [vmem:[%s9338_s14 + $0x3c] sm:$0xf] }
 0x836   : > { %v6170_v42 = vld [vmem:[%s9338_s14 + $0x78] sm:$0xf0]  ;;  %v6169_v25 = vor.u32 %v7701_v21, %v6168_v18  ;;  %v7872_v18 = vld [vmem:[%s9348_s13 + $0x1d0] sm:$0xff] }
 0x837   : > { %2909 = vmatpush.bf16.msrb.mxu2 %v6209_v37  ;;  %2923 = vmatpush.bf16.msra.mxu3 %v6213_v38  ;;  %v6421_v37 = vor.u32 %v7756_v62, %v6418_v32  ;;  %v6352_v38 = vld [vmem:[%s9338_s14 + $0x1b0] sm:$0xf]  ;;  %v6173_v26 = vor.u32 %v7693_v23, %v6170_v42  ;;  %v7821_v62 = vld [vmem:[%s9348_s13 + $0x38] sm:$0xff]  ;;  %v7863_v42 = vld [vmem:[%s9348_s13 + $0x188] sm:$0xff] }
 0x838   : > { %2937 = vmatpush.bf16.msrb.mxu0 %v6217_v45  ;;  %2951 = vmatpush.bf16.msra.mxu1 %v6221_v46  ;;  %v7740_v45 = vld [vmem:[%s9338_s14 + $0x1b4] sm:$0xf]  ;;  %v6353_v30 = vor.u32 %v7748_v51, %v6352_v38  ;;  %v7829_v32 = vld [vmem:[%s9348_s13 + $0x78] sm:$0xff]  ;;  %v7819_v38 = vld [vmem:[%s9348_s13 + $0x28] sm:$0xff] }
 0x839   : > { %v6354_v46 = vld [vmem:[%s9338_s14 + $0x1f0] sm:$0xf0]  ;;  %v7827_v51 = vld [vmem:[%s9348_s13 + $0x68] sm:$0xff] }
 0x83a   : > { %v6357_v50 = vor.u32 %v7740_v45, %v6354_v46  ;;  %v7826_v45 = vld [vmem:[%s9348_s13 + $0x60] sm:$0xff]  ;;  %v7833_v46 = vld [vmem:[%s9348_s13 + $0x98] sm:$0xff]  ;;  %v7848_v21 = vld [vmem:[%s9348_s13 + $0x110] sm:$0xff] }
 0x83b   : > { %2910 = vmatpush.bf16.msrb.mxu2 %v6145_v55  ;;  %2924 = vmatpush.bf16.msra.mxu3 %v6149_v56  ;;  %v6365_v55 = vor.u32 %v7741_v49, %v6362_v27  ;;  %v7724_v56 = vld [vmem:[%s9338_s14 + $0x134] sm:$0xf]  ;;  %v7825_v49 = vld [vmem:[%s9348_s13 + $0x58] sm:$0xff] }
 0x83c   : > { %2938 = vmatpush.bf16.msrb.mxu0 %v6153_v61  ;;  %2952 = vmatpush.bf16.msra.mxu1 %v6157_v63  ;;  %v7725_v61 = vld [vmem:[%s9338_s14 + $0x13c] sm:$0xf]  ;;  %v7832_v27 = vld [vmem:[%s9348_s13 + $0x90] sm:$0xff] }
 0x83d   : > { %v6298_v63 = vld [vmem:[%s9338_s14 + $0x178] sm:$0xf0]  ;;  %v7856_v23 = vld [vmem:[%s9348_s13 + $0x150] sm:$0xff] }
 0x83e   : > { %2911 = vmatmul.bf16.vlgmr.msrb.gmra.mxu2 %v9875_v24  ;;  %2925 = vmatmul.bf16.vlgmr.msra.gmra.mxu3 %v9875_v24 }
 0x83f   : > { %2959 = vmatpush.bf16.msra.mxu2 %v6609_v34  ;;  %2973 = vmatpush.bf16.msrb.mxu3 %v6613_v2  ;;  %v6289_v34 = vor.u32 %v7732_v53, %v6288_v35  ;;  %v6293_v2 = vor.u32 %v7724_v56, %v6290_v57  ;;  %v7824_v35 = vld [vmem:[%s9348_s13 + $0x50] sm:$0xff]  ;;  %v7831_v53 = vld [vmem:[%s9348_s13 + $0x88] sm:$0xff]  ;;  %v7830_v57 = vld [vmem:[%s9348_s13 + $0x80] sm:$0xff] }
 0x840   : > { %2987 = vmatpush.bf16.msra.mxu0 %v6617_v5  ;;  %3001 = vmatpush.bf16.msrb.mxu1 %v6621_v52  ;;  %v6297_v5 = vor.u32 %v7733_v59, %v6296_v58  ;;  %v6301_v52 = vor.u32 %v7725_v61, %v6298_v63  ;;  %v7823_v56 = vld [vmem:[%s9348_s13 + $0x48] sm:$0xff]  ;;  %v7838_v58 = vld [vmem:[%s9348_s13 + $0xc0] sm:$0xff]  ;;  %v7869_v59 = vld [vmem:[%s9348_s13 + $0x1b8] sm:$0xff] }
 0x841   : > { %2939 = vmatmul.bf16.vlgmr.msrb.gmra.mxu0 %v9875_v24  ;;  %2953 = vmatmul.bf16.vlgmr.msra.gmra.mxu1 %v9875_v24  ;;  %v7877_v61 = vld [vmem:[%s9348_s13 + $0x1f8] sm:$0xff]  ;;  %v7814_v63 = vld [vmem:[%s9348_s13] sm:$0xff] }
 0x843   : > { %2960 = vmatpush.bf16.msra.mxu2 %v6545_v41  ;;  %2974 = vmatpush.bf16.msrb.mxu3 %v6549_v12  ;;  %v6225_v41 = vor.u32 %v7716_v0, %v6224_v4  ;;  %v6229_v12 = vor.u32 %v7708_v7, %v6226_v6  ;;  %v7861_v4 = vld [vmem:[%s9348_s13 + $0x178] sm:$0xff]  ;;  %v7868_v0 = vld [vmem:[%s9348_s13 + $0x1b0] sm:$0xff]  ;;  %v7867_v6 = vld [vmem:[%s9348_s13 + $0x1a8] sm:$0xff] }
 0x844   : > { %2988 = vmatpush.bf16.msra.mxu0 %v6553_v15  ;;  %3002 = vmatpush.bf16.msrb.mxu1 %v6557_v16  ;;  %v6233_v15 = vor.u32 %v7717_v9, %v6232_v8  ;;  %v6237_v16 = vor.u32 %v7709_v10, %v6234_v11  ;;  %v7860_v7 = vld [vmem:[%s9348_s13 + $0x170] sm:$0xff]  ;;  %v7875_v8 = vld [vmem:[%s9348_s13 + $0x1e8] sm:$0xff]  ;;  %v7866_v11 = vld [vmem:[%s9348_s13 + $0x1a0] sm:$0xff] }
 0x845   : > { %v7851_v9 = vld [vmem:[%s9348_s13 + $0x128] sm:$0xff] }
 0x846   : > { %v7859_v10 = vld [vmem:[%s9348_s13 + $0x168] sm:$0xff] }
 0x847   : > { %2961 = vmatpush.bf16.msra.mxu2 %v6481_v19  ;;  %2975 = vmatpush.bf16.msrb.mxu3 %v6485_v22  ;;  %v6161_v19 = vor.u32 %v7700_v14, %v6160_v40  ;;  %v6165_v22 = vor.u32 %v7692_v13, %v6162_v36  ;;  %v7858_v40 = vld [vmem:[%s9348_s13 + $0x160] sm:$0xff]  ;;  %v7865_v14 = vld [vmem:[%s9348_s13 + $0x198] sm:$0xff]  ;;  %v7864_v36 = vld [vmem:[%s9348_s13 + $0x190] sm:$0xff] }
 0x848   : > { %2989 = vmatpush.bf16.msra.mxu0 %v6489_v28  ;;  %3003 = vmatpush.bf16.msrb.mxu1 %v6493_v29  ;;  %v7837_v28 = vld [vmem:[%s9348_s13 + $0xb8] sm:$0xff] }
 0x849   : > { %v7845_v29 = vld [vmem:[%s9348_s13 + $0xf8] sm:$0xff] }
 0x84a   : > { %v7857_v13 = vld [vmem:[%s9348_s13 + $0x158] sm:$0xff] }
 0x84b   : > { %2962 = vmatpush.bf16.msra.mxu2 %v6417_v31  ;;  %2976 = vmatpush.bf16.msrb.mxu3 %v6421_v37  ;;  %v7835_v31 = vld [vmem:[%s9348_s13 + $0xa8] sm:$0xff] }
 0x84c   : > { %2990 = vmatpush.bf16.msra.mxu0 %v6425_v44  ;;  %3004 = vmatpush.bf16.msrb.mxu1 %v6429_v39  ;;  %v7843_v37 = vld [vmem:[%s9348_s13 + $0xe8] sm:$0xff]  ;;  %v7842_v44 = vld [vmem:[%s9348_s13 + $0xe0] sm:$0xff] }
 0x84d   : > { %v7818_v39 = vld [vmem:[%s9348_s13 + $0x20] sm:$0xff] }
 0x84f   : > { %2963 = vmatpush.bf16.msra.mxu2 %v6353_v30  ;;  %2977 = vmatpush.bf16.msrb.mxu3 %v6357_v50  ;;  %v7840_v30 = vld [vmem:[%s9348_s13 + $0xd0] sm:$0xff] }
 0x850   : > { %2991 = vmatpush.bf16.msra.mxu0 %v6361_v43  ;;  %3005 = vmatpush.bf16.msrb.mxu1 %v6365_v55  ;;  %v7816_v50 = vld [vmem:[%s9348_s13 + $0x10] sm:$0xff]  ;;  %v7839_v43 = vld [vmem:[%s9348_s13 + $0xc8] sm:$0xff] }
 0x851   : > { %v7815_v55 = vld [vmem:[%s9348_s13 + $0x8] sm:$0xff] }
 0x853   : > { %2964 = vmatpush.bf16.msra.mxu2 %v6289_v34  ;;  %2978 = vmatpush.bf16.msrb.mxu3 %v6293_v2  ;;  %v7822_v34 = vld [vmem:[%s9348_s13 + $0x40] sm:$0xff]  ;;  %v7853_v2 = vld [vmem:[%s9348_s13 + $0x138] sm:$0xff] }
 0x854   : > { %2992 = vmatpush.bf16.msra.mxu0 %v6297_v5  ;;  %3006 = vmatpush.bf16.msrb.mxu1 %v6301_v52  ;;  %v7876_v5 = vld [vmem:[%s9348_s13 + $0x1f0] sm:$0xff] }
 0x855   : > { %v7852_v52 = vld [vmem:[%s9348_s13 + $0x130] sm:$0xff] }
 0x857   : > { %2965 = vmatpush.bf16.msra.mxu2 %v6225_v41  ;;  %2979 = vmatpush.bf16.msrb.mxu3 %v6229_v12  ;;  %v7874_v41 = vld [vmem:[%s9348_s13 + $0x1e0] sm:$0xff] }
 0x858   : > { %2993 = vmatpush.bf16.msra.mxu0 %v6233_v15  ;;  %3007 = vmatpush.bf16.msrb.mxu1 %v6237_v16  ;;  %v7850_v12 = vld [vmem:[%s9348_s13 + $0x120] sm:$0xff]  ;;  %v7873_v15 = vld [vmem:[%s9348_s13 + $0x1d8] sm:$0xff] }
 0x859   : > { %v7849_v16 = vld [vmem:[%s9348_s13 + $0x118] sm:$0xff] }
 0x85b   : > { %2966 = vmatpush.bf16.msra.mxu2 %v6161_v19  ;;  %2980 = vmatpush.bf16.msrb.mxu3 %v6165_v22  ;;  %v7871_v19 = vld [vmem:[%s9348_s13 + $0x1c8] sm:$0xff] }
 0x85c   : > { %2994 = vmatpush.bf16.msra.mxu0 %v6169_v25  ;;  %3008 = vmatpush.bf16.msrb.mxu1 %v6173_v26  ;;  %v7847_v22 = vld [vmem:[%s9348_s13 + $0x108] sm:$0xff]  ;;  %v7862_v26 = vld [vmem:[%s9348_s13 + $0x180] sm:$0xff] }
 0x85d   : > { %v7855_v25 = vld [vmem:[%s9348_s13 + $0x148] sm:$0xff] }
 0x85e   : > { %2967 = vmatmul.bf16.vlgmr.msra.gmra.mxu2 %v9875_v24  ;;  %2981 = vmatmul.bf16.vlgmr.msrb.gmra.mxu3 %v9875_v24 }
 0x85f   : > { %2995 = vmatmul.bf16.vlgmr.msra.gmra.mxu0 %v9875_v24  ;;  %3009 = vmatmul.bf16.vlgmr.msrb.gmra.mxu1 %v9875_v24  ;;  %v7834_v24 = vld [vmem:[%s9348_s13 + $0xa0] sm:$0xff] }
 0x860   : > { %4119 = vmatpush.bf16.msrb.mxu0 %v7837_v28  ;;  %4133 = vmatpush.bf16.msra.mxu1 %v7845_v29  ;;  %v7870_v28 = vld [vmem:[%s9348_s13 + $0x1c0] sm:$0xff] }
 0x861   : > { %4091 = vmatpush.bf16.msrb.mxu2 %v7821_v62  ;;  %4105 = vmatpush.bf16.msra.mxu3 %v7829_v32  ;;  %v7846_v29 = vld [vmem:[%s9348_s13 + $0x100] sm:$0xff] }
 0x862   : > { %v7854_v62 = vld [vmem:[%s9348_s13 + $0x140] sm:$0xff] }
 0x863   : > { %v10078_v32 = vld [vmem:[%s9345_s21] sm:$0xff] }
 0x864   : > { %4120 = vmatpush.bf16.msrb.mxu0 %v7836_v33  ;;  %4134 = vmatpush.bf16.msra.mxu1 %v7844_v54 }
 0x865   : > { %4092 = vmatpush.bf16.msrb.mxu2 %v7820_v48  ;;  %4106 = vmatpush.bf16.msra.mxu3 %v7828_v1  ;;  %v2121_v48 = vperm.slane %v10078_v32, 2  ;;  %v2122_v1 = vperm.slane %v10078_v32, 3 }
 0x868   : > { %4121 = vmatpush.bf16.msrb.mxu0 %v7835_v31  ;;  %4135 = vmatpush.bf16.msra.mxu1 %v7843_v37 }
 0x869   : > { %4093 = vmatpush.bf16.msrb.mxu2 %v7819_v38  ;;  %4107 = vmatpush.bf16.msra.mxu3 %v7827_v51 }
 0x86c   : > { %4122 = vmatpush.bf16.msrb.mxu0 %v7834_v24  ;;  %4136 = vmatpush.bf16.msra.mxu1 %v7842_v44  ;;  %v2119_v24 = vperm.slane %v10078_v32, 0  ;;  %v2120_v44 = vperm.slane %v10078_v32, 1 }
 0x86d   : > { %4094 = vmatpush.bf16.msrb.mxu2 %v7818_v39  ;;  %4108 = vmatpush.bf16.msra.mxu3 %v7826_v45 }
 0x870   : > { %4123 = vmatpush.bf16.msrb.mxu0 %v7833_v46  ;;  %4137 = vmatpush.bf16.msra.mxu1 %v7841_v17 }
 0x871   : > { %4095 = vmatpush.bf16.msrb.mxu2 %v7817_v47  ;;  %4109 = vmatpush.bf16.msra.mxu3 %v7825_v49 }
 0x874   : > { %4124 = vmatpush.bf16.msrb.mxu0 %v7832_v27  ;;  %4138 = vmatpush.bf16.msra.mxu1 %v7840_v30 }
 0x875   : > { %4096 = vmatpush.bf16.msrb.mxu2 %v7816_v50  ;;  %4110 = vmatpush.bf16.msra.mxu3 %v7824_v35 }
 0x878   : > { %4125 = vmatpush.bf16.msrb.mxu0 %v7831_v53  ;;  %4139 = vmatpush.bf16.msra.mxu1 %v7839_v43  ;;  %v7901_v53 = vld [vmem:[%s9348_s13 + $0x2b8] sm:$0xff] }
 0x879   : > { %4097 = vmatpush.bf16.msrb.mxu2 %v7815_v55  ;;  %4111 = vmatpush.bf16.msra.mxu3 %v7823_v56  ;;  %v7909_v43 = vld [vmem:[%s9348_s13 + $0x2f8] sm:$0xff] }
 0x87c   : > { %4126 = vmatpush.bf16.msrb.mxu0 %v7830_v57  ;;  %4140 = vmatpush.bf16.msra.mxu1 %v7838_v58 }
 0x87d   : > { %4098 = vmatpush.bf16.msrb.mxu2 %v7814_v63  ;;  %4112 = vmatpush.bf16.msra.mxu3 %v7822_v34 }
 0x880   : > { %4175 = vmatpush.bf16.msra.mxu0 %v7869_v59  ;;  %4189 = vmatpush.bf16.msrb.mxu1 %v7877_v61 }
 0x881   : > { %4147 = vmatpush.bf16.msra.mxu2 %v7853_v2  ;;  %4161 = vmatpush.bf16.msrb.mxu3 %v7861_v4 }
 0x884   : > { %4176 = vmatpush.bf16.msra.mxu0 %v7868_v0  ;;  %4190 = vmatpush.bf16.msrb.mxu1 %v7876_v5 }
 0x885   : > { %4148 = vmatpush.bf16.msra.mxu2 %v7852_v52  ;;  %4162 = vmatpush.bf16.msrb.mxu3 %v7860_v7  ;;  %v7900_v52 = vld [vmem:[%s9348_s13 + $0x2b0] sm:$0xff] }
 0x886   : > { %v7908_v7 = vld [vmem:[%s9348_s13 + $0x2f0] sm:$0xff] }
 0x888   : > { %4177 = vmatpush.bf16.msra.mxu0 %v7867_v6  ;;  %4191 = vmatpush.bf16.msrb.mxu1 %v7875_v8 }
 0x889   : > { %4149 = vmatpush.bf16.msra.mxu2 %v7851_v9  ;;  %4163 = vmatpush.bf16.msrb.mxu3 %v7859_v10  ;;  %v7885_v9 = vld [vmem:[%s9348_s13 + $0x238] sm:$0xff] }
 0x88a   : > { %v7893_v10 = vld [vmem:[%s9348_s13 + $0x278] sm:$0xff] }
 0x88c   : > { %4178 = vmatpush.bf16.msra.mxu0 %v7866_v11  ;;  %4192 = vmatpush.bf16.msrb.mxu1 %v7874_v41  ;;  %v2125_v11 = vperm.slane %v10078_v32, 6  ;;  %v2126_v41 = vperm.slane %v10078_v32, 7 }
 0x88d   : > { %4150 = vmatpush.bf16.msra.mxu2 %v7850_v12  ;;  %4164 = vmatpush.bf16.msrb.mxu3 %v7858_v40  ;;  %v7899_v12 = vld [vmem:[%s9348_s13 + $0x2a8] sm:$0xff] }
 0x88e   : > { %v7907_v40 = vld [vmem:[%s9348_s13 + $0x2e8] sm:$0xff] }
 0x890   : > { %4179 = vmatpush.bf16.msra.mxu0 %v7865_v14  ;;  %4193 = vmatpush.bf16.msrb.mxu1 %v7873_v15 }
 0x891   : > { %4151 = vmatpush.bf16.msra.mxu2 %v7849_v16  ;;  %4165 = vmatpush.bf16.msrb.mxu3 %v7857_v13  ;;  %v7884_v16 = vld [vmem:[%s9348_s13 + $0x230] sm:$0xff] }
 0x892   : > { %v7892_v13 = vld [vmem:[%s9348_s13 + $0x270] sm:$0xff] }
 0x894   : > { %4180 = vmatpush.bf16.msra.mxu0 %v7864_v36  ;;  %4194 = vmatpush.bf16.msrb.mxu1 %v7872_v18 }
 0x895   : > { %4152 = vmatpush.bf16.msra.mxu2 %v7848_v21  ;;  %4166 = vmatpush.bf16.msrb.mxu3 %v7856_v23  ;;  %v2123_v21 = vperm.slane %v10078_v32, 4  ;;  %v2124_v23 = vperm.slane %v10078_v32, 5 }
 0x898   : > { %4181 = vmatpush.bf16.msra.mxu0 %v7863_v42  ;;  %4195 = vmatpush.bf16.msrb.mxu1 %v7871_v19 }
 0x899   : > { %4153 = vmatpush.bf16.msra.mxu2 %v7847_v22  ;;  %4167 = vmatpush.bf16.msrb.mxu3 %v7855_v25  ;;  %v7898_v22 = vld [vmem:[%s9348_s13 + $0x2a0] sm:$0xff] }
 0x89a   : > { %v7906_v25 = vld [vmem:[%s9348_s13 + $0x2e0] sm:$0xff] }
 0x89b   : > { %v2828_v33 = vpop.f32.mrf.mxu0  ;;  %v2842_v54 = vpop.f32.mrf.mxu1 }
 0x89c   : > { %4182 = vmatpush.bf16.msra.mxu0 %v7862_v26  ;;  %4196 = vmatpush.bf16.msrb.mxu1 %v7870_v28  ;;  %v2829_v38 = vadd.f32 %v2828_v33, %v2121_v48  ;;  %v2843_v51 = vadd.f32 %v2842_v54, %v2122_v1 }
 0x89d   : > { %4154 = vmatpush.bf16.msra.mxu2 %v7846_v29  ;;  %4168 = vmatpush.bf16.msrb.mxu3 %v7854_v62  ;;  %v7883_v29 = vld [vmem:[%s9348_s13 + $0x228] sm:$0xff] }
 0x89e   : > { %v3017_v47 = vmax.f32 %v2829_v38, 0.0  ;;  %v3018_v49 = vmax.f32 %v2843_v51, 0.0  ;;  %v7891_v62 = vld [vmem:[%s9348_s13 + $0x268] sm:$0xff]  ;;  %v7905_v38 = vld [vmem:[%s9348_s13 + $0x2d8] sm:$0xff] }
 0x8a0   : > { %v2800_v31 = vpop.f32.mrf.mxu2  ;;  %v2814_v37 = vpop.f32.mrf.mxu3 }
 0x8a1   : > { %v2801_v50 = vadd.f32 %v2800_v31, %v2119_v24  ;;  %v2815_v35 = vadd.f32 %v2814_v37, %v2120_v44  ;;  %v7897_v37 = vld [vmem:[%s9348_s13 + $0x298] sm:$0xff] }
 0x8a3   : > { %v2830_v39 = vpop.f32.mrf.mxu0  ;;  %v2844_v45 = vpop.f32.mrf.mxu1  ;;  %v3015_v63 = vmax.f32 %v2801_v50, 0.0  ;;  %v3016_v34 = vmax.f32 %v2815_v35, 0.0  ;;  %v7896_v35 = vld [vmem:[%s9348_s13 + $0x290] sm:$0xff] }
 0x8a4   : > { %v2831_v46 = vadd.f32 %v2830_v39, %v2121_v48  ;;  %v2845_v17 = vadd.f32 %v2844_v45, %v2122_v1 }
 0x8a6   : > { %v3033_v27 = vmax.f32 %v2831_v46, 0.0  ;;  %v3034_v30 = vmax.f32 %v2845_v17, 0.0  ;;  %v7882_v17 = vld [vmem:[%s9348_s13 + $0x220] sm:$0xff] }
 0x8a8   : > { %v3049_v55 = vpack.c.bf16 %v3033_v27, %v3017_v47  ;;  %v3050_v56 = vpack.c.bf16 %v3034_v30, %v3018_v49  ;;  %v2802_v57 = vpop.f32.mrf.mxu2  ;;  %v2816_v58 = vpop.f32.mrf.mxu3  ;;  %v7890_v47 = vld [vmem:[%s9348_s13 + $0x260] sm:$0xff] }
 0x8a9   : > { %v2803_v59 = vadd.f32 %v2802_v57, %v2119_v24  ;;  %v2817_v61 = vadd.f32 %v2816_v58, %v2120_v44 }
 0x8aa   : > { %4127 = vmatmul.bf16.vlgmr.msrb.gmra.mxu0 %v3049_v55  ;;  %4141 = vmatmul.bf16.vlgmr.msra.gmra.mxu1 %v3050_v56  ;;  %v10109_v56 = vld [vmem:[%s9345_s21 + $0x8] sm:$0xff] }
 0x8ab   : > { %v3031_v2 = vmax.f32 %v2803_v59, 0.0  ;;  %v3032_v4 = vmax.f32 %v2817_v61, 0.0  ;;  %4231 = vmatpush.bf16.msrb.mxu0 %v7901_v53  ;;  %4245 = vmatpush.bf16.msra.mxu1 %v7909_v43  ;;  %v2884_v0 = vpop.f32.mrf.mxu0  ;;  %v2898_v5 = vpop.f32.mrf.mxu1  ;;  %v7904_v53 = vld [vmem:[%s9348_s13 + $0x2d0] sm:$0xff]  ;;  %v7881_v59 = vld [vmem:[%s9348_s13 + $0x218] sm:$0xff] }
 0x8ac   : > { %v2885_v36 = vadd.f32 %v2884_v0, %v2125_v11  ;;  %v2899_v18 = vadd.f32 %v2898_v5, %v2126_v41  ;;  %v7889_v61 = vld [vmem:[%s9348_s13 + $0x258] sm:$0xff]  ;;  %v7880_v0 = vld [vmem:[%s9348_s13 + $0x210] sm:$0xff] }
 0x8ad   : > { %v3047_v6 = vpack.c.bf16 %v3031_v2, %v3015_v63  ;;  %v3048_v8 = vpack.c.bf16 %v3032_v4, %v3016_v34  ;;  %v7895_v63 = vld [vmem:[%s9348_s13 + $0x288] sm:$0xff]  ;;  %v2129_v2 = vperm.slane %v10109_v56, 2  ;;  %v2130_v4 = vperm.slane %v10109_v56, 3  ;;  %v7888_v5 = vld [vmem:[%s9348_s13 + $0x250] sm:$0xff] }
 0x8ae   : > { %v3021_v33 = vmax.f32 %v2885_v36, 0.0  ;;  %v3022_v54 = vmax.f32 %v2899_v18, 0.0  ;;  %v7903_v34 = vld [vmem:[%s9348_s13 + $0x2c8] sm:$0xff] }
 0x8af   : > { %4232 = vmatpush.bf16.msrb.mxu0 %v7900_v52  ;;  %4246 = vmatpush.bf16.msra.mxu1 %v7908_v7 }
 0x8b0   : > { %4099 = vmatmul.bf16.vlgmr.msrb.gmra.mxu2 %v3047_v6  ;;  %4113 = vmatmul.bf16.vlgmr.msra.gmra.mxu3 %v3048_v8  ;;  %v2856_v14 = vpop.f32.mrf.mxu2  ;;  %v2870_v15 = vpop.f32.mrf.mxu3  ;;  %v7894_v6 = vld [vmem:[%s9348_s13 + $0x280] sm:$0xff] }
 0x8b1   : > { %4203 = vmatpush.bf16.msrb.mxu2 %v7885_v9  ;;  %4217 = vmatpush.bf16.msra.mxu3 %v7893_v10  ;;  %v2857_v32 = vadd.f32 %v2856_v14, %v2123_v21  ;;  %v2871_v31 = vadd.f32 %v2870_v15, %v2124_v23  ;;  %v7902_v8 = vld [vmem:[%s9348_s13 + $0x2c0] sm:$0xff] }
 0x8b3   : > { %4233 = vmatpush.bf16.msrb.mxu0 %v7899_v12  ;;  %4247 = vmatpush.bf16.msra.mxu1 %v7907_v40  ;;  %v2886_v42 = vpop.f32.mrf.mxu0  ;;  %v2900_v19 = vpop.f32.mrf.mxu1  ;;  %v3019_v49 = vmax.f32 %v2857_v32, 0.0  ;;  %v3020_v27 = vmax.f32 %v2871_v31, 0.0  ;;  %v2127_v12 = vperm.slane %v10109_v56, 0  ;;  %v2128_v40 = vperm.slane %v10109_v56, 1 }
 0x8b4   : > { %v2887_v26 = vadd.f32 %v2886_v42, %v2125_v11  ;;  %v2901_v28 = vadd.f32 %v2900_v19, %v2126_v41  ;;  %v7933_v11 = vld [vmem:[%s9348_s13 + $0x3b8] sm:$0xff] }
 0x8b5   : > { %4204 = vmatpush.bf16.msrb.mxu2 %v7884_v16  ;;  %4218 = vmatpush.bf16.msra.mxu3 %v7892_v13  ;;  %v7941_v41 = vld [vmem:[%s9348_s13 + $0x3f8] sm:$0xff]  ;;  %v7879_v16 = vld [vmem:[%s9348_s13 + $0x208] sm:$0xff] }
 0x8b6   : > { %v3037_v48 = vmax.f32 %v2887_v26, 0.0  ;;  %v3038_v1 = vmax.f32 %v2901_v28, 0.0  ;;  %v7887_v13 = vld [vmem:[%s9348_s13 + $0x248] sm:$0xff]  ;;  %v7932_v26 = vld [vmem:[%s9348_s13 + $0x3b0] sm:$0xff] }
 0x8b7   : > { %4234 = vmatpush.bf16.msrb.mxu0 %v7898_v22  ;;  %4248 = vmatpush.bf16.msra.mxu1 %v7906_v25  ;;  %v7940_v28 = vld [vmem:[%s9348_s13 + $0x3f0] sm:$0xff] }
 0x8b8   : > { %v3053_v51 = vpack.c.bf16 %v3037_v48, %v3021_v33  ;;  %v3054_v24 = vpack.c.bf16 %v3038_v1, %v3022_v54  ;;  %v2858_v44 = vpop.f32.mrf.mxu2  ;;  %v2872_v39 = vpop.f32.mrf.mxu3  ;;  %v7878_v48 = vld [vmem:[%s9348_s13 + $0x200] sm:$0xff] }
 0x8b9   : > { %4205 = vmatpush.bf16.msrb.mxu2 %v7883_v29  ;;  %4219 = vmatpush.bf16.msra.mxu3 %v7891_v62  ;;  %v2859_v45 = vadd.f32 %v2858_v44, %v2123_v21  ;;  %v2873_v46 = vadd.f32 %v2872_v39, %v2124_v23  ;;  %v7886_v1 = vld [vmem:[%s9348_s13 + $0x240] sm:$0xff] }
 0x8ba   : > { %4183 = vmatmul.bf16.vlgmr.msra.gmra.mxu0 %v3053_v51  ;;  %4197 = vmatmul.bf16.vlgmr.msrb.gmra.mxu1 %v3054_v24 }
 0x8bb   : > { %v3035_v30 = vmax.f32 %v2859_v45, 0.0  ;;  %v3036_v50 = vmax.f32 %v2873_v46, 0.0  ;;  %4235 = vmatpush.bf16.msrb.mxu0 %v7897_v37  ;;  %4249 = vmatpush.bf16.msra.mxu1 %v7905_v38  ;;  %v7917_v37 = vld [vmem:[%s9348_s13 + $0x338] sm:$0xff]  ;;  %v7931_v45 = vld [vmem:[%s9348_s13 + $0x3a8] sm:$0xff] }
 0x8bc   : > { %v7925_v38 = vld [vmem:[%s9348_s13 + $0x378] sm:$0xff]  ;;  %v7939_v46 = vld [vmem:[%s9348_s13 + $0x3e8] sm:$0xff] }
 0x8bd   : > { %v3051_v43 = vpack.c.bf16 %v3035_v30, %v3019_v49  ;;  %v3052_v55 = vpack.c.bf16 %v3036_v50, %v3020_v27  ;;  %4206 = vmatpush.bf16.msrb.mxu2 %v7882_v17  ;;  %4220 = vmatpush.bf16.msra.mxu3 %v7890_v47  ;;  %v7916_v49 = vld [vmem:[%s9348_s13 + $0x330] sm:$0xff]  ;;  %v7930_v30 = vld [vmem:[%s9348_s13 + $0x3a0] sm:$0xff] }
 0x8be   : > { %v2940_v57 = vpop.f32.mrf.mxu0  ;;  %v2954_v58 = vpop.f32.mrf.mxu1  ;;  %v7924_v27 = vld [vmem:[%s9348_s13 + $0x370] sm:$0xff]  ;;  %v7938_v50 = vld [vmem:[%s9348_s13 + $0x3e0] sm:$0xff] }
 0x8bf   : > { %4236 = vmatpush.bf16.msrb.mxu0 %v7896_v35  ;;  %4250 = vmatpush.bf16.msra.mxu1 %v7904_v53  ;;  %v2941_v9 = vadd.f32 %v2940_v57, %v2129_v2  ;;  %v2955_v10 = vadd.f32 %v2954_v58, %v2130_v4  ;;  %v7915_v35 = vld [vmem:[%s9348_s13 + $0x328] sm:$0xff]  ;;  %v7914_v57 = vld [vmem:[%s9348_s13 + $0x320] sm:$0xff] }
 0x8c0   : > { %4155 = vmatmul.bf16.vlgmr.msra.gmra.mxu2 %v3051_v43  ;;  %4169 = vmatmul.bf16.vlgmr.msrb.gmra.mxu3 %v3052_v55  ;;  %v7923_v53 = vld [vmem:[%s9348_s13 + $0x368] sm:$0xff]  ;;  %v7929_v43 = vld [vmem:[%s9348_s13 + $0x398] sm:$0xff]  ;;  %v7922_v58 = vld [vmem:[%s9348_s13 + $0x360] sm:$0xff] }
 0x8c1   : > { %4207 = vmatpush.bf16.msrb.mxu2 %v7881_v59  ;;  %4221 = vmatpush.bf16.msra.mxu3 %v7889_v61  ;;  %v2912_v52 = vpop.f32.mrf.mxu2  ;;  %v2926_v7 = vpop.f32.mrf.mxu3  ;;  %v3025_v21 = vmax.f32 %v2941_v9, 0.0  ;;  %v3026_v23 = vmax.f32 %v2955_v10, 0.0  ;;  %v7937_v55 = vld [vmem:[%s9348_s13 + $0x3d8] sm:$0xff]  ;;  %v7928_v59 = vld [vmem:[%s9348_s13 + $0x390] sm:$0xff] }
 0x8c2   : > { %v2913_v22 = vadd.f32 %v2912_v52, %v2127_v12  ;;  %v2927_v25 = vadd.f32 %v2926_v7, %v2128_v40  ;;  %v7936_v61 = vld [vmem:[%s9348_s13 + $0x3d0] sm:$0xff]  ;;  %v7927_v52 = vld [vmem:[%s9348_s13 + $0x388] sm:$0xff] }
 0x8c3   : > { %4237 = vmatpush.bf16.msrb.mxu0 %v7895_v63  ;;  %4251 = vmatpush.bf16.msra.mxu1 %v7903_v34  ;;  %v7935_v7 = vld [vmem:[%s9348_s13 + $0x3c8] sm:$0xff]  ;;  %v7912_v9 = vld [vmem:[%s9348_s13 + $0x310] sm:$0xff] }
 0x8c4   : > { %v3023_v51 = vmax.f32 %v2913_v22, 0.0  ;;  %v3024_v24 = vmax.f32 %v2927_v25, 0.0  ;;  %v7920_v10 = vld [vmem:[%s9348_s13 + $0x350] sm:$0xff] }
 0x8c5   : > { %4208 = vmatpush.bf16.msrb.mxu2 %v7880_v0  ;;  %4222 = vmatpush.bf16.msra.mxu3 %v7888_v5  ;;  %v2133_v0 = vperm.slane %v10109_v56, 6  ;;  %v2134_v5 = vperm.slane %v10109_v56, 7 }
 0x8c6   : > { %v2942_v14 = vpop.f32.mrf.mxu0  ;;  %v2956_v15 = vpop.f32.mrf.mxu1 }
 0x8c7   : > { %v2943_v36 = vadd.f32 %v2942_v14, %v2129_v2  ;;  %v2957_v18 = vadd.f32 %v2956_v15, %v2130_v4  ;;  %4238 = vmatpush.bf16.msrb.mxu0 %v7894_v6  ;;  %4252 = vmatpush.bf16.msra.mxu1 %v7902_v8  ;;  %v7913_v2 = vld [vmem:[%s9348_s13 + $0x318] sm:$0xff]  ;;  %v2131_v14 = vperm.slane %v10109_v56, 4  ;;  %v2132_v15 = vperm.slane %v10109_v56, 5 }
 0x8c8   : > { %v7921_v4 = vld [vmem:[%s9348_s13 + $0x358] sm:$0xff] }
 0x8c9   : > { %v3041_v42 = vmax.f32 %v2943_v36, 0.0  ;;  %v3042_v19 = vmax.f32 %v2957_v18, 0.0  ;;  %4209 = vmatpush.bf16.msrb.mxu2 %v7879_v16  ;;  %4223 = vmatpush.bf16.msra.mxu3 %v7887_v13  ;;  %v2914_v33 = vpop.f32.mrf.mxu2  ;;  %v2928_v54 = vpop.f32.mrf.mxu3 }
 0x8ca   : > { %v2915_v32 = vadd.f32 %v2914_v33, %v2127_v12  ;;  %v2929_v31 = vadd.f32 %v2928_v54, %v2128_v40  ;;  %v7926_v12 = vld [vmem:[%s9348_s13 + $0x380] sm:$0xff] }
 0x8cb   : > { %4287 = vmatpush.bf16.msra.mxu0 %v7933_v11  ;;  %4301 = vmatpush.bf16.msrb.mxu1 %v7941_v41  ;;  %v3057_v29 = vpack.c.bf16 %v3041_v42, %v3025_v21  ;;  %v3058_v62 = vpack.c.bf16 %v3042_v19, %v3026_v23  ;;  %v7934_v40 = vld [vmem:[%s9348_s13 + $0x3c0] sm:$0xff]  ;;  %v7911_v21 = vld [vmem:[%s9348_s13 + $0x308] sm:$0xff] }
 0x8cc   : > { %v3039_v44 = vmax.f32 %v2915_v32, 0.0  ;;  %v3040_v39 = vmax.f32 %v2929_v31, 0.0  ;;  %v7919_v23 = vld [vmem:[%s9348_s13 + $0x348] sm:$0xff]  ;;  %v7910_v54 = vld [vmem:[%s9348_s13 + $0x300] sm:$0xff] }
 0x8cd   : > { %4239 = vmatmul.bf16.vlgmr.msrb.gmra.mxu0 %v3057_v29  ;;  %4253 = vmatmul.bf16.vlgmr.msra.gmra.mxu1 %v3058_v62 }
 0x8ce   : > { %4210 = vmatpush.bf16.msrb.mxu2 %v7878_v48  ;;  %4224 = vmatpush.bf16.msra.mxu3 %v7886_v1  ;;  %v3055_v17 = vpack.c.bf16 %v3039_v44, %v3023_v51  ;;  %v3056_v47 = vpack.c.bf16 %v3040_v39, %v3024_v24  ;;  %v7918_v48 = vld [vmem:[%s9348_s13 + $0x340] sm:$0xff] }
 0x8cf   : > { %4288 = vmatpush.bf16.msra.mxu0 %v7932_v26  ;;  %4302 = vmatpush.bf16.msrb.mxu1 %v7940_v28 }
 0x8d1   : > { %4211 = vmatmul.bf16.vlgmr.msrb.gmra.mxu2 %v3055_v17  ;;  %4225 = vmatmul.bf16.vlgmr.msra.gmra.mxu3 %v3056_v47 }
 0x8d2   : > { %4259 = vmatpush.bf16.msra.mxu2 %v7917_v37  ;;  %4273 = vmatpush.bf16.msrb.mxu3 %v7925_v38 }
 0x8d3   : > { %4289 = vmatpush.bf16.msra.mxu0 %v7931_v45  ;;  %4303 = vmatpush.bf16.msrb.mxu1 %v7939_v46 }
 0x8d6   : > { %4260 = vmatpush.bf16.msra.mxu2 %v7916_v49  ;;  %4274 = vmatpush.bf16.msrb.mxu3 %v7924_v27 }
 0x8d7   : > { %4290 = vmatpush.bf16.msra.mxu0 %v7930_v30  ;;  %4304 = vmatpush.bf16.msrb.mxu1 %v7938_v50  ;;  %v8227_v30 = vld [vmem:[%s827_s25] ss:$0 sm:$0xff] }
 0x8da   : > { %4261 = vmatpush.bf16.msra.mxu2 %v7915_v35  ;;  %4275 = vmatpush.bf16.msrb.mxu3 %v7923_v53 }
 0x8db   : > { %4291 = vmatpush.bf16.msra.mxu0 %v7929_v43  ;;  %4305 = vmatpush.bf16.msrb.mxu1 %v7937_v55 }
 0x8dc   : > { %v2996_v63 = vpop.f32.mrf.mxu0  ;;  %v3010_v34 = vpop.f32.mrf.mxu1 }
 0x8dd   : > { %v2997_v11 = vadd.f32 %v2996_v63, %v2133_v0  ;;  %v3011_v41 = vadd.f32 %v3010_v34, %v2134_v5 }
 0x8de   : > { %4262 = vmatpush.bf16.msra.mxu2 %v7914_v57  ;;  %4276 = vmatpush.bf16.msrb.mxu3 %v7922_v58 }
 0x8df   : > { %4292 = vmatpush.bf16.msra.mxu0 %v7928_v59  ;;  %4306 = vmatpush.bf16.msrb.mxu1 %v7936_v61  ;;  %v3029_v42 = vmax.f32 %v2997_v11, 0.0  ;;  %v3030_v19 = vmax.f32 %v3011_v41, 0.0 }
 0x8e1   : > { %v2968_v6 = vpop.f32.mrf.mxu2  ;;  %v2982_v8 = vpop.f32.mrf.mxu3 }
 0x8e2   : > { %4263 = vmatpush.bf16.msra.mxu2 %v7913_v2  ;;  %4277 = vmatpush.bf16.msrb.mxu3 %v7921_v4  ;;  %v2969_v26 = vadd.f32 %v2968_v6, %v2131_v14  ;;  %v2983_v28 = vadd.f32 %v2982_v8, %v2132_v15 }
 0x8e3   : > { %4293 = vmatpush.bf16.msra.mxu0 %v7927_v52  ;;  %4307 = vmatpush.bf16.msrb.mxu1 %v7935_v7 }
 0x8e4   : > { %v2998_v16 = vpop.f32.mrf.mxu0  ;;  %v3012_v13 = vpop.f32.mrf.mxu1  ;;  %v3027_v31 = vmax.f32 %v2969_v26, 0.0  ;;  %v3028_v37 = vmax.f32 %v2983_v28, 0.0 }
 0x8e5   : > { %v2999_v36 = vadd.f32 %v2998_v16, %v2133_v0  ;;  %v3013_v18 = vadd.f32 %v3012_v13, %v2134_v5 }
 0x8e6   : > { %4264 = vmatpush.bf16.msra.mxu2 %v7912_v9  ;;  %4278 = vmatpush.bf16.msrb.mxu3 %v7920_v10 }
 0x8e7   : > { %v3045_v22 = vmax.f32 %v2999_v36, 0.0  ;;  %v3046_v25 = vmax.f32 %v3013_v18, 0.0  ;;  %4294 = vmatpush.bf16.msra.mxu0 %v7926_v12  ;;  %4308 = vmatpush.bf16.msrb.mxu1 %v7934_v40 }
 0x8e9   : > { %v3061_v29 = vpack.c.bf16 %v3045_v22, %v3029_v42  ;;  %v3062_v56 = vpack.c.bf16 %v3046_v25, %v3030_v19  ;;  %v2970_v62 = vpop.f32.mrf.mxu2  ;;  %v2984_v33 = vpop.f32.mrf.mxu3 }
 0x8ea   : > { %4265 = vmatpush.bf16.msra.mxu2 %v7911_v21  ;;  %4279 = vmatpush.bf16.msrb.mxu3 %v7919_v23  ;;  %v2971_v1 = vadd.f32 %v2970_v62, %v2131_v14  ;;  %v2985_v32 = vadd.f32 %v2984_v33, %v2132_v15 }
 0x8eb   : > { %4295 = vmatmul.bf16.vlgmr.msra.gmra.mxu0 %v3061_v29  ;;  %4309 = vmatmul.bf16.vlgmr.msrb.gmra.mxu1 %v3062_v56 }
 0x8ec   : > { %v3043_v38 = vmax.f32 %v2971_v1, 0.0  ;;  %v3044_v51 = vmax.f32 %v2985_v32, 0.0 }
 0x8ee   : > { %4266 = vmatpush.bf16.msra.mxu2 %v7910_v54  ;;  %4280 = vmatpush.bf16.msrb.mxu3 %v7918_v48  ;;  %v3059_v24 = vpack.c.bf16 %v3043_v38, %v3027_v31  ;;  %v3060_v44 = vpack.c.bf16 %v3044_v51, %v3028_v37 }
 0x8f1   : > { %4267 = vmatmul.bf16.vlgmr.msra.gmra.mxu2 %v3059_v24  ;;  %4281 = vmatmul.bf16.vlgmr.msrb.gmra.mxu3 %v3060_v44 }
 0x927   : > { %v4128_v46 = vpop.f32.mrf.mxu0  ;;  %v4142_v17 = vpop.f32.mrf.mxu1 }
 0x92f   : > { %v4130_v27 = vpop.f32.mrf.mxu0  ;;  %v4144_v50 = vpop.f32.mrf.mxu1 }
 0x933   : > { %v4100_v39 = vpop.f32.mrf.mxu2  ;;  %v4114_v45 = vpop.f32.mrf.mxu3 }
 0x934   : > { %v4101_v35 = vadd.f32 %v8227_v30, %v4100_v39 }
 0x936   : > { %v4115_v55 = vadd.f32 %v4114_v45, %v4101_v35 }
 0x937   : > { %v4184_v57 = vpop.f32.mrf.mxu0  ;;  %v4198_v58 = vpop.f32.mrf.mxu1 }
 0x938   : > { %v4129_v59 = vadd.f32 %v4128_v46, %v4115_v55 }
 0x93a   : > { %v4143_v34 = vadd.f32 %v4142_v17, %v4129_v59 }
 0x93b   : > { %v4102_v47 = vpop.f32.mrf.mxu2  ;;  %v4116_v49 = vpop.f32.mrf.mxu3 }
 0x93c   : > { %v4103_v61 = vadd.f32 %v8227_v30, %v4102_v47 }
 0x93e   : > { %v4117_v63 = vadd.f32 %v4116_v49, %v4103_v61 }
 0x93f   : > { %v4186_v5 = vpop.f32.mrf.mxu0  ;;  %v4200_v7 = vpop.f32.mrf.mxu1 }
 0x940   : > { %v4131_v52 = vadd.f32 %v4130_v27, %v4117_v63 }
 0x942   : > { %v4145_v8 = vadd.f32 %v4144_v50, %v4131_v52 }
 0x943   : > { %v4156_v53 = vpop.f32.mrf.mxu2  ;;  %v4170_v43 = vpop.f32.mrf.mxu3 }
 0x944   : > { %v4157_v0 = vadd.f32 %v4156_v53, %v4143_v34 }
 0x946   : > { %v4171_v6 = vadd.f32 %v4170_v43, %v4157_v0 }
 0x948   : > { %v4185_v9 = vadd.f32 %v4184_v57, %v4171_v6 }
 0x94a   : > { %v4240_v12 = vpop.f32.mrf.mxu0  ;;  %v4199_v14 = vadd.f32 %v4198_v58, %v4185_v9  ;;  %v4254_v15 = vpop.f32.mrf.mxu1 }
 0x94b   : > { %v4158_v2 = vpop.f32.mrf.mxu2  ;;  %v4172_v4 = vpop.f32.mrf.mxu3 }
 0x94c   : > { %v4159_v10 = vadd.f32 %v4158_v2, %v4145_v8  ;;  %v8228_v8 = vld [vmem:[%s836_s0] ss:$0 sm:$0xff] }
 0x94e   : > { %v4173_v40 = vadd.f32 %v4172_v4, %v4159_v10 }
 0x950   : > { %v4187_v13 = vadd.f32 %v4186_v5, %v4173_v40 }
 0x952   : > { %v4201_v23 = vadd.f32 %v4200_v7, %v4187_v13  ;;  %v4242_v42 = vpop.f32.mrf.mxu0  ;;  %v4256_v25 = vpop.f32.mrf.mxu1 }
 0x954   : > { %v4212_v11 = vpop.f32.mrf.mxu2  ;;  %v4226_v41 = vpop.f32.mrf.mxu3 }
 0x955   : > { %v4213_v16 = vadd.f32 %v4212_v11, %v4199_v14 }
 0x957   : > { %v4227_v36 = vadd.f32 %v4226_v41, %v4213_v16 }
 0x959   : > { %v4241_v19 = vadd.f32 %v4240_v12, %v4227_v36 }
 0x95b   : > { %v4255_v28 = vadd.f32 %v4254_v15, %v4241_v19 }
 0x95c   : > { %v4214_v18 = vpop.f32.mrf.mxu2  ;;  %v4228_v21 = vpop.f32.mrf.mxu3 }
 0x95d   : > { %v4215_v22 = vadd.f32 %v4214_v18, %v4201_v23 }
 0x95f   : > { %v4229_v26 = vadd.f32 %v4228_v21, %v4215_v22 }
 0x961   : > { %v4243_v54 = vadd.f32 %v4242_v42, %v4229_v26 }
 0x963   : > { %v4257_v31 = vadd.f32 %v4256_v25, %v4243_v54 }
 0x968   : > { %v4296_v33 = vpop.f32.mrf.mxu0  ;;  %v4310_v1 = vpop.f32.mrf.mxu1 }
 0x970   : > { %v4298_v45 = vpop.f32.mrf.mxu0  ;;  %v4312_v17 = vpop.f32.mrf.mxu1 }
 0x974   : > { %v4268_v29 = vpop.f32.mrf.mxu2  ;;  %v4282_v56 = vpop.f32.mrf.mxu3 }
 0x975   : > { %v4269_v62 = vadd.f32 %v4268_v29, %v4255_v28 }
 0x977   : > { %v4283_v48 = vadd.f32 %v4282_v56, %v4269_v62 }
 0x979   : > { %v4297_v32 = vadd.f32 %v4296_v33, %v4283_v48 }
 0x97b   : > { %v4311_v37 = vadd.f32 %v4310_v1, %v4297_v32 }
 0x97c   : > { %v4270_v38 = vpop.f32.mrf.mxu2  ;;  %v4284_v44 = vpop.f32.mrf.mxu3 }
 0x97d   : > { %v4271_v51 = vadd.f32 %v4270_v38, %v4257_v31  ;;  %v4315_v24 = vadd.f32 %v4311_v37, %v9866_v3 }
 0x97f   : > { %v4285_v39 = vadd.f32 %v4284_v44, %v4271_v51  ;;  %4319 = vadd.xlane.f32.xlu1 %v4315_v24 }
 0x981   : > { %v4299_v46 = vadd.f32 %v4298_v45, %v4285_v39 }
 0x983   : > { %v4313_v47 = vadd.f32 %v4312_v17, %v4299_v46 }
 0x985   : > { %v4316_v49 = vadd.f32 %v4313_v47, %v9868_v20 }
 0x987   : > { %4321 = vadd.xlane.f32.xlu0 %v4316_v49 }
 0x9f2   : > { %v4320_v27 = vpop.xlane.xlu1 %4319 }
 0x9f3   : > { %v4323_v30 = vmul.f32 %v4320_v27, %v9751_v60 }
 0x9f5   : > { %v4325_v50 = vsub.f32 %v4315_v24, %v4323_v30 }
 0x9f7   : > { %v4327_v35 = vmul.f32 %v4325_v50, %v4325_v50 }
 0x9f9   : > { %4329 = vadd.xlane.f32.xlu2 %v4327_v35 }
 0x9fa   : > { %v4322_v53 = vpop.xlane.xlu0 %4321 }
 0x9fb   : > { %v4324_v43 = vmul.f32 %v4322_v53, %v9751_v60 }
 0x9fd   : > { %v4326_v3 = vsub.f32 %v4316_v49, %v4324_v43 }
 0x9ff   : > { %v4328_v55 = vmul.f32 %v4326_v3, %v4326_v3 }
 0xa01   : > { %4331 = vadd.xlane.f32.xlu1 %v4328_v55 }
 0xa6c   : > { %v4330_v57 = vpop.xlane.xlu2 %4329 }
 0xa6d   : > { %v4333_v58 = vmul.f32 %v4330_v57, %v9751_v60 }
 0xa6f   : > { %v4335_v59 = vadd.f32 1e-05, %v4333_v58 }
 0xa71   : > { %8300 = vrsqrt.f32 %v4335_v59  ;;  %vm4343_vm1 = vweird.f32 %v4335_v59 }
 0xa74   : > { %v4332_v20 = vpop.xlane.xlu1 %4331 }
 0xa75   : > { %v4334_v61 = vmul.f32 %v4332_v20, %v9751_v60  ;;  %v8229_v60 = vld [vmem:[%s845_s19] ss:$0 sm:$0xff] }
 0xa77   : > { %v8301_v63 = vpop.eup %8300  ;;  %v4336_v34 = vadd.f32 1e-05, %v4334_v61 }
 0xa78   : > { %v4338_v2 = vmul.f32 %v8301_v63, %v4335_v59  ;;  %vm4344_vm0 = vweird.f32 %v8301_v63 }
 0xa79   : > { %8302 = vrsqrt.f32 %v4336_v34  ;;  %vm4345_vm2 = vmor %vm4343_vm1, %vm4344_vm0  ;;  %vm4353_vm4 = vweird.f32 %v4336_v34 }
 0xa7a   : > { %v4339_v4 = vmul.f32 %v8301_v63, %v4338_v2 }
 0xa7c   : > { %v4340_v0 = vmul.f32 0.5, %v4339_v4 }
 0xa7e   : > { %v4341_v5 = vsub.f32 1.5, %v4340_v0 }
 0xa7f   : > { %v8303_v52 = vpop.eup %8302 }
 0xa80   : > { %v4342_v7 = vmul.f32 %v8301_v63, %v4341_v5  ;;  %v4348_v6 = vmul.f32 %v8303_v52, %v4336_v34  ;;  %vm4354_vm3 = vweird.f32 %v8303_v52 }
 0xa81   : > { %vm4355_vm5 = vmor %vm4353_vm4, %vm4354_vm3 }
 0xa82   : > { %v4346_v9 = vsel %vm4345_vm2, %v8301_v63, %v4342_v7  ;;  %v4349_v10 = vmul.f32 %v8303_v52, %v4348_v6 }
 0xa83   : > { %v4357_v11 = vmul.f32 %v4346_v9, %v4325_v50 }
 0xa84   : > { %v4350_v41 = vmul.f32 0.5, %v4349_v10 }
 0xa85   : > { %v4362_v12 = vmul.f32 %v8228_v8, %v4357_v11 }
 0xa86   : > { %v4351_v40 = vsub.f32 1.5, %v4350_v41 }
 0xa87   : > { %v10175_v14 = vadd.f32 %v8229_v60, %v4362_v12 }
 0xa88   : > { %v4352_v15 = vmul.f32 %v8303_v52, %v4351_v40 }
 0xa89   : > { %4369 = vst [vmem:[#allocation2] sm:$0xff] %v10175_v14 }
 0xa8a   : > { %v4356_v16 = vsel %vm4355_vm5, %v8303_v52, %v4352_v15 }
 0xa8b   : > { %v4358_v13 = vmul.f32 %v4356_v16, %v4326_v3 }
 0xa8d   : > { %v4363_v36 = vmul.f32 %v8228_v8, %v4358_v13  ;;  %4374 = sbr.rel (%p7134_p4) target bundleno = 3294 (0xcde), region = 148 }
 0xa8f   : > { %v10178_v18 = vadd.f32 %v8229_v60, %v4363_v36 }
 0xa91   : > { %4370 = vst [vmem:[#allocation2 + $0x8] sm:$0xff] %v10178_v18 }
 0xa92   : > { %v7585_v21 = vld [vmem:[#allocation24 + $0x380] sm:$0xf]  ;;  %v8054_v42 = vld [vmem:[#allocation24 + $0x384] sm:$0xf]  ;;  %v7593_v25 = vld [vmem:[#allocation24 + $0x388] sm:$0xf] }
 0xa93   : > { %v8062_v23 = vld [vmem:[#allocation24 + $0x3bc] sm:$0xf0]  ;;  %v7587_v22 = vld [vmem:[#allocation24 + $0x3c0] sm:$0xf0]  ;;  %v8063_v26 = vld [vmem:[#allocation24 + $0x3c4] sm:$0xf0] }
 0xa94   : > { %v7586_v19 = vor.u32 %v8062_v23, %v7585_v21  ;;  %v7590_v28 = vor.u32 %v8054_v42, %v7587_v22  ;;  %v7594_v29 = vor.u32 %v8063_v26, %v7593_v25  ;;  %v8055_v56 = vld [vmem:[#allocation24 + $0x38c] sm:$0xf]  ;;  %v7521_v33 = vld [vmem:[#allocation24 + $0x300] sm:$0xf]  ;;  %v8038_v1 = vld [vmem:[#allocation24 + $0x304] sm:$0xf] }
 0xa95   : > { %v7595_v62 = vld [vmem:[#allocation24 + $0x3c8] sm:$0xf0]  ;;  %v8046_v48 = vld [vmem:[#allocation24 + $0x33c] sm:$0xf0]  ;;  %v7523_v32 = vld [vmem:[#allocation24 + $0x340] sm:$0xf0] }
 0xa96   : > { %5180 = vmatpush.bf16.msra.mxu0 %v7586_v19  ;;  %v7598_v54 = vor.u32 %v8055_v56, %v7595_v62  ;;  %5194 = vmatpush.bf16.msra.mxu1 %v7590_v28  ;;  %v7522_v31 = vor.u32 %v8046_v48, %v7521_v33  ;;  %v7526_v37 = vor.u32 %v8038_v1, %v7523_v32  ;;  %v7529_v38 = vld [vmem:[#allocation24 + $0x308] sm:$0xf]  ;;  %v8039_v24 = vld [vmem:[#allocation24 + $0x30c] sm:$0xf]  ;;  %v7457_v45 = vld [vmem:[#allocation24 + $0x280] sm:$0xf] }
 0xa97   : > { %5208 = vmatpush.bf16.msra.mxu2 %v7594_v29  ;;  %v8047_v51 = vld [vmem:[#allocation24 + $0x344] sm:$0xf0]  ;;  %v7531_v39 = vld [vmem:[#allocation24 + $0x348] sm:$0xf0]  ;;  %v8030_v46 = vld [vmem:[#allocation24 + $0x2bc] sm:$0xf0] }
 0xa98   : > { %5222 = vmatpush.bf16.msra.mxu3 %v7598_v54  ;;  %v7530_v44 = vor.u32 %v8047_v51, %v7529_v38  ;;  %v7534_v17 = vor.u32 %v8039_v24, %v7531_v39  ;;  %v8022_v47 = vld [vmem:[#allocation24 + $0x284] sm:$0xf]  ;;  %v7465_v27 = vld [vmem:[#allocation24 + $0x288] sm:$0xf]  ;;  %v7458_v30 = vor.u32 %v8030_v46, %v7457_v45  ;;  %v8023_v35 = vld [vmem:[#allocation24 + $0x28c] sm:$0xf] }
 0xa99   : > { %v7459_v49 = vld [vmem:[#allocation24 + $0x2c0] sm:$0xf0]  ;;  %v8031_v50 = vld [vmem:[#allocation24 + $0x2c4] sm:$0xf0]  ;;  %v7467_v53 = vld [vmem:[#allocation24 + $0x2c8] sm:$0xf0] }
 0xa9a   : > { %5181 = vmatpush.bf16.msra.mxu0 %v7522_v31  ;;  %5195 = vmatpush.bf16.msra.mxu1 %v7526_v37  ;;  %v7462_v43 = vor.u32 %v8022_v47, %v7459_v49  ;;  %v7466_v3 = vor.u32 %v8031_v50, %v7465_v27  ;;  %v7393_v55 = vld [vmem:[#allocation24 + $0x200] sm:$0xf]  ;;  %v8006_v58 = vld [vmem:[#allocation24 + $0x204] sm:$0xf]  ;;  %v7470_v59 = vor.u32 %v8023_v35, %v7467_v53  ;;  %v7401_v61 = vld [vmem:[#allocation24 + $0x208] sm:$0xf] }
 0xa9b   : > { %5209 = vmatpush.bf16.msra.mxu2 %v7530_v44  ;;  %v8014_v57 = vld [vmem:[#allocation24 + $0x23c] sm:$0xf0]  ;;  %v7395_v20 = vld [vmem:[#allocation24 + $0x240] sm:$0xf0]  ;;  %v8015_v63 = vld [vmem:[#allocation24 + $0x244] sm:$0xf0] }
 0xa9c   : > { %5223 = vmatpush.bf16.msra.mxu3 %v7534_v17  ;;  %v8007_v34 = vld [vmem:[#allocation24 + $0x20c] sm:$0xf]  ;;  %v7394_v4 = vor.u32 %v8014_v57, %v7393_v55  ;;  %v7398_v0 = vor.u32 %v8006_v58, %v7395_v20  ;;  %v7402_v5 = vor.u32 %v8015_v63, %v7401_v61  ;;  %v7329_v52 = vld [vmem:[#allocation24 + $0x180] sm:$0xf]  ;;  %v7990_v6 = vld [vmem:[#allocation24 + $0x184] sm:$0xf] }
 0xa9d   : > { %v7403_v2 = vld [vmem:[#allocation24 + $0x248] sm:$0xf0]  ;;  %v7998_v7 = vld [vmem:[#allocation24 + $0x1bc] sm:$0xf0]  ;;  %v7331_v9 = vld [vmem:[#allocation24 + $0x1c0] sm:$0xf0] }
 0xa9e   : > { %5182 = vmatpush.bf16.msra.mxu0 %v7458_v30  ;;  %5196 = vmatpush.bf16.msra.mxu1 %v7462_v43  ;;  %v7406_v8 = vor.u32 %v8007_v34, %v7403_v2  ;;  %v7337_v10 = vld [vmem:[#allocation24 + $0x188] sm:$0xf]  ;;  %v7991_v11 = vld [vmem:[#allocation24 + $0x18c] sm:$0xf]  ;;  %v7330_v12 = vor.u32 %v7998_v7, %v7329_v52  ;;  %v7334_v40 = vor.u32 %v7990_v6, %v7331_v9  ;;  %v7265_v16 = vld [vmem:[#allocation24 + $0x100] sm:$0xf] }
 0xa9f   : > { %5210 = vmatpush.bf16.msra.mxu2 %v7466_v3  ;;  %v7999_v60 = vld [vmem:[#allocation24 + $0x1c4] sm:$0xf0]  ;;  %v7339_v41 = vld [vmem:[#allocation24 + $0x1c8] sm:$0xf0]  ;;  %v7982_v13 = vld [vmem:[#allocation24 + $0x13c] sm:$0xf0] }
 0xaa0   : > { %5224 = vmatpush.bf16.msra.mxu3 %v7470_v59  ;;  %v7338_v15 = vor.u32 %v7999_v60, %v7337_v10  ;;  %v7974_v36 = vld [vmem:[#allocation24 + $0x104] sm:$0xf]  ;;  %v7342_v21 = vor.u32 %v7991_v11, %v7339_v41  ;;  %v7273_v42 = vld [vmem:[#allocation24 + $0x108] sm:$0xf]  ;;  %v7975_v22 = vld [vmem:[#allocation24 + $0x10c] sm:$0xf]  ;;  %v7266_v26 = vor.u32 %v7982_v13, %v7265_v16  ;;  %v10184_v10 = vpack.c.bf16 %v10178_v18, %v10175_v14 }
 0xaa1   : > { %v7267_v23 = vld [vmem:[#allocation24 + $0x140] sm:$0xf0]  ;;  %v7983_v19 = vld [vmem:[#allocation24 + $0x144] sm:$0xf0]  ;;  %v7275_v25 = vld [vmem:[#allocation24 + $0x148] sm:$0xf0] }
 0xaa2   : > { %5183 = vmatpush.bf16.msra.mxu0 %v7394_v4  ;;  %5197 = vmatpush.bf16.msra.mxu1 %v7398_v0  ;;  %v7270_v28 = vor.u32 %v7974_v36, %v7267_v23  ;;  %v7274_v29 = vor.u32 %v7983_v19, %v7273_v42  ;;  %v7201_v56 = vld [vmem:[#allocation24 + $0x80] sm:$0xf]  ;;  %v7958_v33 = vld [vmem:[#allocation24 + $0x84] sm:$0xf]  ;;  %v7278_v54 = vor.u32 %v7975_v22, %v7275_v25  ;;  %v7209_v1 = vld [vmem:[#allocation24 + $0x88] sm:$0xf] }
 0xaa3   : > { %5211 = vmatpush.bf16.msra.mxu2 %v7402_v5  ;;  %v7966_v62 = vld [vmem:[#allocation24 + $0xbc] sm:$0xf0]  ;;  %v7203_v48 = vld [vmem:[#allocation24 + $0xc0] sm:$0xf0]  ;;  %v7967_v32 = vld [vmem:[#allocation24 + $0xc4] sm:$0xf0] }
 0xaa4   : > { %5225 = vmatpush.bf16.msra.mxu3 %v7406_v8  ;;  %v7959_v31 = vld [vmem:[#allocation24 + $0x8c] sm:$0xf]  ;;  %v7202_v38 = vor.u32 %v7966_v62, %v7201_v56  ;;  %v7137_v51 = vld [vmem:[#allocation24] sm:$0xf]  ;;  %v7206_v44 = vor.u32 %v7958_v33, %v7203_v48  ;;  %v7210_v39 = vor.u32 %v7967_v32, %v7209_v1  ;;  %v7942_v45 = vld [vmem:[#allocation24 + $0x4] sm:$0xf] }
 0xaa5   : > { %v7211_v37 = vld [vmem:[#allocation24 + $0xc8] sm:$0xf0]  ;;  %v7950_v24 = vld [vmem:[#allocation24 + $0x3c] sm:$0xf0]  ;;  %v7139_v46 = vld [vmem:[#allocation24 + $0x40] sm:$0xf0] }
 0xaa6   : > { %5184 = vmatpush.bf16.msra.mxu0 %v7330_v12  ;;  %5198 = vmatpush.bf16.msra.mxu1 %v7334_v40  ;;  %v7145_v17 = vld [vmem:[#allocation24 + $0x8] sm:$0xf]  ;;  %v7214_v47 = vor.u32 %v7959_v31, %v7211_v37  ;;  %v7943_v27 = vld [vmem:[#allocation24 + $0xc] sm:$0xf]  ;;  %v7601_v50 = vld [vmem:[#allocation24 + $0x390] sm:$0xf]  ;;  %v7138_v43 = vor.u32 %v7950_v24, %v7137_v51  ;;  %v7142_v58 = vor.u32 %v7942_v45, %v7139_v46 }
 0xaa7   : > { %5212 = vmatpush.bf16.msra.mxu2 %v7338_v15  ;;  %v7951_v49 = vld [vmem:[#allocation24 + $0x44] sm:$0xf0]  ;;  %v7147_v30 = vld [vmem:[#allocation24 + $0x48] sm:$0xf0]  ;;  %v8064_v35 = vld [vmem:[#allocation24 + $0x3cc] sm:$0xf0] }
 0xaa8   : > { %5226 = vmatpush.bf16.msra.mxu3 %v7342_v21  ;;  %v8056_v53 = vld [vmem:[#allocation24 + $0x394] sm:$0xf]  ;;  %v7609_v55 = vld [vmem:[#allocation24 + $0x398] sm:$0xf]  ;;  %v7146_v59 = vor.u32 %v7951_v49, %v7145_v17  ;;  %v8057_v20 = vld [vmem:[#allocation24 + $0x39c] sm:$0xf]  ;;  %v7150_v63 = vor.u32 %v7943_v27, %v7147_v30  ;;  %v7602_v34 = vor.u32 %v8064_v35, %v7601_v50 }
 0xaa9   : > { %v7603_v3 = vld [vmem:[#allocation24 + $0x3d0] sm:$0xf0]  ;;  %v8065_v57 = vld [vmem:[#allocation24 + $0x3d4] sm:$0xf0]  ;;  %v7611_v61 = vld [vmem:[#allocation24 + $0x3d8] sm:$0xf0] }
 0xaaa   : > { %5185 = vmatpush.bf16.msra.mxu0 %v7266_v26  ;;  %5199 = vmatpush.bf16.msra.mxu1 %v7270_v28  ;;  %v7606_v2 = vor.u32 %v8056_v53, %v7603_v3  ;;  %v7610_v4 = vor.u32 %v8065_v57, %v7609_v55  ;;  %v7537_v0 = vld [vmem:[#allocation24 + $0x310] sm:$0xf]  ;;  %v8040_v52 = vld [vmem:[#allocation24 + $0x314] sm:$0xf]  ;;  %v7614_v7 = vor.u32 %v8057_v20, %v7611_v61  ;;  %v7545_v8 = vld [vmem:[#allocation24 + $0x318] sm:$0xf] }
 0xaab   : > { %5213 = vmatpush.bf16.msra.mxu2 %v7274_v29  ;;  %v8048_v5 = vld [vmem:[#allocation24 + $0x34c] sm:$0xf0]  ;;  %v7539_v6 = vld [vmem:[#allocation24 + $0x350] sm:$0xf0]  ;;  %v8049_v9 = vld [vmem:[#allocation24 + $0x354] sm:$0xf0] }
 0xaac   : > { %5227 = vmatpush.bf16.msra.mxu3 %v7278_v54  ;;  %v8041_v60 = vld [vmem:[#allocation24 + $0x31c] sm:$0xf]  ;;  %v7538_v41 = vor.u32 %v8048_v5, %v7537_v0  ;;  %v7542_v12 = vor.u32 %v8040_v52, %v7539_v6  ;;  %v7546_v40 = vor.u32 %v8049_v9, %v7545_v8  ;;  %v7473_v15 = vld [vmem:[#allocation24 + $0x290] sm:$0xf]  ;;  %v8024_v13 = vld [vmem:[#allocation24 + $0x294] sm:$0xf] }
 0xaad   : > { %v7547_v11 = vld [vmem:[#allocation24 + $0x358] sm:$0xf0]  ;;  %v8032_v16 = vld [vmem:[#allocation24 + $0x2cc] sm:$0xf0]  ;;  %v7475_v21 = vld [vmem:[#allocation24 + $0x2d0] sm:$0xf0] }
 0xaae   : > { %5186 = vmatpush.bf16.msra.mxu0 %v7202_v38  ;;  %5200 = vmatpush.bf16.msra.mxu1 %v7206_v44  ;;  %v7550_v36 = vor.u32 %v8041_v60, %v7547_v11  ;;  %v7481_v23 = vld [vmem:[#allocation24 + $0x298] sm:$0xf]  ;;  %v8025_v18 = vld [vmem:[#allocation24 + $0x29c] sm:$0xf]  ;;  %v7474_v19 = vor.u32 %v8032_v16, %v7473_v15  ;;  %v7478_v22 = vor.u32 %v8024_v13, %v7475_v21  ;;  %v7409_v26 = vld [vmem:[#allocation24 + $0x210] sm:$0xf] }
 0xaaf   : > { %5214 = vmatpush.bf16.msra.mxu2 %v7210_v39  ;;  %v8033_v14 = vld [vmem:[#allocation24 + $0x2d4] sm:$0xf0]  ;;  %v7483_v42 = vld [vmem:[#allocation24 + $0x2d8] sm:$0xf0]  ;;  %v8016_v28 = vld [vmem:[#allocation24 + $0x24c] sm:$0xf0] }
 0xab0   : > { %5228 = vmatpush.bf16.msra.mxu3 %v7214_v47  ;;  %v7482_v25 = vor.u32 %v8033_v14, %v7481_v23  ;;  %v8008_v29 = vld [vmem:[#allocation24 + $0x214] sm:$0xf]  ;;  %v7486_v56 = vor.u32 %v8025_v18, %v7483_v42  ;;  %v7417_v33 = vld [vmem:[#allocation24 + $0x218] sm:$0xf]  ;;  %v8009_v48 = vld [vmem:[#allocation24 + $0x21c] sm:$0xf]  ;;  %v7410_v32 = vor.u32 %v8016_v28, %v7409_v26 }
 0xab1   : > { %v7411_v62 = vld [vmem:[#allocation24 + $0x250] sm:$0xf0]  ;;  %v8017_v54 = vld [vmem:[#allocation24 + $0x254] sm:$0xf0]  ;;  %v7419_v1 = vld [vmem:[#allocation24 + $0x258] sm:$0xf0] }
 0xab2   : > { %5187 = vmatpush.bf16.msra.mxu0 %v7138_v43  ;;  %5201 = vmatpush.bf16.msra.mxu1 %v7142_v58  ;;  %v7414_v31 = vor.u32 %v8008_v29, %v7411_v62  ;;  %v7418_v37 = vor.u32 %v8017_v54, %v7417_v33  ;;  %v7345_v38 = vld [vmem:[#allocation24 + $0x190] sm:$0xf]  ;;  %v7992_v24 = vld [vmem:[#allocation24 + $0x194] sm:$0xf]  ;;  %v7422_v44 = vor.u32 %v8009_v48, %v7419_v1  ;;  %v7353_v45 = vld [vmem:[#allocation24 + $0x198] sm:$0xf] }
 0xab3   : > { %5215 = vmatpush.bf16.msra.mxu2 %v7146_v59  ;;  %v8000_v51 = vld [vmem:[#allocation24 + $0x1cc] sm:$0xf0]  ;;  %v7347_v39 = vld [vmem:[#allocation24 + $0x1d0] sm:$0xf0]  ;;  %v8001_v46 = vld [vmem:[#allocation24 + $0x1d4] sm:$0xf0] }
 0xab4   : > { %5229 = vmatpush.bf16.msra.mxu3 %v7150_v63  ;;  %v7993_v17 = vld [vmem:[#allocation24 + $0x19c] sm:$0xf]  ;;  %v7346_v49 = vor.u32 %v8000_v51, %v7345_v38  ;;  %v7350_v27 = vor.u32 %v7992_v24, %v7347_v39  ;;  %v7354_v30 = vor.u32 %v8001_v46, %v7353_v45  ;;  %v7281_v50 = vld [vmem:[#allocation24 + $0x110] sm:$0xf]  ;;  %v7976_v53 = vld [vmem:[#allocation24 + $0x114] sm:$0xf] }
 0xab5   : > { %5188 = vmatmul.bf16.vlgmr.msra.gmra.mxu0 %v10184_v10  ;;  %5202 = vmatmul.bf16.vlgmr.msra.gmra.mxu1 %v10184_v10  ;;  %v7355_v47 = vld [vmem:[#allocation24 + $0x1d8] sm:$0xf0]  ;;  %v7984_v35 = vld [vmem:[#allocation24 + $0x14c] sm:$0xf0]  ;;  %v7283_v3 = vld [vmem:[#allocation24 + $0x150] sm:$0xf0] }
 0xab6   : > { %5236 = vmatpush.bf16.msrb.mxu0 %v7602_v34  ;;  %5250 = vmatpush.bf16.msrb.mxu1 %v7606_v2  ;;  %v7358_v43 = vor.u32 %v7993_v17, %v7355_v47  ;;  %v7289_v55 = vld [vmem:[#allocation24 + $0x118] sm:$0xf]  ;;  %v7977_v58 = vld [vmem:[#allocation24 + $0x11c] sm:$0xf]  ;;  %v7282_v20 = vor.u32 %v7984_v35, %v7281_v50  ;;  %v7286_v61 = vor.u32 %v7976_v53, %v7283_v3  ;;  %v7217_v34 = vld [vmem:[#allocation24 + $0x90] sm:$0xf] }
 0xab7   : > { %5264 = vmatpush.bf16.msrb.mxu2 %v7610_v4  ;;  %5230 = vmatmul.bf16.vlgmr.msra.gmra.mxu3 %v10184_v10  ;;  %v7985_v57 = vld [vmem:[#allocation24 + $0x154] sm:$0xf0]  ;;  %v7291_v59 = vld [vmem:[#allocation24 + $0x158] sm:$0xf0]  ;;  %v7968_v2 = vld [vmem:[#allocation24 + $0xcc] sm:$0xf0] }
 0xab8   : > { %5278 = vmatpush.bf16.msrb.mxu3 %v7614_v7  ;;  %5216 = vmatmul.bf16.vlgmr.msra.gmra.mxu2 %v10184_v10  ;;  %v7290_v63 = vor.u32 %v7985_v57, %v7289_v55  ;;  %v7960_v4 = vld [vmem:[#allocation24 + $0x94] sm:$0xf]  ;;  %v7294_v0 = vor.u32 %v7977_v58, %v7291_v59  ;;  %v7225_v52 = vld [vmem:[#allocation24 + $0x98] sm:$0xf]  ;;  %v7961_v6 = vld [vmem:[#allocation24 + $0x9c] sm:$0xf]  ;;  %v7218_v9 = vor.u32 %v7968_v2, %v7217_v34 }
 0xab9   : > { %v7219_v5 = vld [vmem:[#allocation24 + $0xd0] sm:$0xf0]  ;;  %v7969_v7 = vld [vmem:[#allocation24 + $0xd4] sm:$0xf0]  ;;  %v7227_v8 = vld [vmem:[#allocation24 + $0xd8] sm:$0xf0] }
 0xaba   : > { %5237 = vmatpush.bf16.msrb.mxu0 %v7538_v41  ;;  %5251 = vmatpush.bf16.msrb.mxu1 %v7542_v12  ;;  %v7153_v60 = vld [vmem:[#allocation24 + $0x10] sm:$0xf]  ;;  %v7222_v41 = vor.u32 %v7960_v4, %v7219_v5  ;;  %v7226_v12 = vor.u32 %v7969_v7, %v7225_v52  ;;  %v7155_v15 = vld [vmem:[#allocation24 + $0x50] sm:$0xf0]  ;;  %v7161_v16 = vld [vmem:[#allocation24 + $0x18] sm:$0xf]  ;;  %v7230_v13 = vor.u32 %v7961_v6, %v7227_v8 }
 0xabb   : > { %5265 = vmatpush.bf16.msrb.mxu2 %v7546_v40  ;;  %v7952_v11 = vld [vmem:[#allocation24 + $0x4c] sm:$0xf0]  ;;  %v7944_v40 = vld [vmem:[#allocation24 + $0x14] sm:$0xf]  ;;  %v7945_v21 = vld [vmem:[#allocation24 + $0x1c] sm:$0xf] }
 0xabc   : > { %5279 = vmatpush.bf16.msrb.mxu3 %v7550_v36  ;;  %v7953_v36 = vld [vmem:[#allocation24 + $0x54] sm:$0xf0]  ;;  %v7163_v23 = vld [vmem:[#allocation24 + $0x58] sm:$0xf0]  ;;  %v7617_v14 = vld [vmem:[#allocation24 + $0x3a0] sm:$0xf]  ;;  %v7158_v28 = vor.u32 %v7944_v40, %v7155_v15 }
 0xabd   : > { %v8066_v18 = vld [vmem:[#allocation24 + $0x3dc] sm:$0xf0]  ;;  %v8058_v42 = vld [vmem:[#allocation24 + $0x3a4] sm:$0xf]  ;;  %v8067_v26 = vld [vmem:[#allocation24 + $0x3e4] sm:$0xf0]  ;;  %v7162_v29 = vor.u32 %v7953_v36, %v7161_v16  ;;  %v7166_v33 = vor.u32 %v7945_v21, %v7163_v23 }
 0xabe   : > { %5238 = vmatpush.bf16.msrb.mxu0 %v7474_v19  ;;  %5252 = vmatpush.bf16.msrb.mxu1 %v7478_v22  ;;  %v7154_v19 = vor.u32 %v7952_v11, %v7153_v60  ;;  %v7619_v22 = vld [vmem:[#allocation24 + $0x3e0] sm:$0xf0]  ;;  %v7627_v62 = vld [vmem:[#allocation24 + $0x3e8] sm:$0xf0]  ;;  %v7618_v54 = vor.u32 %v8066_v18, %v7617_v14  ;;  %v7561_v24 = vld [vmem:[#allocation24 + $0x328] sm:$0xf] }
 0xabf   : > { %5266 = vmatpush.bf16.msrb.mxu2 %v7482_v25  ;;  %v7625_v25 = vld [vmem:[#allocation24 + $0x3a8] sm:$0xf]  ;;  %v7622_v48 = vor.u32 %v8058_v42, %v7619_v22  ;;  %v7555_v51 = vld [vmem:[#allocation24 + $0x360] sm:$0xf0]  ;;  %v8043_v39 = vld [vmem:[#allocation24 + $0x32c] sm:$0xf] }
 0xac0   : > { %5280 = vmatpush.bf16.msrb.mxu3 %v7486_v56  ;;  %v8059_v56 = vld [vmem:[#allocation24 + $0x3ac] sm:$0xf]  ;;  %v7626_v1 = vor.u32 %v8067_v26, %v7625_v25  ;;  %v7491_v35 = vld [vmem:[#allocation24 + $0x2e0] sm:$0xf0]  ;;  %v7497_v53 = vld [vmem:[#allocation24 + $0x2a8] sm:$0xf] }
 0xac1   : > { %v7630_v38 = vor.u32 %v8059_v56, %v7627_v62  ;;  %v7563_v45 = vld [vmem:[#allocation24 + $0x368] sm:$0xf0]  ;;  %v7427_v2 = vld [vmem:[#allocation24 + $0x260] sm:$0xf0]  ;;  %v7433_v4 = vld [vmem:[#allocation24 + $0x228] sm:$0xf] }
 0xac2   : > { %5239 = vmatpush.bf16.msrb.mxu0 %v7410_v32  ;;  %5253 = vmatpush.bf16.msrb.mxu1 %v7414_v31  ;;  %v7553_v32 = vld [vmem:[#allocation24 + $0x320] sm:$0xf]  ;;  %v7566_v50 = vor.u32 %v8043_v39, %v7563_v45  ;;  %v8027_v3 = vld [vmem:[#allocation24 + $0x2ac] sm:$0xf]  ;;  %v7994_v11 = vld [vmem:[#allocation24 + $0x1a4] sm:$0xf] }
 0xac3   : > { %5267 = vmatpush.bf16.msrb.mxu2 %v7418_v37  ;;  %v8050_v31 = vld [vmem:[#allocation24 + $0x35c] sm:$0xf0]  ;;  %v8042_v37 = vld [vmem:[#allocation24 + $0x324] sm:$0xf]  ;;  %v7499_v55 = vld [vmem:[#allocation24 + $0x2e8] sm:$0xf0] }
 0xac4   : > { %5281 = vmatpush.bf16.msrb.mxu3 %v7422_v44  ;;  %v8051_v44 = vld [vmem:[#allocation24 + $0x364] sm:$0xf0]  ;;  %v7554_v46 = vor.u32 %v8050_v31, %v7553_v32  ;;  %v7558_v17 = vor.u32 %v8042_v37, %v7555_v51  ;;  %v7502_v34 = vor.u32 %v8027_v3, %v7499_v55  ;;  %v8011_v5 = vld [vmem:[#allocation24 + $0x22c] sm:$0xf]  ;;  %v8002_v60 = vld [vmem:[#allocation24 + $0x1dc] sm:$0xf0] }
 0xac5   : > { %v7562_v47 = vor.u32 %v8051_v44, %v7561_v24  ;;  %v7435_v52 = vld [vmem:[#allocation24 + $0x268] sm:$0xf0]  ;;  %v7369_v40 = vld [vmem:[#allocation24 + $0x1a8] sm:$0xf]  ;;  %v7297_v14 = vld [vmem:[#allocation24 + $0x120] sm:$0xf] }
 0xac6   : > { %5240 = vmatpush.bf16.msrb.mxu0 %v7346_v49  ;;  %5254 = vmatpush.bf16.msrb.mxu1 %v7350_v27  ;;  %v7489_v49 = vld [vmem:[#allocation24 + $0x2a0] sm:$0xf]  ;;  %v8003_v15 = vld [vmem:[#allocation24 + $0x1e4] sm:$0xf0]  ;;  %v7995_v16 = vld [vmem:[#allocation24 + $0x1ac] sm:$0xf] }
 0xac7   : > { %5268 = vmatpush.bf16.msrb.mxu2 %v7354_v30  ;;  %v8034_v27 = vld [vmem:[#allocation24 + $0x2dc] sm:$0xf0]  ;;  %v8026_v30 = vld [vmem:[#allocation24 + $0x2a4] sm:$0xf]  ;;  %v7370_v23 = vor.u32 %v8003_v15, %v7369_v40  ;;  %v7305_v25 = vld [vmem:[#allocation24 + $0x128] sm:$0xf] }
 0xac8   : > { %5282 = vmatpush.bf16.msrb.mxu3 %v7358_v43  ;;  %v8035_v43 = vld [vmem:[#allocation24 + $0x2e4] sm:$0xf0]  ;;  %v7490_v57 = vor.u32 %v8034_v27, %v7489_v49  ;;  %v7494_v58 = vor.u32 %v8026_v30, %v7491_v35  ;;  %v7986_v18 = vld [vmem:[#allocation24 + $0x15c] sm:$0xf0]  ;;  %v7978_v42 = vld [vmem:[#allocation24 + $0x124] sm:$0xf] }
 0xac9   : > { %v7498_v59 = vor.u32 %v8035_v43, %v7497_v53  ;;  %v7299_v22 = vld [vmem:[#allocation24 + $0x160] sm:$0xf0]  ;;  %v7987_v26 = vld [vmem:[#allocation24 + $0x164] sm:$0xf0]  ;;  %v7298_v56 = vor.u32 %v7986_v18, %v7297_v14  ;;  %v7963_v51 = vld [vmem:[#allocation24 + $0xac] sm:$0xf] }
 0xaca   : > { %5241 = vmatpush.bf16.msrb.mxu0 %v7282_v20  ;;  %5255 = vmatpush.bf16.msrb.mxu1 %v7286_v61  ;;  %v7425_v20 = vld [vmem:[#allocation24 + $0x220] sm:$0xf]  ;;  %v7302_v62 = vor.u32 %v7978_v42, %v7299_v22  ;;  %v7235_v31 = vld [vmem:[#allocation24 + $0xe0] sm:$0xf0]  ;;  %v7241_v37 = vld [vmem:[#allocation24 + $0xa8] sm:$0xf] }
 0xacb   : > { %5269 = vmatpush.bf16.msrb.mxu2 %v7290_v63  ;;  %v8018_v61 = vld [vmem:[#allocation24 + $0x25c] sm:$0xf0]  ;;  %v8010_v63 = vld [vmem:[#allocation24 + $0x224] sm:$0xf]  ;;  %v7243_v24 = vld [vmem:[#allocation24 + $0xe8] sm:$0xf0] }
 0xacc   : > { %5283 = vmatpush.bf16.msrb.mxu3 %v7294_v0  ;;  %v8019_v0 = vld [vmem:[#allocation24 + $0x264] sm:$0xf0]  ;;  %v7426_v7 = vor.u32 %v8018_v61, %v7425_v20  ;;  %v7430_v6 = vor.u32 %v8010_v63, %v7427_v2  ;;  %v7169_v39 = vld [vmem:[#allocation24 + $0x20] sm:$0xf]  ;;  %v7171_v49 = vld [vmem:[#allocation24 + $0x60] sm:$0xf0]  ;;  %v7246_v30 = vor.u32 %v7963_v51, %v7243_v24 }
 0xacd   : > { %v7434_v8 = vor.u32 %v8019_v0, %v7433_v4  ;;  %v7954_v45 = vld [vmem:[#allocation24 + $0x5c] sm:$0xf0]  ;;  %v7177_v27 = vld [vmem:[#allocation24 + $0x28] sm:$0xf]  ;;  %v7947_v35 = vld [vmem:[#allocation24 + $0x2c] sm:$0xf] }
 0xace   : > { %5242 = vmatpush.bf16.msrb.mxu0 %v7218_v9  ;;  %5256 = vmatpush.bf16.msrb.mxu1 %v7222_v41  ;;  %v7361_v9 = vld [vmem:[#allocation24 + $0x1a0] sm:$0xf]  ;;  %v7438_v41 = vor.u32 %v8011_v5, %v7435_v52  ;;  %v7179_v53 = vld [vmem:[#allocation24 + $0x68] sm:$0xf0]  ;;  %v7633_v43 = vld [vmem:[#allocation24 + $0x3b0] sm:$0xf] }
 0xacf   : > { %5270 = vmatpush.bf16.msrb.mxu2 %v7226_v12  ;;  %v7363_v12 = vld [vmem:[#allocation24 + $0x1e0] sm:$0xf0]  ;;  %v7362_v36 = vor.u32 %v8002_v60, %v7361_v9  ;;  %v8068_v3 = vld [vmem:[#allocation24 + $0x3ec] sm:$0xf0]  ;;  %v8060_v55 = vld [vmem:[#allocation24 + $0x3b4] sm:$0xf]  ;;  %v7182_v4 = vor.u32 %v7947_v35, %v7179_v53 }
 0xad0   : > { %5284 = vmatpush.bf16.msrb.mxu3 %v7230_v13  ;;  %v7371_v13 = vld [vmem:[#allocation24 + $0x1e8] sm:$0xf0]  ;;  %v7366_v21 = vor.u32 %v7994_v11, %v7363_v12  ;;  %v8069_v20 = vld [vmem:[#allocation24 + $0x3f4] sm:$0xf0]  ;;  %v7643_v2 = vld [vmem:[#allocation24 + $0x3f8] sm:$0xf0]  ;;  %v7634_v0 = vor.u32 %v8068_v3, %v7633_v43 }
 0xad1   : > { %v7571_v60 = vld [vmem:[#allocation24 + $0x370] sm:$0xf0]  ;;  %v7577_v11 = vld [vmem:[#allocation24 + $0x338] sm:$0xf]  ;;  %v8045_v12 = vld [vmem:[#allocation24 + $0x33c] sm:$0xf] }
 0xad2   : > { %5243 = vmatpush.bf16.msrb.mxu0 %v7154_v19  ;;  %5257 = vmatpush.bf16.msrb.mxu1 %v7158_v28  ;;  %v7374_v19 = vor.u32 %v7995_v16, %v7371_v13  ;;  %v7979_v28 = vld [vmem:[#allocation24 + $0x12c] sm:$0xf]  ;;  %v7579_v40 = vld [vmem:[#allocation24 + $0x378] sm:$0xf0]  ;;  %v7507_v18 = vld [vmem:[#allocation24 + $0x2f0] sm:$0xf0] }
 0xad3   : > { %5271 = vmatpush.bf16.msrb.mxu2 %v7162_v29  ;;  %v7307_v29 = vld [vmem:[#allocation24 + $0x168] sm:$0xf0]  ;;  %v7582_v14 = vor.u32 %v8045_v12, %v7579_v40  ;;  %v7513_v42 = vld [vmem:[#allocation24 + $0x2b8] sm:$0xf]  ;;  %v8029_v22 = vld [vmem:[#allocation24 + $0x2bc] sm:$0xf] }
 0xad4   : > { %5285 = vmatpush.bf16.msrb.mxu3 %v7166_v33  ;;  %v7306_v33 = vor.u32 %v7987_v26, %v7305_v25  ;;  %v7310_v32 = vor.u32 %v7979_v28, %v7307_v29  ;;  %v7515_v25 = vld [vmem:[#allocation24 + $0x2f8] sm:$0xf0]  ;;  %v7313_v43 = vld [vmem:[#allocation24 + $0x130] sm:$0xf] }
 0xad5   : > { %5244 = vmatmul.bf16.vlgmr.msrb.gmra.mxu0 %v10184_v10  ;;  %5258 = vmatmul.bf16.vlgmr.msrb.gmra.mxu1 %v10184_v10  ;;  %v7988_v3 = vld [vmem:[#allocation24 + $0x16c] sm:$0xf0] }
 0xad6   : > { %5292 = vmatpush.bf16.msra.mxu0 %v7618_v54  ;;  %5306 = vmatpush.bf16.msra.mxu1 %v7622_v48  ;;  %v7233_v54 = vld [vmem:[#allocation24 + $0xa0] sm:$0xf] }
 0xad7   : > { %5320 = vmatpush.bf16.msra.mxu2 %v7626_v1  ;;  %5286 = vmatmul.bf16.vlgmr.msrb.gmra.mxu3 %v10184_v10  ;;  %v7970_v48 = vld [vmem:[#allocation24 + $0xdc] sm:$0xf0]  ;;  %v7962_v1 = vld [vmem:[#allocation24 + $0xa4] sm:$0xf] }
 0xad8   : > { %5334 = vmatpush.bf16.msra.mxu3 %v7630_v38  ;;  %5272 = vmatmul.bf16.vlgmr.msrb.gmra.mxu2 %v10184_v10  ;;  %v7971_v38 = vld [vmem:[#allocation24 + $0xe4] sm:$0xf0]  ;;  %v7234_v44 = vor.u32 %v7970_v48, %v7233_v54  ;;  %v7518_v54 = vor.u32 %v8029_v22, %v7515_v25  ;;  %v7443_v48 = vld [vmem:[#allocation24 + $0x270] sm:$0xf0] }
 0xada   : > { %5293 = vmatpush.bf16.msra.mxu0 %v7554_v46  ;;  %5307 = vmatpush.bf16.msra.mxu1 %v7558_v17  ;;  %v7238_v46 = vor.u32 %v7962_v1, %v7235_v31  ;;  %v7242_v17 = vor.u32 %v7971_v38, %v7241_v37  ;;  %v7449_v1 = vld [vmem:[#allocation24 + $0x238] sm:$0xf]  ;;  %v8013_v31 = vld [vmem:[#allocation24 + $0x23c] sm:$0xf] }
 0xadb   : > { %5321 = vmatpush.bf16.msra.mxu2 %v7562_v47  ;;  %v7946_v47 = vld [vmem:[#allocation24 + $0x24] sm:$0xf]  ;;  %v7451_v37 = vld [vmem:[#allocation24 + $0x278] sm:$0xf0] }
 0xadc   : > { %5335 = vmatpush.bf16.msra.mxu3 %v7566_v50  ;;  %v7955_v50 = vld [vmem:[#allocation24 + $0x64] sm:$0xf0]  ;;  %v7174_v61 = vor.u32 %v7946_v47, %v7171_v49  ;;  %v7385_v47 = vld [vmem:[#allocation24 + $0x1b8] sm:$0xf] }
 0xadd   : > { %v7178_v63 = vor.u32 %v7955_v50, %v7177_v27  ;;  %v8005_v49 = vld [vmem:[#allocation24 + $0x1f4] sm:$0xf0]  ;;  %v7997_v27 = vld [vmem:[#allocation24 + $0x1bc] sm:$0xf] }
 0xade   : > { %5294 = vmatpush.bf16.msra.mxu0 %v7490_v57  ;;  %5308 = vmatpush.bf16.msra.mxu1 %v7494_v58  ;;  %v7170_v57 = vor.u32 %v7954_v45, %v7169_v39  ;;  %v7635_v58 = vld [vmem:[#allocation24 + $0x3f0] sm:$0xf0]  ;;  %v8004_v39 = vld [vmem:[#allocation24 + $0x1ec] sm:$0xf0]  ;;  %v7386_v53 = vor.u32 %v8005_v49, %v7385_v47 }
 0xadf   : > { %5322 = vmatpush.bf16.msra.mxu2 %v7498_v59  ;;  %v7641_v59 = vld [vmem:[#allocation24 + $0x3b8] sm:$0xf]  ;;  %v7638_v5 = vor.u32 %v8060_v55, %v7635_v58  ;;  %v7996_v45 = vld [vmem:[#allocation24 + $0x1b4] sm:$0xf] }
 0xae0   : > { %5336 = vmatpush.bf16.msra.mxu3 %v7502_v34  ;;  %v8061_v34 = vld [vmem:[#allocation24 + $0x3bc] sm:$0xf]  ;;  %v7642_v52 = vor.u32 %v8069_v20, %v7641_v59  ;;  %v7980_v55 = vld [vmem:[#allocation24 + $0x134] sm:$0xf]  ;;  %v7321_v59 = vld [vmem:[#allocation24 + $0x138] sm:$0xf] }
 0xae1   : > { %v7646_v9 = vor.u32 %v8061_v34, %v7643_v2  ;;  %v7315_v58 = vld [vmem:[#allocation24 + $0x170] sm:$0xf0]  ;;  %v7989_v20 = vld [vmem:[#allocation24 + $0x174] sm:$0xf0]  ;;  %v7314_v34 = vor.u32 %v7988_v3, %v7313_v43 }
 0xae2   : > { %5295 = vmatpush.bf16.msra.mxu0 %v7426_v7  ;;  %5309 = vmatpush.bf16.msra.mxu1 %v7430_v6  ;;  %v7569_v7 = vld [vmem:[#allocation24 + $0x330] sm:$0xf]  ;;  %v7318_v2 = vor.u32 %v7980_v55, %v7315_v58 }
 0xae3   : > { %5323 = vmatpush.bf16.msra.mxu2 %v7434_v8  ;;  %v8052_v6 = vld [vmem:[#allocation24 + $0x36c] sm:$0xf0]  ;;  %v8044_v8 = vld [vmem:[#allocation24 + $0x334] sm:$0xf] }
 0xae4   : > { %5337 = vmatpush.bf16.msra.mxu3 %v7438_v41  ;;  %v8053_v41 = vld [vmem:[#allocation24 + $0x374] sm:$0xf0]  ;;  %v7570_v15 = vor.u32 %v8052_v6, %v7569_v7  ;;  %v7574_v16 = vor.u32 %v8044_v8, %v7571_v60  ;;  %v7251_v6 = vld [vmem:[#allocation24 + $0xf0] sm:$0xf0]  ;;  %v7965_v60 = vld [vmem:[#allocation24 + $0xbc] sm:$0xf] }
 0xae5   : > { %v7578_v13 = vor.u32 %v8053_v41, %v7577_v11  ;;  %v7257_v8 = vld [vmem:[#allocation24 + $0xb8] sm:$0xf]  ;;  %v7259_v11 = vld [vmem:[#allocation24 + $0xf8] sm:$0xf0] }
 0xae6   : > { %5296 = vmatpush.bf16.msra.mxu0 %v7362_v36  ;;  %5310 = vmatpush.bf16.msra.mxu1 %v7366_v21  ;;  %v7505_v36 = vld [vmem:[#allocation24 + $0x2b0] sm:$0xf] }
 0xae7   : > { %5324 = vmatpush.bf16.msra.mxu2 %v7370_v23  ;;  %v8036_v21 = vld [vmem:[#allocation24 + $0x2ec] sm:$0xf0]  ;;  %v8028_v23 = vld [vmem:[#allocation24 + $0x2b4] sm:$0xf] }
 0xae8   : > { %5338 = vmatpush.bf16.msra.mxu3 %v7374_v19  ;;  %v8037_v19 = vld [vmem:[#allocation24 + $0x2f4] sm:$0xf0]  ;;  %v7506_v26 = vor.u32 %v8036_v21, %v7505_v36  ;;  %v7510_v28 = vor.u32 %v8028_v23, %v7507_v18  ;;  %v7262_v36 = vor.u32 %v7965_v60, %v7259_v11  ;;  %v7187_v21 = vld [vmem:[#allocation24 + $0x70] sm:$0xf0]  ;;  %v7949_v18 = vld [vmem:[#allocation24 + $0x3c] sm:$0xf] }
 0xae9   : > { %v7514_v29 = vor.u32 %v8037_v19, %v7513_v42  ;;  %v7193_v23 = vld [vmem:[#allocation24 + $0x38] sm:$0xf]  ;;  %v7195_v42 = vld [vmem:[#allocation24 + $0x78] sm:$0xf0] }
 0xaea   : > { %5297 = vmatpush.bf16.msra.mxu0 %v7298_v56  ;;  %5311 = vmatpush.bf16.msra.mxu1 %v7302_v62  ;;  %v7441_v56 = vld [vmem:[#allocation24 + $0x230] sm:$0xf] }
 0xaeb   : > { %5325 = vmatpush.bf16.msra.mxu2 %v7306_v33  ;;  %v8020_v62 = vld [vmem:[#allocation24 + $0x26c] sm:$0xf0]  ;;  %v8012_v33 = vld [vmem:[#allocation24 + $0x234] sm:$0xf] }
 0xaec   : > { %5339 = vmatpush.bf16.msra.mxu3 %v7310_v32  ;;  %v8021_v32 = vld [vmem:[#allocation24 + $0x274] sm:$0xf0]  ;;  %v7442_v38 = vor.u32 %v8020_v62, %v7441_v56  ;;  %v7446_v51 = vor.u32 %v8012_v33, %v7443_v48 }
 0xaed   : > { %v7450_v24 = vor.u32 %v8021_v32, %v7449_v1 }
 0xaee   : > { %5298 = vmatpush.bf16.msra.mxu0 %v7234_v44  ;;  %5312 = vmatpush.bf16.msra.mxu1 %v7238_v46  ;;  %v7377_v44 = vld [vmem:[#allocation24 + $0x1b0] sm:$0xf]  ;;  %v7454_v46 = vor.u32 %v8013_v31, %v7451_v37 }
 0xaef   : > { %5326 = vmatpush.bf16.msra.mxu2 %v7242_v17  ;;  %v7379_v17 = vld [vmem:[#allocation24 + $0x1f0] sm:$0xf0]  ;;  %v7378_v50 = vor.u32 %v8004_v39, %v7377_v44 }
 0xaf0   : > { %5340 = vmatpush.bf16.msra.mxu3 %v7246_v30  ;;  %v7387_v30 = vld [vmem:[#allocation24 + $0x1f8] sm:$0xf0]  ;;  %v7382_v35 = vor.u32 %v7996_v45, %v7379_v17 }
 0xaf2   : > { %5299 = vmatpush.bf16.msra.mxu0 %v7170_v57  ;;  %5313 = vmatpush.bf16.msra.mxu1 %v7174_v61  ;;  %v7390_v57 = vor.u32 %v7997_v27, %v7387_v30  ;;  %v7981_v61 = vld [vmem:[#allocation24 + $0x13c] sm:$0xf] }
 0xaf3   : > { %5327 = vmatpush.bf16.msra.mxu2 %v7178_v63  ;;  %v7323_v63 = vld [vmem:[#allocation24 + $0x178] sm:$0xf0] }
 0xaf4   : > { %5341 = vmatpush.bf16.msra.mxu3 %v7182_v4  ;;  %v7322_v4 = vor.u32 %v7989_v20, %v7321_v59  ;;  %v7326_v7 = vor.u32 %v7981_v61, %v7323_v63  ;;  %v10210_v59 = vld [vmem:[#allocation26 + $0x8] sm:$0xff] }
 0xaf5   : > { %5300 = vmatmul.bf16.vlgmr.msra.gmra.mxu0 %v10184_v10  ;;  %5314 = vmatmul.bf16.vlgmr.msra.gmra.mxu1 %v10184_v10  ;;  %v4519_v11 = vperm.slane %v10210_v59, 3 }
 0xaf6   : > { %5348 = vmatpush.bf16.msrb.mxu0 %v7634_v0  ;;  %5362 = vmatpush.bf16.msrb.mxu1 %v7638_v5  ;;  %v7249_v0 = vld [vmem:[#allocation24 + $0xb0] sm:$0xf] }
 0xaf7   : > { %5376 = vmatpush.bf16.msrb.mxu2 %v7642_v52  ;;  %5342 = vmatmul.bf16.vlgmr.msra.gmra.mxu3 %v10184_v10  ;;  %v7972_v5 = vld [vmem:[#allocation24 + $0xec] sm:$0xf0]  ;;  %v7964_v52 = vld [vmem:[#allocation24 + $0xb4] sm:$0xf] }
 0xaf8   : > { %5390 = vmatpush.bf16.msrb.mxu3 %v7646_v9  ;;  %5328 = vmatmul.bf16.vlgmr.msra.gmra.mxu2 %v10184_v10  ;;  %v7973_v9 = vld [vmem:[#allocation24 + $0xf4] sm:$0xf0]  ;;  %v7250_v41 = vor.u32 %v7972_v5, %v7249_v0  ;;  %v7254_v12 = vor.u32 %v7964_v52, %v7251_v6  ;;  %v4516_v5 = vperm.slane %v10210_v59, 0  ;;  %v4517_v52 = vperm.slane %v10210_v59, 1 }
 0xaf9   : > { %v7258_v40 = vor.u32 %v7973_v9, %v7257_v8  ;;  %v4518_v8 = vperm.slane %v10210_v59, 2 }
 0xafa   : > { %5349 = vmatpush.bf16.msrb.mxu0 %v7570_v15  ;;  %5363 = vmatpush.bf16.msrb.mxu1 %v7574_v16  ;;  %v7185_v15 = vld [vmem:[#allocation24 + $0x30] sm:$0xf] }
 0xafb   : > { %5377 = vmatpush.bf16.msrb.mxu2 %v7578_v13  ;;  %v7956_v16 = vld [vmem:[#allocation24 + $0x6c] sm:$0xf0]  ;;  %v7948_v13 = vld [vmem:[#allocation24 + $0x34] sm:$0xf] }
 0xafc   : > { %5391 = vmatpush.bf16.msrb.mxu3 %v7582_v14  ;;  %v7957_v14 = vld [vmem:[#allocation24 + $0x74] sm:$0xf0]  ;;  %v7186_v19 = vor.u32 %v7956_v16, %v7185_v15  ;;  %v7190_v22 = vor.u32 %v7948_v13, %v7187_v21  ;;  %v4520_v15 = vperm.slane %v10210_v59, 4 }
 0xafd   : > { %v7194_v25 = vor.u32 %v7957_v14, %v7193_v23 }
 0xafe   : > { %5350 = vmatpush.bf16.msrb.mxu0 %v7506_v26  ;;  %5364 = vmatpush.bf16.msrb.mxu1 %v7510_v28  ;;  %v7198_v26 = vor.u32 %v7949_v18, %v7195_v42 }
 0xaff   : > { %5378 = vmatpush.bf16.msrb.mxu2 %v7514_v29 }
 0xb00   : > { %5392 = vmatpush.bf16.msrb.mxu3 %v7518_v54 }
 0xb02   : > { %5351 = vmatpush.bf16.msrb.mxu0 %v7442_v38  ;;  %5365 = vmatpush.bf16.msrb.mxu1 %v7446_v51 }
 0xb03   : > { %5379 = vmatpush.bf16.msrb.mxu2 %v7450_v24 }
 0xb04   : > { %5393 = vmatpush.bf16.msrb.mxu3 %v7454_v46  ;;  %v4504_v46 = vld [vmem:[#allocation26] sm:$0xff] }
 0xb05   : > { %v4510_v47 = vperm.slane %v4504_v46, 2  ;;  %v4509_v49 = vperm.slane %v4504_v46, 1  ;;  %v4511_v27 = vperm.slane %v4504_v46, 3  ;;  %v4515_v0 = vperm.slane %v4504_v46, 7 }
 0xb06   : > { %5352 = vmatpush.bf16.msrb.mxu0 %v7378_v50  ;;  %5366 = vmatpush.bf16.msrb.mxu1 %v7382_v35 }
 0xb07   : > { %5380 = vmatpush.bf16.msrb.mxu2 %v7386_v53  ;;  %v4512_v53 = vperm.slane %v4504_v46, 4 }
 0xb08   : > { %5394 = vmatpush.bf16.msrb.mxu3 %v7390_v57  ;;  %v4513_v57 = vperm.slane %v4504_v46, 5 }
 0xb0a   : > { %5353 = vmatpush.bf16.msrb.mxu0 %v7314_v34  ;;  %5367 = vmatpush.bf16.msrb.mxu1 %v7318_v2  ;;  %v4514_v34 = vperm.slane %v4504_v46, 6 }
 0xb0b   : > { %5381 = vmatpush.bf16.msrb.mxu2 %v7322_v4 }
 0xb0c   : > { %5395 = vmatpush.bf16.msrb.mxu3 %v7326_v7 }
 0xb0e   : > { %5354 = vmatpush.bf16.msrb.mxu0 %v7250_v41  ;;  %5368 = vmatpush.bf16.msrb.mxu1 %v7254_v12 }
 0xb0f   : > { %5382 = vmatpush.bf16.msrb.mxu2 %v7258_v40 }
 0xb10   : > { %5396 = vmatpush.bf16.msrb.mxu3 %v7262_v36  ;;  %v4521_v36 = vperm.slane %v10210_v59, 5 }
 0xb12   : > { %5355 = vmatpush.bf16.msrb.mxu0 %v7186_v19  ;;  %5369 = vmatpush.bf16.msrb.mxu1 %v7190_v22 }
 0xb13   : > { %5383 = vmatpush.bf16.msrb.mxu2 %v7194_v25 }
 0xb14   : > { %5397 = vmatpush.bf16.msrb.mxu3 %v7198_v26 }
 0xb15   : > { %5356 = vmatmul.bf16.vlgmr.msrb.gmra.mxu0 %v10184_v10  ;;  %5370 = vmatmul.bf16.vlgmr.msrb.gmra.mxu1 %v10184_v10 }
 0xb16   : > { %5384 = vmatmul.bf16.vlgmr.msrb.gmra.mxu2 %v10184_v10 }
 0xb17   : > { %5398 = vmatmul.bf16.vlgmr.msrb.gmra.mxu3 %v10184_v10  ;;  %v4508_v10 = vperm.slane %v4504_v46, 0 }
 0xb32   : > { %v5189_v28 = vpop.f32.mrf.mxu0  ;;  %v5203_v29 = vpop.f32.mrf.mxu1 }
 0xb33   : > { %v10202_v50 = vadd.f32 %v5189_v28, %v4508_v10  ;;  %v10206_v3 = vadd.f32 %v5203_v29, %v4509_v49 }
 0xb3a   : > { %v5231_v62 = vpop.f32.mrf.mxu3  ;;  %v5191_v33 = vpop.f32.mrf.mxu0 }
 0xb3b   : > { %v5217_v56 = vpop.f32.mrf.mxu2  ;;  %v5205_v54 = vpop.f32.mrf.mxu1  ;;  %v10208_v55 = vadd.f32 %v5231_v62, %v4511_v27  ;;  %v10236_v23 = vadd.f32 %v5191_v33, %v4508_v10  ;;  %v4522_v62 = vperm.slane %v10210_v59, 6 }
 0xb3c   : > { %v10204_v35 = vadd.f32 %v5217_v56, %v4510_v47  ;;  %v10243_v19 = vadd.f32 %v5205_v54, %v4509_v49 }
 0xb3d   : > { %v5405_v2 = vmax.f32 %v10206_v3, %v10208_v55 }
 0xb3e   : > { %v5404_v61 = vmax.f32 %v10202_v50, %v10204_v35 }
 0xb42   : > { %v5233_v1 = vpop.f32.mrf.mxu3 }
 0xb43   : > { %v5219_v48 = vpop.f32.mrf.mxu2  ;;  %v10245_v22 = vadd.f32 %v5233_v1, %v4511_v27  ;;  %v4523_v1 = vperm.slane %v10210_v59, 7 }
 0xb44   : > { %v10238_v14 = vadd.f32 %v5219_v48, %v4510_v47 }
 0xb52   : > { %v5245_v32 = vpop.f32.mrf.mxu0  ;;  %v5259_v31 = vpop.f32.mrf.mxu1 }
 0xb53   : > { %v10214_v63 = vadd.f32 %v5245_v32, %v4512_v53  ;;  %v10218_v4 = vadd.f32 %v5259_v31, %v4513_v57  ;;  %v5421_v32 = vmax.f32 %v10236_v23, %v10238_v14 }
 0xb55   : > { %v5406_v7 = vmax.f32 %v5404_v61, %v10214_v63  ;;  %v5407_v9 = vmax.f32 %v5405_v2, %v10218_v4 }
 0xb5a   : > { %v5287_v38 = vpop.f32.mrf.mxu3  ;;  %v5247_v51 = vpop.f32.mrf.mxu0 }
 0xb5b   : > { %v5273_v37 = vpop.f32.mrf.mxu2  ;;  %v5261_v24 = vpop.f32.mrf.mxu1  ;;  %v10227_v60 = vadd.f32 %v5287_v38, %v4515_v0  ;;  %v10250_v28 = vadd.f32 %v5247_v51, %v4512_v53  ;;  %v5422_v38 = vmax.f32 %v10243_v19, %v10245_v22 }
 0xb5c   : > { %v10223_v6 = vadd.f32 %v5273_v37, %v4514_v34  ;;  %v10256_v33 = vadd.f32 %v5261_v24, %v4513_v57 }
 0xb5d   : > { %v5409_v25 = vmax.f32 %v5407_v9, %v10227_v60  ;;  %v5423_v46 = vmax.f32 %v5421_v32, %v10250_v28 }
 0xb5e   : > { %v5408_v18 = vmax.f32 %v5406_v7, %v10223_v6  ;;  %v5424_v49 = vmax.f32 %v5422_v38, %v10256_v33 }
 0xb62   : > { %v5289_v39 = vpop.f32.mrf.mxu3 }
 0xb63   : > { %v5275_v44 = vpop.f32.mrf.mxu2  ;;  %v10269_v51 = vadd.f32 %v5289_v39, %v4515_v0 }
 0xb64   : > { %v10264_v31 = vadd.f32 %v5275_v44, %v4514_v34 }
 0xb65   : > { %v5426_v61 = vmax.f32 %v5424_v49, %v10269_v51 }
 0xb72   : > { %v5301_v45 = vpop.f32.mrf.mxu0  ;;  %v5315_v17 = vpop.f32.mrf.mxu1 }
 0xb73   : > { %v10230_v12 = vadd.f32 %v5301_v45, %v4516_v5  ;;  %v10233_v13 = vadd.f32 %v5315_v17, %v4517_v52 }
 0xb75   : > { %v5410_v29 = vmax.f32 %v5408_v18, %v10230_v12  ;;  %v5411_v48 = vmax.f32 %v5409_v25, %v10233_v13 }
 0xb7a   : > { %v5343_v43 = vpop.f32.mrf.mxu3  ;;  %v5303_v58 = vpop.f32.mrf.mxu0 }
 0xb7b   : > { %v5329_v30 = vpop.f32.mrf.mxu2  ;;  %v5317_v20 = vpop.f32.mrf.mxu1  ;;  %v10248_v26 = vadd.f32 %v5343_v43, %v4519_v11  ;;  %v10273_v17 = vadd.f32 %v5303_v58, %v4516_v5  ;;  %v5425_v43 = vmax.f32 %v5423_v46, %v10264_v31 }
 0xb7c   : > { %v10241_v42 = vadd.f32 %v5329_v30, %v4518_v8  ;;  %v10279_v27 = vadd.f32 %v5317_v20, %v4517_v52 }
 0xb7d   : > { %v5413_v24 = vmax.f32 %v5411_v48, %v10248_v26  ;;  %v5427_v20 = vmax.f32 %v5425_v43, %v10273_v17 }
 0xb7e   : > { %v5412_v37 = vmax.f32 %v5410_v29, %v10241_v42  ;;  %v5428_v5 = vmax.f32 %v5426_v61, %v10279_v27 }
 0xb82   : > { %v5345_v40 = vpop.f32.mrf.mxu3 }
 0xb83   : > { %v5331_v41 = vpop.f32.mrf.mxu2  ;;  %v10289_v34 = vadd.f32 %v5345_v40, %v4519_v11 }
 0xb84   : > { %v10285_v57 = vadd.f32 %v5331_v41, %v4518_v8 }
 0xb85   : > { %v5430_v9 = vmax.f32 %v5428_v5, %v10289_v34 }
 0xb86   : > { %v5429_v8 = vmax.f32 %v5427_v20, %v10285_v57 }
 0xb92   : > { %v5357_v16 = vpop.f32.mrf.mxu0  ;;  %v5371_v21 = vpop.f32.mrf.mxu1 }
 0xb93   : > { %v10253_v56 = vadd.f32 %v5357_v16, %v4520_v15  ;;  %v10259_v54 = vadd.f32 %v5371_v21, %v4521_v36 }
 0xb95   : > { %v5414_v10 = vmax.f32 %v5412_v37, %v10253_v56  ;;  %v5415_v30 = vmax.f32 %v5413_v24, %v10259_v54 }
 0xb99   : > { %v5385_v45 = vpop.f32.mrf.mxu2 }
 0xb9a   : > { %v10276_v47 = vadd.f32 %v5385_v45, %v4522_v62  ;;  %v5399_v44 = vpop.f32.mrf.mxu3  ;;  %v5359_v53 = vpop.f32.mrf.mxu0 }
 0xb9b   : > { %v10282_v39 = vadd.f32 %v5399_v44, %v4523_v1  ;;  %v5373_v58 = vpop.f32.mrf.mxu1  ;;  %v10293_v0 = vadd.f32 %v5359_v53, %v4520_v15 }
 0xb9c   : > { %v5416_v59 = vmax.f32 %v5414_v10, %v10276_v47  ;;  %v10296_v52 = vadd.f32 %v5373_v58, %v4521_v36 }
 0xb9d   : > { %v5417_v2 = vmax.f32 %v5415_v30, %v10282_v39  ;;  %v5431_v11 = vmax.f32 %v5429_v8, %v10293_v0 }
 0xb9e   : > { %v5432_v21 = vmax.f32 %v5430_v9, %v10296_v52 }
 0xb9f   : > { %v5418_v7 = vmax.f32 %v5416_v59, %v5417_v2 }
 0xba1   : > { %5419 = vmax.xlane.f32.xlu0 %v5418_v7  ;;  %v5387_v41 = vpop.f32.mrf.mxu2 }
 0xba2   : > { %v10301_v40 = vadd.f32 %v5387_v41, %v4522_v62  ;;  %v5401_v16 = vpop.f32.mrf.mxu3 }
 0xba3   : > { %v10304_v15 = vadd.f32 %v5401_v16, %v4523_v1 }
 0xba4   : > { %v5433_v18 = vmax.f32 %v5431_v11, %v10301_v40 }
 0xba5   : > { %v5434_v36 = vmax.f32 %v5432_v21, %v10304_v15 }
 0xba7   : > { %v5435_v25 = vmax.f32 %v5433_v18, %v5434_v36 }
 0xba9   : > { %5436 = vmax.xlane.f32.xlu0 %v5435_v25 }
 0xc14   : > { %v10308_v29 = vpop.xlane.xlu0 %5419 }
 0xc15   : > { %v10312_v48 = vsub.f32 %v10202_v50, %v10308_v29  ;;  %v10316_v62 = vsub.f32 %v10206_v3, %v10308_v29  ;;  %v10320_v1 = vsub.f32 %v10204_v35, %v10308_v29  ;;  %v10324_v32 = vsub.f32 %v10208_v55, %v10308_v29 }
 0xc16   : > { %v10330_v50 = vsub.f32 %v10214_v63, %v10308_v29  ;;  %v10335_v3 = vsub.f32 %v10218_v4, %v10308_v29  ;;  %v10340_v55 = vsub.f32 %v10223_v6, %v10308_v29  ;;  %v10347_v63 = vsub.f32 %v10227_v60, %v10308_v29 }
 0xc17   : > { %v5470_v37 = vmul.f32 1.442695, %v10312_v48  ;;  %v5472_v38 = vmul.f32 1.442695, %v10316_v62  ;;  %v5474_v24 = vmul.f32 1.442695, %v10320_v1  ;;  %v10352_v44 = vsub.f32 %v10230_v12, %v10308_v29 }
 0xc18   : > { %v5476_v35 = vmul.f32 1.442695, %v10324_v32  ;;  %v5478_v45 = vmul.f32 1.442695, %v10330_v50  ;;  %v5480_v4 = vmul.f32 1.442695, %v10335_v3  ;;  %v10356_v6 = vsub.f32 %v10233_v13, %v10308_v29 }
 0xc19   : > { %8304 = vpow2.f32 %v5470_v37  ;;  %v5482_v30 = vmul.f32 1.442695, %v10340_v55  ;;  %v5484_v58 = vmul.f32 1.442695, %v10347_v63  ;;  %v10370_v13 = vsub.f32 %v10241_v42, %v10308_v29 }
 0xc1a   : > { %8306 = vpow2.f32 %v5472_v38  ;;  %v5486_v59 = vmul.f32 1.442695, %v10352_v44  ;;  %v10380_v5 = vsub.f32 %v10248_v26, %v10308_v29  ;;  %v10390_v41 = vsub.f32 %v10253_v56, %v10308_v29 }
 0xc1b   : > { %8308 = vpow2.f32 %v5474_v24 }
 0xc1c   : > { %v10343_v46 = vpop.xlane.xlu0 %5436  ;;  %8310 = vpow2.f32 %v5476_v35  ;;  %v5492_v18 = vmul.f32 1.442695, %v10380_v5 }
 0xc1d   : > { %8312 = vpow2.f32 %v5478_v45  ;;  %v10361_v60 = vsub.f32 %v10236_v23, %v10343_v46  ;;  %v10366_v12 = vsub.f32 %v10243_v19, %v10343_v46  ;;  %v5488_v23 = vmul.f32 1.442695, %v10356_v6 }
 0xc1e   : > { %8314 = vpow2.f32 %v5480_v4  ;;  %v10376_v20 = vsub.f32 %v10238_v14, %v10343_v46  ;;  %v10385_v8 = vsub.f32 %v10245_v22, %v10343_v46  ;;  %v5490_v14 = vmul.f32 1.442695, %v10370_v13 }
 0xc1f   : > { %v8305_v10 = vpop.eup %8304  ;;  %8316 = vpow2.f32 %v5482_v30  ;;  %v5502_v7 = vmul.f32 1.442695, %v10361_v60  ;;  %v5504_v9 = vmul.f32 1.442695, %v10366_v12  ;;  %v10395_v16 = vsub.f32 %v10250_v28, %v10343_v46 }
 0xc20   : > { %v8307_v49 = vpop.eup %8306  ;;  %8318 = vpow2.f32 %v5484_v58  ;;  %v5506_v21 = vmul.f32 1.442695, %v10376_v20  ;;  %v10400_v22 = vsub.f32 %v10259_v54, %v10308_v29  ;;  %v10405_v25 = vsub.f32 %v10256_v33, %v10343_v46 }
 0xc21   : > { %v5534_v53 = vadd.f32 %v8307_v49, %v8305_v10  ;;  %v8309_v43 = vpop.eup %8308  ;;  %8320 = vpow2.f32 %v5486_v59  ;;  %v5508_v37 = vmul.f32 1.442695, %v10385_v8  ;;  %v10410_v28 = vsub.f32 %v10276_v47, %v10308_v29 }
 0xc22   : > { %v8311_v2 = vpop.eup %8310  ;;  %8322 = vpow2.f32 %v5488_v23  ;;  %v5494_v54 = vmul.f32 1.442695, %v10390_v41  ;;  %v10415_v35 = vsub.f32 %v10264_v31, %v10343_v46  ;;  %v5510_v33 = vmul.f32 1.442695, %v10395_v16 }
 0xc23   : > { %v5535_v61 = vadd.f32 %v8309_v43, %v5534_v53  ;;  %v8313_v42 = vpop.eup %8312  ;;  %8324 = vpow2.f32 %v5502_v7  ;;  %v10420_v4 = vsub.f32 %v10282_v39, %v10308_v29  ;;  %v5496_v47 = vmul.f32 1.442695, %v10400_v22 }
 0xc24   : > { %v8315_v11 = vpop.eup %8314  ;;  %8326 = vpow2.f32 %v5504_v9  ;;  %v10425_v30 = vsub.f32 %v10269_v51, %v10343_v46  ;;  %v5512_v31 = vmul.f32 1.442695, %v10405_v25  ;;  %v5498_v43 = vmul.f32 1.442695, %v10410_v28 }
 0xc25   : > { %v5536_v19 = vadd.f32 %v8311_v2, %v5535_v61  ;;  %v8317_v36 = vpop.eup %8316  ;;  %8328 = vpow2.f32 %v5490_v14  ;;  %v10431_v39 = vsub.f32 %v10273_v17, %v10343_v46  ;;  %v5514_v29 = vmul.f32 1.442695, %v10415_v35 }
 0xc26   : > { %v8319_v24 = vpop.eup %8318  ;;  %8330 = vpow2.f32 %v5506_v21  ;;  %v5500_v51 = vmul.f32 1.442695, %v10420_v4  ;;  %v10437_v7 = vsub.f32 %v10279_v27, %v10343_v46 }
 0xc27   : > { %v5537_v26 = vadd.f32 %v8313_v42, %v5536_v19  ;;  %v8321_v45 = vpop.eup %8320  ;;  %8332 = vpow2.f32 %v5492_v18  ;;  %v5516_v42 = vmul.f32 1.442695, %v10425_v30  ;;  %v5518_v21 = vmul.f32 1.442695, %v10431_v39 }
 0xc28   : > { %v8323_v49 = vpop.eup %8322  ;;  %8334 = vpow2.f32 %v5508_v37  ;;  %v10447_v37 = vsub.f32 %v10289_v34, %v10343_v46  ;;  %v10457_v34 = vsub.f32 %v10296_v52, %v10343_v46  ;;  %v10467_v52 = vsub.f32 %v10304_v15, %v10343_v46 }
 0xc29   : > { %v5538_v56 = vadd.f32 %v8315_v11, %v5537_v26  ;;  %v8325_v53 = vpop.eup %8324  ;;  %8336 = vpow2.f32 %v5494_v54  ;;  %v10442_v11 = vsub.f32 %v10285_v57, %v10343_v46  ;;  %v5520_v54 = vmul.f32 1.442695, %v10437_v7 }
 0xc2a   : > { %v8327_v59 = vpop.eup %8326  ;;  %8338 = vpow2.f32 %v5510_v33 }
 0xc2b   : > { %v5539_v38 = vadd.f32 %v8317_v36, %v5538_v56  ;;  %v8329_v61 = vpop.eup %8328  ;;  %8340 = vpow2.f32 %v5496_v47  ;;  %v5551_v23 = vadd.f32 %v8327_v59, %v8325_v53  ;;  %v5522_v47 = vmul.f32 1.442695, %v10442_v11 }
 0xc2c   : > { %v8331_v19 = vpop.eup %8330  ;;  %8342 = vpow2.f32 %v5512_v31 }
 0xc2d   : > { %v5540_v10 = vadd.f32 %v8319_v24, %v5539_v38  ;;  %v8333_v9 = vpop.eup %8332  ;;  %8344 = vpow2.f32 %v5498_v43  ;;  %v5552_v14 = vadd.f32 %v8331_v19, %v5551_v23  ;;  %v5524_v43 = vmul.f32 1.442695, %v10447_v37 }
 0xc2e   : > { %v8335_v26 = vpop.eup %8334  ;;  %8346 = vpow2.f32 %v5514_v29 }
 0xc2f   : > { %v5541_v58 = vadd.f32 %v8321_v45, %v5540_v10  ;;  %v8337_v18 = vpop.eup %8336  ;;  %8348 = vpow2.f32 %v5500_v51  ;;  %v5553_v27 = vadd.f32 %v8335_v26, %v5552_v14  ;;  %v10452_v45 = vsub.f32 %v10293_v0, %v10343_v46 }
 0xc30   : > { %v8339_v36 = vpop.eup %8338  ;;  %8350 = vpow2.f32 %v5516_v42  ;;  %v10462_v0 = vsub.f32 %v10301_v40, %v10343_v46  ;;  %v5528_v42 = vmul.f32 1.442695, %v10457_v34 }
 0xc31   : > { %v5542_v2 = vadd.f32 %v8323_v49, %v5541_v58  ;;  %v8341_v38 = vpop.eup %8340  ;;  %v5554_v33 = vadd.f32 %v8339_v36, %v5553_v27  ;;  %8352 = vpow2.f32 %v5518_v21  ;;  %v5526_v51 = vmul.f32 1.442695, %v10452_v45 }
 0xc32   : > { %v8343_v57 = vpop.eup %8342  ;;  %8354 = vpow2.f32 %v5520_v54  ;;  %v5530_v40 = vmul.f32 1.442695, %v10462_v0  ;;  %v5532_v21 = vmul.f32 1.442695, %v10467_v52 }
 0xc33   : > { %v5543_v17 = vadd.f32 %v8329_v61, %v5542_v2  ;;  %v8345_v10 = vpop.eup %8344  ;;  %v5555_v31 = vadd.f32 %v8343_v57, %v5554_v33  ;;  %8356 = vpow2.f32 %v5522_v47 }
 0xc34   : > { %v8347_v53 = vpop.eup %8346  ;;  %8358 = vpow2.f32 %v5524_v43 }
 0xc35   : > { %v5544_v56 = vadd.f32 %v8333_v9, %v5543_v17  ;;  %v8349_v58 = vpop.eup %8348  ;;  %v5556_v29 = vadd.f32 %v8347_v53, %v5555_v31  ;;  %8360 = vpow2.f32 %v5526_v51 }
 0xc36   : > { %v8351_v61 = vpop.eup %8350  ;;  %8362 = vpow2.f32 %v5528_v42 }
 0xc37   : > { %v5545_v24 = vadd.f32 %v8337_v18, %v5544_v56  ;;  %v5557_v23 = vadd.f32 %v8351_v61, %v5556_v29  ;;  %v8353_v19 = vpop.eup %8352  ;;  %8364 = vpow2.f32 %v5530_v40 }
 0xc38   : > { %v8355_v17 = vpop.eup %8354  ;;  %8366 = vpow2.f32 %v5532_v21 }
 0xc39   : > { %v5546_v49 = vadd.f32 %v8341_v38, %v5545_v24  ;;  %v5558_v9 = vadd.f32 %v8353_v19, %v5557_v23  ;;  %v8357_v26 = vpop.eup %8356 }
 0xc3a   : > { %v8359_v56 = vpop.eup %8358 }
 0xc3b   : > { %v5547_v59 = vadd.f32 %v8345_v10, %v5546_v49  ;;  %v5559_v14 = vadd.f32 %v8355_v17, %v5558_v9  ;;  %v8361_v15 = vpop.eup %8360 }
 0xc3c   : > { %v8363_v36 = vpop.eup %8362 }
 0xc3d   : > { %v5548_v2 = vadd.f32 %v8349_v58, %v5547_v59  ;;  %v5560_v18 = vadd.f32 %v8357_v26, %v5559_v14  ;;  %v8365_v38 = vpop.eup %8364 }
 0xc3e   : > { %v8367_v33 = vpop.eup %8366 }
 0xc3f   : > { %5549 = vadd.xlane.f32.xlu1 %v5548_v2  ;;  %v5561_v27 = vadd.f32 %v8359_v56, %v5560_v18 }
 0xc41   : > { %v5562_v46 = vadd.f32 %v8361_v15, %v5561_v27 }
 0xc43   : > { %v5563_v54 = vadd.f32 %v8363_v36, %v5562_v46 }
 0xc45   : > { %v5564_v24 = vadd.f32 %v8365_v38, %v5563_v54 }
 0xc47   : > { %v5565_v57 = vadd.f32 %v8367_v33, %v5564_v24 }
 0xc49   : > { %5566 = vadd.xlane.f32.xlu1 %v5565_v57 }
 0xcb2   : > { %v5550_v47 = vpop.xlane.xlu1 %5549 }
 0xcb3   : > { %8368 = vlog2.f32 %v5550_v47 }
 0xcb9   : > { %v8369_v10 = vpop.eup %8368 }
 0xcba   : > { %v5569_v49 = vmul.f32 0.6931472, %v8369_v10 }
 0xcbc   : > { %v5572_v31 = vsub.f32 %v10312_v48, %v5569_v49  ;;  %v5573_v53 = vsub.f32 %v10316_v62, %v5569_v49  ;;  %v5574_v43 = vsub.f32 %v10320_v1, %v5569_v49  ;;  %v5575_v58 = vsub.f32 %v10324_v32, %v5569_v49  ;;  %v5567_v62 = vpop.xlane.xlu1 %5566 }
 0xcbd   : > { %v5576_v59 = vsub.f32 %v10330_v50, %v5569_v49  ;;  %v5577_v29 = vsub.f32 %v10335_v3, %v5569_v49  ;;  %v5578_v61 = vsub.f32 %v10340_v55, %v5569_v49  ;;  %v5579_v51 = vsub.f32 %v10347_v63, %v5569_v49 }
 0xcbe   : > { %5604 = vst [vmem:[#allocation27] sm:$0xff] %v5572_v31  ;;  %v5580_v48 = vsub.f32 %v10352_v44, %v5569_v49  ;;  %v5581_v1 = vsub.f32 %v10356_v6, %v5569_v49  ;;  %8370 = vlog2.f32 %v5567_v62  ;;  %v5582_v32 = vsub.f32 %v10370_v13, %v5569_v49 }
 0xcbf   : > { %5605 = vst [vmem:[#allocation27 + $0x8] sm:$0xff] %v5573_v53  ;;  %v5583_v50 = vsub.f32 %v10380_v5, %v5569_v49  ;;  %v5584_v3 = vsub.f32 %v10390_v41, %v5569_v49  ;;  %v5585_v55 = vsub.f32 %v10400_v22, %v5569_v49  ;;  %v5586_v63 = vsub.f32 %v10410_v28, %v5569_v49 }
 0xcc0   : > { %5606 = vst [vmem:[#allocation27 + $0x10] sm:$0xff] %v5574_v43  ;;  %v5587_v6 = vsub.f32 %v10420_v4, %v5569_v49 }
 0xcc1   : > { %5607 = vst [vmem:[#allocation27 + $0x18] sm:$0xff] %v5575_v58 }
 0xcc2   : > { %5608 = vst [vmem:[#allocation27 + $0x20] sm:$0xff] %v5576_v59 }
 0xcc3   : > { %5609 = vst [vmem:[#allocation27 + $0x28] sm:$0xff] %v5577_v29 }
 0xcc4   : > { %5610 = vst [vmem:[#allocation27 + $0x30] sm:$0xff] %v5578_v61  ;;  %v8371_v44 = vpop.eup %8370 }
 0xcc5   : > { %5611 = vst [vmem:[#allocation27 + $0x38] sm:$0xff] %v5579_v51  ;;  %v5571_v2 = vmul.f32 0.6931472, %v8371_v44 }
 0xcc6   : > { %5612 = vst [vmem:[#allocation27 + $0x40] sm:$0xff] %v5580_v48 }
 0xcc7   : > { %5613 = vst [vmem:[#allocation27 + $0x48] sm:$0xff] %v5581_v1  ;;  %v5588_v13 = vsub.f32 %v10361_v60, %v5571_v2  ;;  %v5589_v5 = vsub.f32 %v10366_v12, %v5571_v2  ;;  %v5590_v41 = vsub.f32 %v10376_v20, %v5571_v2  ;;  %v5591_v22 = vsub.f32 %v10385_v8, %v5571_v2 }
 0xcc8   : > { %5614 = vst [vmem:[#allocation27 + $0x50] sm:$0xff] %v5582_v32  ;;  %v5592_v28 = vsub.f32 %v10395_v16, %v5571_v2  ;;  %v5593_v23 = vsub.f32 %v10405_v25, %v5571_v2  ;;  %v5594_v4 = vsub.f32 %v10415_v35, %v5571_v2  ;;  %v5595_v19 = vsub.f32 %v10425_v30, %v5571_v2 }
 0xcc9   : > { %5615 = vst [vmem:[#allocation27 + $0x58] sm:$0xff] %v5583_v50  ;;  %v5596_v60 = vsub.f32 %v10431_v39, %v5571_v2  ;;  %v5597_v12 = vsub.f32 %v10437_v7, %v5571_v2  ;;  %v5598_v20 = vsub.f32 %v10442_v11, %v5571_v2  ;;  %v5599_v8 = vsub.f32 %v10447_v37, %v5571_v2 }
 0xcca   : > { %5616 = vst [vmem:[#allocation27 + $0x60] sm:$0xff] %v5584_v3  ;;  %v5600_v16 = vsub.f32 %v10452_v45, %v5571_v2  ;;  %v5601_v25 = vsub.f32 %v10457_v34, %v5571_v2  ;;  %v5602_v35 = vsub.f32 %v10462_v0, %v5571_v2  ;;  %v5603_v30 = vsub.f32 %v10467_v52, %v5571_v2 }
 0xccb   : > { %5617 = vst [vmem:[#allocation27 + $0x68] sm:$0xff] %v5585_v55 }
 0xccc   : > { %5618 = vst [vmem:[#allocation27 + $0x70] sm:$0xff] %v5586_v63 }
 0xccd   : > { %5619 = vst [vmem:[#allocation27 + $0x78] sm:$0xff] %v5587_v6 }
 0xcce   : > { %5620 = vst [vmem:[#allocation27 + $0x80] sm:$0xff] %v5588_v13 }
 0xccf   : > { %5621 = vst [vmem:[#allocation27 + $0x88] sm:$0xff] %v5589_v5 }
 0xcd0   : > { %5622 = vst [vmem:[#allocation27 + $0x90] sm:$0xff] %v5590_v41 }
 0xcd1   : > { %5623 = vst [vmem:[#allocation27 + $0x98] sm:$0xff] %v5591_v22 }
 0xcd2   : > { %5624 = vst [vmem:[#allocation27 + $0xa0] sm:$0xff] %v5592_v28 }
 0xcd3   : > { %5625 = vst [vmem:[#allocation27 + $0xa8] sm:$0xff] %v5593_v23 }
 0xcd4   : > { %5626 = vst [vmem:[#allocation27 + $0xb0] sm:$0xff] %v5594_v4 }
 0xcd5   : > { %5627 = vst [vmem:[#allocation27 + $0xb8] sm:$0xff] %v5595_v19 }
 0xcd6   : > { %5628 = vst [vmem:[#allocation27 + $0xc0] sm:$0xff] %v5596_v60 }
 0xcd7   : > { %5629 = vst [vmem:[#allocation27 + $0xc8] sm:$0xff] %v5597_v12 }
 0xcd8   : > { %5630 = vst [vmem:[#allocation27 + $0xd0] sm:$0xff] %v5598_v20 }
 0xcd9   : > { %5631 = vst [vmem:[#allocation27 + $0xd8] sm:$0xff] %v5599_v8 }
 0xcda   : > { %5632 = vst [vmem:[#allocation27 + $0xe0] sm:$0xff] %v5600_v16 }
 0xcdb   : > { %5633 = vst [vmem:[#allocation27 + $0xe8] sm:$0xff] %v5601_v25 }
 0xcdc   : > { %5634 = vst [vmem:[#allocation27 + $0xf0] sm:$0xff] %v5602_v35 }
 0xcdd   : > { %5635 = vst [vmem:[#allocation27 + $0xf8] sm:$0xff] %v5603_v30 }
 0xcde PF: > { %s10589_s28 = sld [smem:[#allocation39_spill]]  ;;  %s8914_s5 = smov [#allocation27]  }
 0xcdf   : > { %s5641_s3 = sshll.u32 %s8914_s5, 4  ;;  %s10590_s14 = sld [smem:[#allocation50_spill]]  ;;  %s5642_s3 = int_to_ptr.vmem [resolvable:$true] %s5641_s3 }
 0xce0   : > { %s8915_s21 = smov 2048   ;;  %s8916_s23 = smov 128  }
 0xce4   : > { %p8132_p5 = scmp.eq.s32.totalorder %s10589_s28, 7 }
 0xce5   : > { %s5643_s20 = sshll.u32 %s10590_s14, 4  ;;  %s5644_s20 = int_to_ptr.hbm [resolvable:$true] %s5643_s20 }
 0xce6   : > { %8113 = dma.vmem_to_hbm [thread:$0]  (%p8132_p5), %s5642_s3, 4096, %s5644_s20, [#allocation5], %s8915_s21, %s8915_s21, %s8916_s23  }
 0xce7   : > { %8875 = dma.done.wait (%p8132_p5), [#allocation5], 4096  }
 0xce8   : > { %8877 = vsyncadd (%p8132_p5), [#allocation5], 4294963200 }
 0xce9 PF: > { %s10591_s21 = sld [smem:[#allocation40_spill]] }
 0xcea   : > { %s10592_s18 = sld [smem:[#allocation37_spill]] }
 0xceb   : > { %s10593_s19 = sld [smem:[#allocation38_spill]] }
 0xcec   : > { %s10594_s20 = sld [smem:[#allocation41_spill]] }
 0xcef   : > { %p43_p8 = scmp.ge.s32.totalorder %s10591_s21, 10  }
 0xcf1   :  { %45 = sbr.rel (!%p43_p8) target bundleno = 24 (0x18), region = 269 }
 0xcf6   :  { %5660 = vsyncpa [#allocation4], 1 }
 0xcf7   :  { %5662 = vsyncpa [#allocation4 + $0x1], 1 }
 0xcf8   :  { %5663 = vsyncpa [#allocation7], 1 }
 0xcf9   :  { %5665 = vsyncpa [#allocation7 + $0x1], 1 }
 0xcfa   :  { %5666 = vsyncpa [#allocation10], 1 }
 0xcfb   :  { %5668 = vsyncpa [#allocation10 + $0x1], 1 }
 0xcfc   :  { %5669 = vsyncpa [#allocation13], 1 }
 0xcfd   :  { %5671 = vsyncpa [#allocation13 + $0x1], 1 }
 0xcfe   :  { %5672 = vsyncpa [#allocation16], 1 }
 0xcff   :  { %5674 = vsyncpa [#allocation16 + $0x1], 1 }
 0xd00   :  { %5675 = vsyncpa [#allocation19], 1 }
 0xd01   :  { %5677 = vsyncpa [#allocation19 + $0x1], 1 }
 0xd02   :  { %5678 = vsyncpa [#allocation22], 1 }
 0xd03   :  { %5680 = vsyncpa [#allocation22 + $0x1], 1 }
 0xd04   :  { %5681 = vsyncpa [#allocation25], 1 }
 0xd05   :  { %5682 = vsyncpa [#allocation5], 1 }
 0xd06   :  { %5684 = vsyncpa [#allocation5 + $0x1], 1 }

</bundles_post_ra>
